<compile_context>
chip_gen: v6e
topology: v6e:2x2x1
jax: 0.10.0
libtpu: 0.0.40
codegen_flags: <defaults>
</compile_context>

<pallas_src>
import jax
import jax.numpy as jnp
from jax.experimental import pallas as pl
from jax.experimental.pallas import tpu as pltpu

EPS = 1e-5  # nn.InstanceNorm2d default eps, affine=False, biased variance


def _residual_block_kernel(x_ref, w1_ref, w2_ref, o_ref, pad_ref, patch_ref):
    _, H, W, C = x_ref.shape
    HW = H * W
    x = x_ref[0]                                       # (H, W, C) f32

    def reflect_pad(img):
        # ReflectionPad2d(1): write interior + mirrored edges straight into the
        # reused (H+2, W+2, C) VMEM scratch (no concatenates).
        pad_ref[1:H + 1, 1:W + 1, :] = img
        pad_ref[0:1, 1:W + 1, :] = img[1:2]                    # top    <- row 1
        pad_ref[H + 1:H + 2, 1:W + 1, :] = img[H - 2:H - 1]    # bottom <- row H-2
        # columns (corners handled since rows 0 / H+1 are already filled)
        pad_ref[:, 0:1, :] = pad_ref[:, 2:3, :]                # left   <- col 1
        pad_ref[:, W + 1:W + 2, :] = pad_ref[:, W - 1:W, :]    # right  <- col W-2

    def conv3x3(w_ref):
        # im2col into the reused (H*W, 9*C) scratch, then a single matmul with
        # K = 9*C and f32 accumulation on the MXU.
        for kh in range(3):
            for kw in range(3):
                t = kh * 3 + kw
                tap = pad_ref[kh:kh + H, kw:kw + W, :].reshape(HW, C)
                patch_ref[:, t * C:(t + 1) * C] = tap.astype(patch_ref.dtype)
        return jnp.dot(patch_ref[...], w_ref[...],
                       preferred_element_type=jnp.float32)     # (H*W, C) f32

    def instance_norm_stats(y):
        # single pass: sum and sum-of-squares, biased variance, one rsqrt/channel
        n = jnp.float32(HW)
        s1 = jnp.sum(y, axis=0, keepdims=True)
        s2 = jnp.sum(y * y, axis=0, keepdims=True)
        mu = s1 / n
        var = jnp.maximum(s2 / n - mu * mu, 0.0)
        return mu, jax.lax.rsqrt(var + EPS)

    # conv1 -> InstanceNorm -> ReLU (ReLU fused into the normalize multiply)
    reflect_pad(x)
    y1 = conv3x3(w1_ref)
    mu1, inv1 = instance_norm_stats(y1)
    h1 = jnp.maximum((y1 - mu1) * inv1, 0.0)

    # conv2 -> InstanceNorm
    reflect_pad(h1.reshape(H, W, C))
    y2 = conv3x3(w2_ref)
    mu2, inv2 = instance_norm_stats(y2)
    h2 = (y2 - mu2) * inv2

    o_ref[0] = x + h2.reshape(H, W, C)                 # residual add


def residual_block(x_nchw, w1_hwio, b1, w2_hwio, b2, *, use_bf16_mxu=False):
    """x_nchw: (B, C, H, W) f32.  Conv weights in HWIO (3, 3, C, C), biases (C,).

    Conv biases are mathematically no-ops under InstanceNorm2d(affine=False),
    so they are accepted for interface parity but not used by the kernel.
    """
    del b1, b2
    x = jnp.transpose(x_nchw, (0, 2, 3, 1))            # -> NHWC
    B, H, W, C = x.shape

    mxu_dtype = jnp.bfloat16 if use_bf16_mxu else jnp.float32
    # HWIO -> (9*C, C): row index = (kh*3 + kw)*C + ci, matching im2col columns.
    w1_2d = w1_hwio.reshape(9 * C, C).astype(mxu_dtype)
    w2_2d = w2_hwio.reshape(9 * C, C).astype(mxu_dtype)

    # rough per-step VMEM working set (double-buffered I/O + scratch), bytes
    ws = 4 * (2 * 2 * H * W * C + 2 * 2 * 9 * C * C
              + (H + 2) * (W + 2) * C + 9 * H * W * C)
    vmem_limit = int(min(48 * 1024 * 1024, max(32 * 1024 * 1024, 2 * ws)))

    out = pl.pallas_call(
        _residual_block_kernel,
        out_shape=jax.ShapeDtypeStruct((B, H, W, C), jnp.float32),
        grid_spec=pltpu.PrefetchScalarGridSpec(
            num_scalar_prefetch=0,
            grid=(B,),
            in_specs=[
                pl.BlockSpec((1, H, W, C), lambda b: (b, 0, 0, 0)),
                pl.BlockSpec((9 * C, C), lambda b: (0, 0)),
                pl.BlockSpec((9 * C, C), lambda b: (0, 0)),
            ],
            out_specs=pl.BlockSpec((1, H, W, C), lambda b: (b, 0, 0, 0)),
            scratch_shapes=[
                pltpu.VMEM((H + 2, W + 2, C), jnp.float32),   # reflection pad
                pltpu.VMEM((H * W, 9 * C), mxu_dtype),        # im2col patches
            ],
        ),
        compiler_params=pltpu.CompilerParams(
            dimension_semantics=("parallel",),
            vmem_limit_bytes=vmem_limit,
        ),
    )(x, w1_2d, w2_2d)

    return jnp.transpose(out, (0, 3, 1, 2))             # back to NCHW


def _ref_forward(x_nchw, w1, b1, w2, b2):
    # Pure-JAX reference (applies the biases; InstanceNorm cancels them).
    x = jnp.transpose(x_nchw, (0, 2, 3, 1))

    def conv(y, w, b):
        yp = jnp.pad(y, ((0, 0), (1, 1), (1, 1), (0, 0)), mode="reflect")
        out = jax.lax.conv_general_dilated(
            yp, w, (1, 1), "VALID",
            dimension_numbers=("NHWC", "HWIO", "NHWC"))
        return out + b[None, None, None, :]

    def inorm(y):
        mu = jnp.mean(y, axis=(1, 2), keepdims=True)
        var = jnp.mean(jnp.square(y - mu), axis=(1, 2), keepdims=True)
        return (y - mu) * jax.lax.rsqrt(var + EPS)

    h = conv(x, w1, b1)
    h = jnp.maximum(inorm(h), 0.0)
    h = conv(h, w2, b2)
    h = inorm(h)
    return jnp.transpose(x + h, (0, 3, 1, 2))


if __name__ == "__main__":
    B, C, H, W = 2, 4, 16, 16
    key = jax.random.PRNGKey(0)
    kx, kw1, kb1, kw2, kb2 = jax.random.split(key, 5)

    x = jax.random.normal(kx, (B, C, H, W), dtype=jnp.float32)
    # Conv2d(C, C, 3) params stored as HWIO (kh, kw, Cin, Cout).
    w1 = 0.1 * jax.random.normal(kw1, (3, 3, C, C), dtype=jnp.float32)
    b1 = 0.01 * jax.random.normal(kb1, (C,), dtype=jnp.float32)
    w2 = 0.1 * jax.random.normal(kw2, (3, 3, C, C), dtype=jnp.float32)
    b2 = 0.01 * jax.random.normal(kb2, (C,), dtype=jnp.float32)

    y = jax.block_until_ready(residual_block(x, w1, b1, w2, b2))
    y_ref = _ref_forward(x, w1, b1, w2, b2)
    assert y.shape == (B, C, H, W)
    assert jnp.allclose(y, y_ref, atol=1e-4, rtol=1e-4), "mismatch vs reference"
    print("KERNEL_OK")
</pallas_src>

<mosaic_0001>
module attributes {stable_mosaic.version = 11 : i64} {
  func.func @_residual_block_kernel(%arg0: i32, %arg1: memref<1x16x16x4xf32, #tpu.memory_space<vmem>>, %arg2: memref<36x4xf32, #tpu.memory_space<vmem>>, %arg3: memref<36x4xf32, #tpu.memory_space<vmem>>, %arg4: memref<1x16x16x4xf32, #tpu.memory_space<vmem>>, %arg5: memref<18x18x4xf32, #tpu.memory_space<vmem>>, %arg6: memref<256x36xf32, #tpu.memory_space<vmem>>) attributes {dimension_semantics = [#tpu.dimension_semantics<parallel>], iteration_bounds = array<i64: 2>, scalar_prefetch = 0 : i64, scratch_operands = 2 : i64, tpu.core_type = #tpu.core_type<tc>, window_params = [{transform_indices = @transform_0, window_bounds = array<i64: 1, 16, 16, 4>}, {pipeline_mode = #tpu.pipeline_mode<synchronous>, transform_indices = @transform_1, window_bounds = array<i64: 36, 4>}, {pipeline_mode = #tpu.pipeline_mode<synchronous>, transform_indices = @transform_2, window_bounds = array<i64: 36, 4>}, {transform_indices = @transform_3, window_bounds = array<i64: 1, 16, 16, 4>}]} {
    %c0 = arith.constant 0 : index
    %c0_0 = arith.constant 0 : index
    %c0_1 = arith.constant 0 : index
    %c0_2 = arith.constant 0 : index
    %0 = vector.load %arg1[%c0, %c0_0, %c0_1, %c0_2] : memref<1x16x16x4xf32, #tpu.memory_space<vmem>>, vector<1x16x16x4xf32>
    %1 = vector.shape_cast %0 : vector<1x16x16x4xf32> to vector<16x16x4xf32>
    %c1 = arith.constant 1 : index
    %c1_3 = arith.constant 1 : index
    %c0_4 = arith.constant 0 : index
    %2 = vector.load %arg5[%c1, %c1_3, %c0_4] : memref<18x18x4xf32, #tpu.memory_space<vmem>>, vector<16x16x4xf32>
    tpu.vector_store %arg5[%c1, %c1_3, %c0_4], %1 {strides = array<i32>} : memref<18x18x4xf32, #tpu.memory_space<vmem>>, vector<16x16x4xf32>,
    %3 = vector.extract_strided_slice %1 {offsets = [1, 0, 0], sizes = [1, 16, 4], strides = [1, 1, 1]} : vector<16x16x4xf32> to vector<1x16x4xf32>
    %c0_5 = arith.constant 0 : index
    %c1_6 = arith.constant 1 : index
    %c0_7 = arith.constant 0 : index
    %4 = vector.load %arg5[%c0_5, %c1_6, %c0_7] : memref<18x18x4xf32, #tpu.memory_space<vmem>>, vector<1x16x4xf32>
    tpu.vector_store %arg5[%c0_5, %c1_6, %c0_7], %3 {strides = array<i32>} : memref<18x18x4xf32, #tpu.memory_space<vmem>>, vector<1x16x4xf32>,
    %5 = vector.extract_strided_slice %1 {offsets = [14, 0, 0], sizes = [1, 16, 4], strides = [1, 1, 1]} : vector<16x16x4xf32> to vector<1x16x4xf32>
    %c17 = arith.constant 17 : index
    %c1_8 = arith.constant 1 : index
    %c0_9 = arith.constant 0 : index
    %6 = vector.load %arg5[%c17, %c1_8, %c0_9] : memref<18x18x4xf32, #tpu.memory_space<vmem>>, vector<1x16x4xf32>
    tpu.vector_store %arg5[%c17, %c1_8, %c0_9], %5 {strides = array<i32>} : memref<18x18x4xf32, #tpu.memory_space<vmem>>, vector<1x16x4xf32>,
    %c0_10 = arith.constant 0 : index
    %c2 = arith.constant 2 : index
    %c0_11 = arith.constant 0 : index
    %7 = vector.load %arg5[%c0_10, %c2, %c0_11] : memref<18x18x4xf32, #tpu.memory_space<vmem>>, vector<18x1x4xf32>
    %c0_12 = arith.constant 0 : index
    %c0_13 = arith.constant 0 : index
    %c0_14 = arith.constant 0 : index
    %8 = vector.load %arg5[%c0_12, %c0_13, %c0_14] : memref<18x18x4xf32, #tpu.memory_space<vmem>>, vector<18x1x4xf32>
    tpu.vector_store %arg5[%c0_12, %c0_13, %c0_14], %7 {strides = array<i32>} : memref<18x18x4xf32, #tpu.memory_space<vmem>>, vector<18x1x4xf32>,
    %c0_15 = arith.constant 0 : index
    %c15 = arith.constant 15 : index
    %c0_16 = arith.constant 0 : index
    %9 = vector.load %arg5[%c0_15, %c15, %c0_16] : memref<18x18x4xf32, #tpu.memory_space<vmem>>, vector<18x1x4xf32>
    %c0_17 = arith.constant 0 : index
    %c17_18 = arith.constant 17 : index
    %c0_19 = arith.constant 0 : index
    %10 = vector.load %arg5[%c0_17, %c17_18, %c0_19] : memref<18x18x4xf32, #tpu.memory_space<vmem>>, vector<18x1x4xf32>
    tpu.vector_store %arg5[%c0_17, %c17_18, %c0_19], %9 {strides = array<i32>} : memref<18x18x4xf32, #tpu.memory_space<vmem>>, vector<18x1x4xf32>,
    %c0_20 = arith.constant 0 : index
    %c0_21 = arith.constant 0 : index
    %c0_22 = arith.constant 0 : index
    %11 = vector.load %arg5[%c0_20, %c0_21, %c0_22] : memref<18x18x4xf32, #tpu.memory_space<vmem>>, vector<16x16x4xf32>
    %12 = vector.shape_cast %11 : vector<16x16x4xf32> to vector<256x4xf32>
    %c0_23 = arith.constant 0 : index
    %c0_24 = arith.constant 0 : index
    %13 = vector.load %arg6[%c0_23, %c0_24] : memref<256x36xf32, #tpu.memory_space<vmem>>, vector<256x4xf32>
    tpu.vector_store %arg6[%c0_23, %c0_24], %12 {strides = array<i32>} : memref<256x36xf32, #tpu.memory_space<vmem>>, vector<256x4xf32>,
    %c0_25 = arith.constant 0 : index
    %c1_26 = arith.constant 1 : index
    %c0_27 = arith.constant 0 : index
    %14 = vector.load %arg5[%c0_25, %c1_26, %c0_27] : memref<18x18x4xf32, #tpu.memory_space<vmem>>, vector<16x16x4xf32>
    %15 = vector.shape_cast %14 : vector<16x16x4xf32> to vector<256x4xf32>
    %c0_28 = arith.constant 0 : index
    %c4 = arith.constant 4 : index
    %16 = vector.load %arg6[%c0_28, %c4] : memref<256x36xf32, #tpu.memory_space<vmem>>, vector<256x4xf32>
    tpu.vector_store %arg6[%c0_28, %c4], %15 {strides = array<i32>} : memref<256x36xf32, #tpu.memory_space<vmem>>, vector<256x4xf32>,
    %c0_29 = arith.constant 0 : index
    %c2_30 = arith.constant 2 : index
    %c0_31 = arith.constant 0 : index
    %17 = vector.load %arg5[%c0_29, %c2_30, %c0_31] : memref<18x18x4xf32, #tpu.memory_space<vmem>>, vector<16x16x4xf32>
    %18 = vector.shape_cast %17 : vector<16x16x4xf32> to vector<256x4xf32>
    %c0_32 = arith.constant 0 : index
    %c8 = arith.constant 8 : index
    %19 = vector.load %arg6[%c0_32, %c8] : memref<256x36xf32, #tpu.memory_space<vmem>>, vector<256x4xf32>
    tpu.vector_store %arg6[%c0_32, %c8], %18 {strides = array<i32>} : memref<256x36xf32, #tpu.memory_space<vmem>>, vector<256x4xf32>,
    %c1_33 = arith.constant 1 : index
    %c0_34 = arith.constant 0 : index
    %c0_35 = arith.constant 0 : index
    %20 = vector.load %arg5[%c1_33, %c0_34, %c0_35] : memref<18x18x4xf32, #tpu.memory_space<vmem>>, vector<16x16x4xf32>
    %21 = vector.shape_cast %20 : vector<16x16x4xf32> to vector<256x4xf32>
    %c0_36 = arith.constant 0 : index
    %c12 = arith.constant 12 : index
    %22 = vector.load %arg6[%c0_36, %c12] : memref<256x36xf32, #tpu.memory_space<vmem>>, vector<256x4xf32>
    tpu.vector_store %arg6[%c0_36, %c12], %21 {strides = array<i32>} : memref<256x36xf32, #tpu.memory_space<vmem>>, vector<256x4xf32>,
    %c1_37 = arith.constant 1 : index
    %c1_38 = arith.constant 1 : index
    %c0_39 = arith.constant 0 : index
    %23 = vector.load %arg5[%c1_37, %c1_38, %c0_39] : memref<18x18x4xf32, #tpu.memory_space<vmem>>, vector<16x16x4xf32>
    %24 = vector.shape_cast %23 : vector<16x16x4xf32> to vector<256x4xf32>
    %c0_40 = arith.constant 0 : index
    %c16 = arith.constant 16 : index
    %25 = vector.load %arg6[%c0_40, %c16] : memref<256x36xf32, #tpu.memory_space<vmem>>, vector<256x4xf32>
    tpu.vector_store %arg6[%c0_40, %c16], %24 {strides = array<i32>} : memref<256x36xf32, #tpu.memory_space<vmem>>, vector<256x4xf32>,
    %c1_41 = arith.constant 1 : index
    %c2_42 = arith.constant 2 : index
    %c0_43 = arith.constant 0 : index
    %26 = vector.load %arg5[%c1_41, %c2_42, %c0_43] : memref<18x18x4xf32, #tpu.memory_space<vmem>>, vector<16x16x4xf32>
    %27 = vector.shape_cast %26 : vector<16x16x4xf32> to vector<256x4xf32>
    %c0_44 = arith.constant 0 : index
    %c20 = arith.constant 20 : index
    %28 = vector.load %arg6[%c0_44, %c20] : memref<256x36xf32, #tpu.memory_space<vmem>>, vector<256x4xf32>
    tpu.vector_store %arg6[%c0_44, %c20], %27 {strides = array<i32>} : memref<256x36xf32, #tpu.memory_space<vmem>>, vector<256x4xf32>,
    %c2_45 = arith.constant 2 : index
    %c0_46 = arith.constant 0 : index
    %c0_47 = arith.constant 0 : index
    %29 = vector.load %arg5[%c2_45, %c0_46, %c0_47] : memref<18x18x4xf32, #tpu.memory_space<vmem>>, vector<16x16x4xf32>
    %30 = vector.shape_cast %29 : vector<16x16x4xf32> to vector<256x4xf32>
    %c0_48 = arith.constant 0 : index
    %c24 = arith.constant 24 : index
    %31 = vector.load %arg6[%c0_48, %c24] : memref<256x36xf32, #tpu.memory_space<vmem>>, vector<256x4xf32>
    tpu.vector_store %arg6[%c0_48, %c24], %30 {strides = array<i32>} : memref<256x36xf32, #tpu.memory_space<vmem>>, vector<256x4xf32>,
    %c2_49 = arith.constant 2 : index
    %c1_50 = arith.constant 1 : index
    %c0_51 = arith.constant 0 : index
    %32 = vector.load %arg5[%c2_49, %c1_50, %c0_51] : memref<18x18x4xf32, #tpu.memory_space<vmem>>, vector<16x16x4xf32>
    %33 = vector.shape_cast %32 : vector<16x16x4xf32> to vector<256x4xf32>
    %c0_52 = arith.constant 0 : index
    %c28 = arith.constant 28 : index
    %34 = vector.load %arg6[%c0_52, %c28] : memref<256x36xf32, #tpu.memory_space<vmem>>, vector<256x4xf32>
    tpu.vector_store %arg6[%c0_52, %c28], %33 {strides = array<i32>} : memref<256x36xf32, #tpu.memory_space<vmem>>, vector<256x4xf32>,
    %c2_53 = arith.constant 2 : index
    %c2_54 = arith.constant 2 : index
    %c0_55 = arith.constant 0 : index
    %35 = vector.load %arg5[%c2_53, %c2_54, %c0_55] : memref<18x18x4xf32, #tpu.memory_space<vmem>>, vector<16x16x4xf32>
    %36 = vector.shape_cast %35 : vector<16x16x4xf32> to vector<256x4xf32>
    %c0_56 = arith.constant 0 : index
    %c32 = arith.constant 32 : index
    %37 = vector.load %arg6[%c0_56, %c32] : memref<256x36xf32, #tpu.memory_space<vmem>>, vector<256x4xf32>
    tpu.vector_store %arg6[%c0_56, %c32], %36 {strides = array<i32>} : memref<256x36xf32, #tpu.memory_space<vmem>>, vector<256x4xf32>,
    %c0_57 = arith.constant 0 : index
    %c0_58 = arith.constant 0 : index
    %38 = vector.load %arg6[%c0_57, %c0_58] : memref<256x36xf32, #tpu.memory_space<vmem>>, vector<256x36xf32>
    %c0_59 = arith.constant 0 : index
    %c0_60 = arith.constant 0 : index
    %39 = vector.load %arg2[%c0_59, %c0_60] : memref<36x4xf32, #tpu.memory_space<vmem>>, vector<36x4xf32>
    %cst = arith.constant dense<0.000000e+00> : vector<256x4xf32>
    %40 = tpu.matmul %38, %39, %cst {dimension_numbers = #tpu.dot_dimension_numbers<[1], [0], [0], [1], [0, 0, 1, 1], [], []>} : vector<256x36xf32>, vector<36x4xf32>, vector<256x4xf32> -> vector<256x4xf32>
    %cst_61 = arith.constant dense<0.000000e+00> : vector<4xf32>
    %41 = vector.multi_reduction <add>, %40, %cst_61 [0] : vector<256x4xf32> to vector<4xf32>
    %42 = vector.shape_cast %41 : vector<4xf32> to vector<1x4xf32>
    %43 = arith.mulf %40, %40 : vector<256x4xf32>
    %cst_62 = arith.constant dense<0.000000e+00> : vector<4xf32>
    %44 = vector.multi_reduction <add>, %43, %cst_62 [0] : vector<256x4xf32> to vector<4xf32>
    %45 = vector.shape_cast %44 : vector<4xf32> to vector<1x4xf32>
    %cst_63 = arith.constant 2.560000e+02 : f32
    %46 = vector.broadcast %cst_63 : f32 to vector<1x4xf32>
    %47 = arith.divf %42, %46 : vector<1x4xf32>
    %cst_64 = arith.constant 2.560000e+02 : f32
    %48 = vector.broadcast %cst_64 : f32 to vector<1x4xf32>
    %49 = arith.divf %45, %48 : vector<1x4xf32>
    %50 = arith.mulf %47, %47 : vector<1x4xf32>
    %51 = arith.subf %49, %50 : vector<1x4xf32>
    %cst_65 = arith.constant 0.000000e+00 : f32
    %52 = vector.broadcast %cst_65 : f32 to vector<1x4xf32>
    %53 = arith.maximumf %51, %52 : vector<1x4xf32>
    %cst_66 = arith.constant 9.99999974E-6 : f32
    %54 = vector.broadcast %cst_66 : f32 to vector<1x4xf32>
    %55 = arith.addf %53, %54 : vector<1x4xf32>
    %56 = math.rsqrt %55 : vector<1x4xf32>
    %57 = vector.broadcast %47 : vector<1x4xf32> to vector<256x4xf32>
    %58 = arith.subf %40, %57 : vector<256x4xf32>
    %59 = vector.broadcast %56 : vector<1x4xf32> to vector<256x4xf32>
    %60 = arith.mulf %58, %59 : vector<256x4xf32>
    %cst_67 = arith.constant 0.000000e+00 : f32
    %61 = vector.broadcast %cst_67 : f32 to vector<256x4xf32>
    %62 = arith.maximumf %60, %61 : vector<256x4xf32>
    %63 = vector.shape_cast %62 : vector<256x4xf32> to vector<16x16x4xf32>
    %c1_68 = arith.constant 1 : index
    %c1_69 = arith.constant 1 : index
    %c0_70 = arith.constant 0 : index
    %64 = vector.load %arg5[%c1_68, %c1_69, %c0_70] : memref<18x18x4xf32, #tpu.memory_space<vmem>>, vector<16x16x4xf32>
    tpu.vector_store %arg5[%c1_68, %c1_69, %c0_70], %63 {strides = array<i32>} : memref<18x18x4xf32, #tpu.memory_space<vmem>>, vector<16x16x4xf32>,
    %65 = vector.extract_strided_slice %63 {offsets = [1, 0, 0], sizes = [1, 16, 4], strides = [1, 1, 1]} : vector<16x16x4xf32> to vector<1x16x4xf32>
    %c0_71 = arith.constant 0 : index
    %c1_72 = arith.constant 1 : index
    %c0_73 = arith.constant 0 : index
    %66 = vector.load %arg5[%c0_71, %c1_72, %c0_73] : memref<18x18x4xf32, #tpu.memory_space<vmem>>, vector<1x16x4xf32>
    tpu.vector_store %arg5[%c0_71, %c1_72, %c0_73], %65 {strides = array<i32>} : memref<18x18x4xf32, #tpu.memory_space<vmem>>, vector<1x16x4xf32>,
    %67 = vector.extract_strided_slice %63 {offsets = [14, 0, 0], sizes = [1, 16, 4], strides = [1, 1, 1]} : vector<16x16x4xf32> to vector<1x16x4xf32>
    %c17_74 = arith.constant 17 : index
    %c1_75 = arith.constant 1 : index
    %c0_76 = arith.constant 0 : index
    %68 = vector.load %arg5[%c17_74, %c1_75, %c0_76] : memref<18x18x4xf32, #tpu.memory_space<vmem>>, vector<1x16x4xf32>
    tpu.vector_store %arg5[%c17_74, %c1_75, %c0_76], %67 {strides = array<i32>} : memref<18x18x4xf32, #tpu.memory_space<vmem>>, vector<1x16x4xf32>,
    %c0_77 = arith.constant 0 : index
    %c2_78 = arith.constant 2 : index
    %c0_79 = arith.constant 0 : index
    %69 = vector.load %arg5[%c0_77, %c2_78, %c0_79] : memref<18x18x4xf32, #tpu.memory_space<vmem>>, vector<18x1x4xf32>
    %c0_80 = arith.constant 0 : index
    %c0_81 = arith.constant 0 : index
    %c0_82 = arith.constant 0 : index
    %70 = vector.load %arg5[%c0_80, %c0_81, %c0_82] : memref<18x18x4xf32, #tpu.memory_space<vmem>>, vector<18x1x4xf32>
    tpu.vector_store %arg5[%c0_80, %c0_81, %c0_82], %69 {strides = array<i32>} : memref<18x18x4xf32, #tpu.memory_space<vmem>>, vector<18x1x4xf32>,
    %c0_83 = arith.constant 0 : index
    %c15_84 = arith.constant 15 : index
    %c0_85 = arith.constant 0 : index
    %71 = vector.load %arg5[%c0_83, %c15_84, %c0_85] : memref<18x18x4xf32, #tpu.memory_space<vmem>>, vector<18x1x4xf32>
    %c0_86 = arith.constant 0 : index
    %c17_87 = arith.constant 17 : index
    %c0_88 = arith.constant 0 : index
    %72 = vector.load %arg5[%c0_86, %c17_87, %c0_88] : memref<18x18x4xf32, #tpu.memory_space<vmem>>, vector<18x1x4xf32>
    tpu.vector_store %arg5[%c0_86, %c17_87, %c0_88], %71 {strides = array<i32>} : memref<18x18x4xf32, #tpu.memory_space<vmem>>, vector<18x1x4xf32>,
    %c0_89 = arith.constant 0 : index
    %c0_90 = arith.constant 0 : index
    %c0_91 = arith.constant 0 : index
    %73 = vector.load %arg5[%c0_89, %c0_90, %c0_91] : memref<18x18x4xf32, #tpu.memory_space<vmem>>, vector<16x16x4xf32>
    %74 = vector.shape_cast %73 : vector<16x16x4xf32> to vector<256x4xf32>
    %c0_92 = arith.constant 0 : index
    %c0_93 = arith.constant 0 : index
    %75 = vector.load %arg6[%c0_92, %c0_93] : memref<256x36xf32, #tpu.memory_space<vmem>>, vector<256x4xf32>
    tpu.vector_store %arg6[%c0_92, %c0_93], %74 {strides = array<i32>} : memref<256x36xf32, #tpu.memory_space<vmem>>, vector<256x4xf32>,
    %c0_94 = arith.constant 0 : index
    %c1_95 = arith.constant 1 : index
    %c0_96 = arith.constant 0 : index
    %76 = vector.load %arg5[%c0_94, %c1_95, %c0_96] : memref<18x18x4xf32, #tpu.memory_space<vmem>>, vector<16x16x4xf32>
    %77 = vector.shape_cast %76 : vector<16x16x4xf32> to vector<256x4xf32>
    %c0_97 = arith.constant 0 : index
    %c4_98 = arith.constant 4 : index
    %78 = vector.load %arg6[%c0_97, %c4_98] : memref<256x36xf32, #tpu.memory_space<vmem>>, vector<256x4xf32>
    tpu.vector_store %arg6[%c0_97, %c4_98], %77 {strides = array<i32>} : memref<256x36xf32, #tpu.memory_space<vmem>>, vector<256x4xf32>,
    %c0_99 = arith.constant 0 : index
    %c2_100 = arith.constant 2 : index
    %c0_101 = arith.constant 0 : index
    %79 = vector.load %arg5[%c0_99, %c2_100, %c0_101] : memref<18x18x4xf32, #tpu.memory_space<vmem>>, vector<16x16x4xf32>
    %80 = vector.shape_cast %79 : vector<16x16x4xf32> to vector<256x4xf32>
    %c0_102 = arith.constant 0 : index
    %c8_103 = arith.constant 8 : index
    %81 = vector.load %arg6[%c0_102, %c8_103] : memref<256x36xf32, #tpu.memory_space<vmem>>, vector<256x4xf32>
    tpu.vector_store %arg6[%c0_102, %c8_103], %80 {strides = array<i32>} : memref<256x36xf32, #tpu.memory_space<vmem>>, vector<256x4xf32>,
    %c1_104 = arith.constant 1 : index
    %c0_105 = arith.constant 0 : index
    %c0_106 = arith.constant 0 : index
    %82 = vector.load %arg5[%c1_104, %c0_105, %c0_106] : memref<18x18x4xf32, #tpu.memory_space<vmem>>, vector<16x16x4xf32>
    %83 = vector.shape_cast %82 : vector<16x16x4xf32> to vector<256x4xf32>
    %c0_107 = arith.constant 0 : index
    %c12_108 = arith.constant 12 : index
    %84 = vector.load %arg6[%c0_107, %c12_108] : memref<256x36xf32, #tpu.memory_space<vmem>>, vector<256x4xf32>
    tpu.vector_store %arg6[%c0_107, %c12_108], %83 {strides = array<i32>} : memref<256x36xf32, #tpu.memory_space<vmem>>, vector<256x4xf32>,
    %c1_109 = arith.constant 1 : index
    %c1_110 = arith.constant 1 : index
    %c0_111 = arith.constant 0 : index
    %85 = vector.load %arg5[%c1_109, %c1_110, %c0_111] : memref<18x18x4xf32, #tpu.memory_space<vmem>>, vector<16x16x4xf32>
    %86 = vector.shape_cast %85 : vector<16x16x4xf32> to vector<256x4xf32>
    %c0_112 = arith.constant 0 : index
    %c16_113 = arith.constant 16 : index
    %87 = vector.load %arg6[%c0_112, %c16_113] : memref<256x36xf32, #tpu.memory_space<vmem>>, vector<256x4xf32>
    tpu.vector_store %arg6[%c0_112, %c16_113], %86 {strides = array<i32>} : memref<256x36xf32, #tpu.memory_space<vmem>>, vector<256x4xf32>,
    %c1_114 = arith.constant 1 : index
    %c2_115 = arith.constant 2 : index
    %c0_116 = arith.constant 0 : index
    %88 = vector.load %arg5[%c1_114, %c2_115, %c0_116] : memref<18x18x4xf32, #tpu.memory_space<vmem>>, vector<16x16x4xf32>
    %89 = vector.shape_cast %88 : vector<16x16x4xf32> to vector<256x4xf32>
    %c0_117 = arith.constant 0 : index
    %c20_118 = arith.constant 20 : index
    %90 = vector.load %arg6[%c0_117, %c20_118] : memref<256x36xf32, #tpu.memory_space<vmem>>, vector<256x4xf32>
    tpu.vector_store %arg6[%c0_117, %c20_118], %89 {strides = array<i32>} : memref<256x36xf32, #tpu.memory_space<vmem>>, vector<256x4xf32>,
    %c2_119 = arith.constant 2 : index
    %c0_120 = arith.constant 0 : index
    %c0_121 = arith.constant 0 : index
    %91 = vector.load %arg5[%c2_119, %c0_120, %c0_121] : memref<18x18x4xf32, #tpu.memory_space<vmem>>, vector<16x16x4xf32>
    %92 = vector.shape_cast %91 : vector<16x16x4xf32> to vector<256x4xf32>
    %c0_122 = arith.constant 0 : index
    %c24_123 = arith.constant 24 : index
    %93 = vector.load %arg6[%c0_122, %c24_123] : memref<256x36xf32, #tpu.memory_space<vmem>>, vector<256x4xf32>
    tpu.vector_store %arg6[%c0_122, %c24_123], %92 {strides = array<i32>} : memref<256x36xf32, #tpu.memory_space<vmem>>, vector<256x4xf32>,
    %c2_124 = arith.constant 2 : index
    %c1_125 = arith.constant 1 : index
    %c0_126 = arith.constant 0 : index
    %94 = vector.load %arg5[%c2_124, %c1_125, %c0_126] : memref<18x18x4xf32, #tpu.memory_space<vmem>>, vector<16x16x4xf32>
    %95 = vector.shape_cast %94 : vector<16x16x4xf32> to vector<256x4xf32>
    %c0_127 = arith.constant 0 : index
    %c28_128 = arith.constant 28 : index
    %96 = vector.load %arg6[%c0_127, %c28_128] : memref<256x36xf32, #tpu.memory_space<vmem>>, vector<256x4xf32>
    tpu.vector_store %arg6[%c0_127, %c28_128], %95 {strides = array<i32>} : memref<256x36xf32, #tpu.memory_space<vmem>>, vector<256x4xf32>,
    %c2_129 = arith.constant 2 : index
    %c2_130 = arith.constant 2 : index
    %c0_131 = arith.constant 0 : index
    %97 = vector.load %arg5[%c2_129, %c2_130, %c0_131] : memref<18x18x4xf32, #tpu.memory_space<vmem>>, vector<16x16x4xf32>
    %98 = vector.shape_cast %97 : vector<16x16x4xf32> to vector<256x4xf32>
    %c0_132 = arith.constant 0 : index
    %c32_133 = arith.constant 32 : index
    %99 = vector.load %arg6[%c0_132, %c32_133] : memref<256x36xf32, #tpu.memory_space<vmem>>, vector<256x4xf32>
    tpu.vector_store %arg6[%c0_132, %c32_133], %98 {strides = array<i32>} : memref<256x36xf32, #tpu.memory_space<vmem>>, vector<256x4xf32>,
    %c0_134 = arith.constant 0 : index
    %c0_135 = arith.constant 0 : index
    %100 = vector.load %arg6[%c0_134, %c0_135] : memref<256x36xf32, #tpu.memory_space<vmem>>, vector<256x36xf32>
    %c0_136 = arith.constant 0 : index
    %c0_137 = arith.constant 0 : index
    %101 = vector.load %arg3[%c0_136, %c0_137] : memref<36x4xf32, #tpu.memory_space<vmem>>, vector<36x4xf32>
    %cst_138 = arith.constant dense<0.000000e+00> : vector<256x4xf32>
    %102 = tpu.matmul %100, %101, %cst_138 {dimension_numbers = #tpu.dot_dimension_numbers<[1], [0], [0], [1], [0, 0, 1, 1], [], []>} : vector<256x36xf32>, vector<36x4xf32>, vector<256x4xf32> -> vector<256x4xf32>
    %cst_139 = arith.constant dense<0.000000e+00> : vector<4xf32>
    %103 = vector.multi_reduction <add>, %102, %cst_139 [0] : vector<256x4xf32> to vector<4xf32>
    %104 = vector.shape_cast %103 : vector<4xf32> to vector<1x4xf32>
    %105 = arith.mulf %102, %102 : vector<256x4xf32>
    %cst_140 = arith.constant dense<0.000000e+00> : vector<4xf32>
    %106 = vector.multi_reduction <add>, %105, %cst_140 [0] : vector<256x4xf32> to vector<4xf32>
    %107 = vector.shape_cast %106 : vector<4xf32> to vector<1x4xf32>
    %cst_141 = arith.constant 2.560000e+02 : f32
    %108 = vector.broadcast %cst_141 : f32 to vector<1x4xf32>
    %109 = arith.divf %104, %108 : vector<1x4xf32>
    %cst_142 = arith.constant 2.560000e+02 : f32
    %110 = vector.broadcast %cst_142 : f32 to vector<1x4xf32>
    %111 = arith.divf %107, %110 : vector<1x4xf32>
    %112 = arith.mulf %109, %109 : vector<1x4xf32>
    %113 = arith.subf %111, %112 : vector<1x4xf32>
    %cst_143 = arith.constant 0.000000e+00 : f32
    %114 = vector.broadcast %cst_143 : f32 to vector<1x4xf32>
    %115 = arith.maximumf %113, %114 : vector<1x4xf32>
    %cst_144 = arith.constant 9.99999974E-6 : f32
    %116 = vector.broadcast %cst_144 : f32 to vector<1x4xf32>
    %117 = arith.addf %115, %116 : vector<1x4xf32>
    %118 = math.rsqrt %117 : vector<1x4xf32>
    %119 = vector.broadcast %109 : vector<1x4xf32> to vector<256x4xf32>
    %120 = arith.subf %102, %119 : vector<256x4xf32>
    %121 = vector.broadcast %118 : vector<1x4xf32> to vector<256x4xf32>
    %122 = arith.mulf %120, %121 : vector<256x4xf32>
    %123 = vector.shape_cast %122 : vector<256x4xf32> to vector<16x16x4xf32>
    %124 = arith.addf %1, %123 : vector<16x16x4xf32>
    %c0_145 = arith.constant 0 : index
    %c0_146 = arith.constant 0 : index
    %c0_147 = arith.constant 0 : index
    %c0_148 = arith.constant 0 : index
    %125 = vector.load %arg4[%c0_145, %c0_146, %c0_147, %c0_148] : memref<1x16x16x4xf32, #tpu.memory_space<vmem>>, vector<1x16x16x4xf32>
    %126 = vector.shape_cast %125 : vector<1x16x16x4xf32> to vector<16x16x4xf32>
    %127 = vector.shape_cast %124 : vector<16x16x4xf32> to vector<1x16x16x4xf32>
    tpu.vector_store %arg4[%c0_145, %c0_146, %c0_147, %c0_148], %127 {strides = array<i32>} : memref<1x16x16x4xf32, #tpu.memory_space<vmem>>, vector<1x16x16x4xf32>,
    return
  }
  func.func @transform_0(%arg0: i32) -> (i32, i32, i32, i32) {
    %c0_i32 = arith.constant 0 : i32
    %c0_i32_0 = arith.constant 0 : i32
    %c0_i32_1 = arith.constant 0 : i32
    %c0_i32_2 = arith.constant 0 : i32
    return %arg0, %c0_i32, %c0_i32_0, %c0_i32_1 : i32, i32, i32, i32
  }
  func.func @transform_1(%arg0: i32) -> (i32, i32) {
    %c0_i32 = arith.constant 0 : i32
    %c0_i32_0 = arith.constant 0 : i32
    %c0_i32_1 = arith.constant 0 : i32
    return %c0_i32, %c0_i32_0 : i32, i32
  }
  func.func @transform_2(%arg0: i32) -> (i32, i32) {
    %c0_i32 = arith.constant 0 : i32
    %c0_i32_0 = arith.constant 0 : i32
    %c0_i32_1 = arith.constant 0 : i32
    return %c0_i32, %c0_i32_0 : i32, i32
  }
  func.func @transform_3(%arg0: i32) -> (i32, i32, i32, i32) {
    %c0_i32 = arith.constant 0 : i32
    %c0_i32_0 = arith.constant 0 : i32
    %c0_i32_1 = arith.constant 0 : i32
    %c0_i32_2 = arith.constant 0 : i32
    return %arg0, %c0_i32, %c0_i32_0, %c0_i32_1 : i32, i32, i32, i32
  }
}

</mosaic_0001>

<bundles_post_ra>
// kernel: tpu_custom_call.1
= control target key start
LH: loop header
LB: loop body
LE: loop exit
PB: predicated region body
PF: predicated region fallthrough
CT: control target
= control target key end

     0   :  { %s5315_s12 = smov 0   ;;  %s8062_s0 = inlined_call_operand.vmem [shape: f32[2,16,16,4], index: 0, kind: input, shape index: {}]   ;;  %s8063_s1 = inlined_call_operand.vmem [shape: f32[36,4], index: 1, kind: input, shape index: {}]   ;;  %s8064_s2 = inlined_call_operand.vmem [shape: f32[36,4], index: 2, kind: input, shape index: {}]   ;;  %s8065_s3 = inlined_call_operand.vmem [shape: f32[2,16,16,4], index: 3, kind: output, shape index: {}]  }
   0x1 LB: > { %s4990_s13 = sadd.s32 4294967295, %s5285_s12   ;;  %p4994_p0 = scmp.ge.s32.totalorder %s5285_s12, 1  ;;  %s5285_s12 = sphi %s5315_s12, %s13_s12  }
   0x2   : > { %p137_p1 = scmp.lt.s32.totalorder %s5285_s12, 3 }
   0x4   : > { %p138_p2 = pnand %p4994_p0, %p137_p1 }
   0x6   : > { %141 = sbr.rel (%p138_p2) target bundleno = 1813 (0x715), region = 32 }
   0xb   : > { %p161_p3 = scmp.lt.s32.totalorder %s4990_s13, 1  ;;  %vm204_vm0 = vcmask 31744   ;;  %s5287_s18 = smov 4   ;;  %vm260_vm1 = vcmask 24576   ;;  %vm539_vm2 = vcmask 64544   ;;  %vm732_vm3 = vcmask 97344  }
   0xc   : > { %s5288_s19 = smov 8   ;;  %s5289_s20 = smov 12   ;;  %vm925_vm4 = vcmask 130144   ;;  %vm2058_vm5 = vcmask 1043456   ;;  %vm1118_vm6 = vcmask 162944   ;;  %vm1311_vm7 = vcmask 195744  }
   0xd   : > { %s8201_s13 = smov (!%p161_p3, %s4990_s13), 1  ;;  %s5290_s21 = smov 16   ;;  %vm1505_vm8 = vcmask 228544   ;;  %vm1698_vm9 = vcmask 261344   ;;  %vm1891_vm10 = vcmask 294144   ;;  %vm1961_vm11 = vcmask 293888  }
   0xe   : > { %s5067_s14 = sshll.u32 %s8201_s13, 8  ;;  %s5291_s22 = smov 20  }
   0xf   : > { %s5331_s17 = scalar_lea.vmem %s8062_s0, %s5067_s14  ;;  %s5292_s4 = smov 24  }
  0x10   : > { %v5334_v0 = vld [vmem:[%s5331_s17 + $0x10] sm:$0xff]  ;;  %v5337_v1 = vld [vmem:[%s5331_s17] sm:$0xff]  ;;  %v5340_v2 = vld [vmem:[%s5331_s17 + $0x18] sm:$0xff]  ;;  %s5293_s7 = smov 28   ;;  %s5294_s8 = smov 32  }
  0x11   : > { %8112 = vst [vmem:[#allocation4_spill] sm:$0xff] %v5334_v0  ;;  %8113 = vst [vmem:[#allocation5_spill] sm:$0xff] %v5337_v1  ;;  %v5353_v3 = vld [vmem:[%s5331_s17 + $0x8] sm:$0xff]  ;;  %v5356_v4 = vld [vmem:[%s5331_s17 + $0x20] sm:$0xff] }
  0x12   : > { %8114 = vst [vmem:[#allocation6_spill] sm:$0xff] %v5340_v2  ;;  %237 = vst.msk [vmem:[#allocation2 + $0x1] sm:$0xff] %vm204_vm0, %v5334_v0  ;;  %v5359_v5 = vld [vmem:[%s5331_s17 + $0x28] sm:$0xff]  ;;  %v5368_v6 = vld [vmem:[%s5331_s17 + $0x30] sm:$0xff] }
  0x13   : > { %207 = vst.msk [vmem:[#allocation2 + $0x31] sm:$0xff] %vm204_vm0, %v5334_v0  ;;  %205 = vst.msk [vmem:[#allocation2 + $0x19] sm:$0xff] %vm204_vm0, %v5337_v1  ;;  %v5371_v7 = vld [vmem:[%s5331_s17 + $0x38] sm:$0xff]  ;;  %v5374_v8 = vld [vmem:[%s5331_s17 + $0x40] sm:$0xff] }
  0x14   : > { %238 = vst.msk [vmem:[#allocation2 + $0x9] sm:$0xff] %vm204_vm0, %v5340_v2  ;;  %208 = vst.msk [vmem:[#allocation2 + $0x39] sm:$0xff] %vm204_vm0, %v5340_v2  ;;  %v5383_v9 = vld [vmem:[%s5331_s17 + $0x48] sm:$0xff]  ;;  %v5386_v10 = vld [vmem:[%s5331_s17 + $0x50] sm:$0xff] }
  0x15   : > { %8115 = vst [vmem:[#allocation7_spill] sm:$0xff] %v5353_v3  ;;  %8116 = vst [vmem:[#allocation8_spill] sm:$0xff] %v5356_v4  ;;  %v5389_v11 = vld [vmem:[%s5331_s17 + $0x58] sm:$0xff]  ;;  %v5398_v12 = vld [vmem:[%s5331_s17 + $0x60] sm:$0xff] }
  0x16   : > { %8117 = vst [vmem:[#allocation9_spill] sm:$0xff] %v5359_v5  ;;  %206 = vst.msk [vmem:[#allocation2 + $0x21] sm:$0xff] %vm204_vm0, %v5353_v3  ;;  %v5401_v13 = vld [vmem:[%s5331_s17 + $0x68] sm:$0xff]  ;;  %v5404_v14 = vld [vmem:[%s5331_s17 + $0x70] sm:$0xff] }
  0x17   : > { %209 = vst.msk [vmem:[#allocation2 + $0x49] sm:$0xff] %vm204_vm0, %v5356_v4  ;;  %210 = vst.msk [vmem:[#allocation2 + $0x51] sm:$0xff] %vm204_vm0, %v5359_v5  ;;  %v5413_v15 = vld [vmem:[%s5331_s17 + $0x78] sm:$0xff]  ;;  %v5416_v16 = vld [vmem:[%s5331_s17 + $0x80] sm:$0xff] }
  0x18   : > { %8118 = vst [vmem:[#allocation10_spill] sm:$0xff] %v5368_v6  ;;  %8119 = vst [vmem:[#allocation11_spill] sm:$0xff] %v5371_v7  ;;  %v5419_v17 = vld [vmem:[%s5331_s17 + $0x88] sm:$0xff]  ;;  %v5428_v18 = vld [vmem:[%s5331_s17 + $0x90] sm:$0xff] }
  0x19   : > { %8120 = vst [vmem:[#allocation12_spill] sm:$0xff] %v5374_v8  ;;  %211 = vst.msk [vmem:[#allocation2 + $0x61] sm:$0xff] %vm204_vm0, %v5368_v6  ;;  %v5431_v19 = vld [vmem:[%s5331_s17 + $0x98] sm:$0xff]  ;;  %v5434_v20 = vld [vmem:[%s5331_s17 + $0xa0] sm:$0xff] }
  0x1a   : > { %212 = vst.msk [vmem:[#allocation2 + $0x69] sm:$0xff] %vm204_vm0, %v5371_v7  ;;  %213 = vst.msk [vmem:[#allocation2 + $0x79] sm:$0xff] %vm204_vm0, %v5374_v8  ;;  %v5443_v21 = vld [vmem:[%s5331_s17 + $0xa8] sm:$0xff]  ;;  %v5446_v22 = vld [vmem:[%s5331_s17 + $0xb0] sm:$0xff] }
  0x1b   : > { %8121 = vst [vmem:[#allocation13_spill] sm:$0xff] %v5383_v9  ;;  %8122 = vst [vmem:[#allocation14_spill] sm:$0xff] %v5386_v10  ;;  %v5449_v23 = vld [vmem:[%s5331_s17 + $0xb8] sm:$0xff]  ;;  %v379_v24 = vld [vmem:[#allocation2 + $0x1] sm:$0xff] }
  0x1c   : > { %8123 = vst [vmem:[#allocation15_spill] sm:$0xff] %v5389_v11  ;;  %214 = vst.msk [vmem:[#allocation2 + $0x81] sm:$0xff] %vm204_vm0, %v5383_v9  ;;  %v5451_v25 = vld [vmem:[#allocation2 + $0x19] sm:$0xff]  ;;  %443 = vrot.lane.b32.xlu0 %v379_v24, %s5287_s18  ;;  %v380_v26 = vld [vmem:[#allocation2 + $0x9] sm:$0xff] }
  0x1d   : > { %215 = vst.msk [vmem:[#allocation2 + $0x91] sm:$0xff] %vm204_vm0, %v5386_v10  ;;  %216 = vst.msk [vmem:[#allocation2 + $0x99] sm:$0xff] %vm204_vm0, %v5389_v11  ;;  %447 = vrot.lane.b32.xlu1 %v5451_v25, %s5287_s18  ;;  %v5462_v27 = vld [vmem:[#allocation2 + $0x21] sm:$0xff]  ;;  %v5467_v28 = vld [vmem:[#allocation2 + $0x31] sm:$0xff] }
  0x1e   : > { %8124 = vst [vmem:[#allocation16_spill] sm:$0xff] %v5398_v12  ;;  %8125 = vst [vmem:[#allocation17_spill] sm:$0xff] %v5401_v13  ;;  %v5469_v29 = vld [vmem:[#allocation2 + $0x39] sm:$0xff]  ;;  %v5471_v30 = vld [vmem:[#allocation2 + $0x49] sm:$0xff] }
  0x1f   : > { %8126 = vst [vmem:[#allocation18_spill] sm:$0xff] %v5404_v14  ;;  %217 = vst.msk [vmem:[#allocation2 + $0xa9] sm:$0xff] %vm204_vm0, %v5398_v12  ;;  %v5474_v31 = vld [vmem:[%s5331_s17 + $0xc0] sm:$0xff]  ;;  %v5480_v32 = vld [vmem:[#allocation2 + $0x51] sm:$0xff] }
  0x20   : > { %218 = vst.msk [vmem:[#allocation2 + $0xb1] sm:$0xff] %vm204_vm0, %v5401_v13  ;;  %219 = vst.msk [vmem:[#allocation2 + $0xc1] sm:$0xff] %vm204_vm0, %v5404_v14  ;;  %445 = vrot.lane.b32.xlu0 %v380_v26, %s5287_s18  ;;  %v5485_v33 = vld [vmem:[%s5331_s17 + $0xc8] sm:$0xff]  ;;  %v5488_v34 = vld [vmem:[%s5331_s17 + $0xd0] sm:$0xff] }
  0x21   : > { %8127 = vst [vmem:[#allocation19_spill] sm:$0xff] %v5413_v15  ;;  %8128 = vst [vmem:[#allocation20_spill] sm:$0xff] %v5416_v16  ;;  %449 = vrot.lane.b32.xlu1 %v5462_v27, %s5287_s18  ;;  %v5495_v35 = vld [vmem:[%s5331_s17 + $0xd8] sm:$0xff]  ;;  %v5498_v36 = vld [vmem:[%s5331_s17 + $0xe0] sm:$0xff] }
  0x22   : > { %8129 = vst [vmem:[#allocation21_spill] sm:$0xff] %v5419_v17  ;;  %220 = vst.msk [vmem:[#allocation2 + $0xc9] sm:$0xff] %vm204_vm0, %v5413_v15  ;;  %v5501_v37 = vld [vmem:[%s5331_s17 + $0xe8] sm:$0xff]  ;;  %v280_v39 = vld [vmem:[#allocation2 + $0x27] sm:$0x1] }
  0x23   : > { %221 = vst.msk [vmem:[#allocation2 + $0xd9] sm:$0xff] %vm204_vm0, %v5416_v16  ;;  %222 = vst.msk [vmem:[#allocation2 + $0xe1] sm:$0xff] %vm204_vm0, %v5419_v17  ;;  %v279_v38 = vld [vmem:[#allocation2 + $0xf] sm:$0x1]  ;;  %v281_v40 = vld [vmem:[#allocation2 + $0x3f] sm:$0x1] }
  0x24   : > { %8130 = vst [vmem:[#allocation22_spill] sm:$0xff] %v5428_v18  ;;  %8131 = vst [vmem:[#allocation23_spill] sm:$0xff] %v5431_v19  ;;  %451 = vrot.lane.b32.xlu0 %v5467_v28, %s5287_s18  ;;  %v282_v41 = vld [vmem:[#allocation2 + $0x57] sm:$0x1]  ;;  %v283_v42 = vld [vmem:[#allocation2 + $0x6f] sm:$0x1] }
  0x25   : > { %8132 = vst [vmem:[#allocation24_spill] sm:$0xff] %v5434_v20  ;;  %223 = vst.msk [vmem:[#allocation2 + $0xf1] sm:$0xff] %vm204_vm0, %v5428_v18  ;;  %453 = vrot.lane.b32.xlu1 %v5469_v29, %s5287_s18  ;;  %v5520_v43 = vld [vmem:[#allocation2 + $0x61] sm:$0xff]  ;;  %v5522_v44 = vld [vmem:[#allocation2 + $0x69] sm:$0xff] }
  0x26   : > { %224 = vst.msk [vmem:[#allocation2 + $0xf9] sm:$0xff] %vm204_vm0, %v5431_v19  ;;  %225 = vst.msk [vmem:[#allocation2 + $0x109] sm:$0xff] %vm204_vm0, %v5434_v20  ;;  %v284_v45 = vld [vmem:[#allocation2 + $0x87] sm:$0x1]  ;;  %v285_v46 = vld [vmem:[#allocation2 + $0x9f] sm:$0x1] }
  0x27   : > { %8133 = vst [vmem:[#allocation25_spill] sm:$0xff] %v5443_v21  ;;  %8134 = vst [vmem:[#allocation26_spill] sm:$0xff] %v5446_v22  ;;  %v286_v47 = vld [vmem:[#allocation2 + $0xb7] sm:$0x1]  ;;  %v5534_v49 = vld [vmem:[#allocation2 + $0x79] sm:$0xff] }
  0x28   : > { %8135 = vst [vmem:[#allocation27_spill] sm:$0xff] %v5449_v23  ;;  %226 = vst.msk [vmem:[#allocation2 + $0x111] sm:$0xff] %vm204_vm0, %v5443_v21  ;;  %455 = vrot.lane.b32.xlu0 %v5471_v30, %s5287_s18  ;;  %v5536_v50 = vld [vmem:[#allocation2 + $0x81] sm:$0xff]  ;;  %v5544_v53 = vld [vmem:[#allocation2 + $0x91] sm:$0xff] }
  0x29   : > { %227 = vst.msk [vmem:[#allocation2 + $0x121] sm:$0xff] %vm204_vm0, %v5446_v22  ;;  %228 = vst.msk [vmem:[#allocation2 + $0x129] sm:$0xff] %vm204_vm0, %v5449_v23  ;;  %457 = vrot.lane.b32.xlu1 %v5480_v32, %s5287_s18  ;;  %v287_v48 = vld [vmem:[#allocation2 + $0xcf] sm:$0x1]  ;;  %v5546_v54 = vld [vmem:[#allocation2 + $0x99] sm:$0xff] }
  0x2a   : > { %8136 = vst [vmem:[#allocation28_spill] sm:$0xff] %v5474_v31  ;;  %229 = vst.msk [vmem:[#allocation2 + $0x139] sm:$0xff] %vm204_vm0, %v5474_v31  ;;  %v288_v51 = vld [vmem:[#allocation2 + $0xe7] sm:$0x1]  ;;  %v242_v57 = vld [vmem:[#allocation2 + $0x2] sm:$0x1] }
  0x2b   : > { %8137 = vst [vmem:[#allocation29_spill] sm:$0xff] %v5485_v33  ;;  %8138 = vst [vmem:[#allocation30_spill] sm:$0xff] %v5488_v34  ;;  %v243_v58 = vld [vmem:[#allocation2 + $0x1a] sm:$0x1]  ;;  %v5554_v59 = vld [vmem:[#allocation2 + $0xa9] sm:$0xff] }
  0x2c   : > { %230 = vst.msk [vmem:[#allocation2 + $0x141] sm:$0xff] %vm204_vm0, %v5485_v33  ;;  %231 = vst.msk [vmem:[#allocation2 + $0x151] sm:$0xff] %vm204_vm0, %v5488_v34  ;;  %459 = vrot.lane.b32.xlu0 %v5520_v43, %s5287_s18  ;;  %v316_v61 = vld [vmem:[#allocation2 + $0x8] sm:$0xff]  ;;  %v5558_v62 = vld [vmem:[#allocation2 + $0xb1] sm:$0xff] }
  0x2d   : > { %8139 = vst [vmem:[#allocation31_spill] sm:$0xff] %v5495_v35  ;;  %8140 = vst [vmem:[#allocation32_spill] sm:$0xff] %v5498_v36  ;;  %461 = vrot.lane.b32.xlu1 %v5522_v44, %s5287_s18  ;;  %v289_v52 = vld [vmem:[#allocation2 + $0xff] sm:$0x1]  ;;  %v5562_v63 = vld [vmem:[#allocation2 + $0x20] sm:$0xff] }
  0x2e   : > { %8141 = vst [vmem:[#allocation33_spill] sm:$0xff] %v5501_v37  ;;  %232 = vst.msk [vmem:[#allocation2 + $0x159] sm:$0xff] %vm204_vm0, %v5495_v35  ;;  %v244_v26 = vld [vmem:[#allocation2 + $0x32] sm:$0x1]  ;;  %v5758_v6 = vld [vmem:[%s5331_s17 + $0xf8] sm:$0xff] }
  0x2f   : > { %233 = vst.msk [vmem:[#allocation2 + $0x169] sm:$0xff] %vm204_vm0, %v5498_v36  ;;  %240 = vst.msk [vmem:[#allocation2 + $0x199] sm:$0xff] %vm204_vm0, %v5498_v36  ;;  %v290_v55 = vld [vmem:[#allocation2 + $0x117] sm:$0x1] }
  0x30   : > { %234 = vst.msk [vmem:[#allocation2 + $0x171] sm:$0xff] %vm204_vm0, %v5501_v37  ;;  %241 = vst.msk [vmem:[#allocation2 + $0x1a1] sm:$0xff] %vm204_vm0, %v5501_v37  ;;  %463 = vrot.lane.b32.xlu0 %v5534_v49, %s5287_s18  ;;  %v291_v56 = vld [vmem:[#allocation2 + $0x12f] sm:$0x1]  ;;  %v5657_v34 = vld [vmem:[#allocation2 + $0x110] sm:$0xff] }
  0x31   : > { %297 = vst.msk [vmem:[#allocation2 + $0x11] sm:$0x1] %vm260_vm1, %v279_v38  ;;  %298 = vst.msk [vmem:[#allocation2 + $0x29] sm:$0x1] %vm260_vm1, %v280_v39  ;;  %465 = vrot.lane.b32.xlu1 %v5536_v50, %s5287_s18  ;;  %v5567_v38 = vld [vmem:[#allocation2 + $0x38] sm:$0xff]  ;;  %v5569_v39 = vld [vmem:[#allocation2 + $0xc1] sm:$0xff] }
  0x32   : > { %299 = vst.msk [vmem:[#allocation2 + $0x41] sm:$0x1] %vm260_vm1, %v281_v40  ;;  %300 = vst.msk [vmem:[#allocation2 + $0x59] sm:$0x1] %vm260_vm1, %v282_v41  ;;  %v245_v41 = vld [vmem:[#allocation2 + $0x4a] sm:$0x1] }
  0x33   : > { %301 = vst.msk [vmem:[#allocation2 + $0x71] sm:$0x1] %vm260_vm1, %v283_v42  ;;  %302 = vst.msk [vmem:[#allocation2 + $0x89] sm:$0x1] %vm260_vm1, %v284_v45  ;;  %v292_v60 = vld [vmem:[#allocation2 + $0x147] sm:$0x1] }
  0x34   : > { %303 = vst.msk [vmem:[#allocation2 + $0xa1] sm:$0x1] %vm260_vm1, %v285_v46  ;;  %304 = vst.msk [vmem:[#allocation2 + $0xb9] sm:$0x1] %vm260_vm1, %v286_v47  ;;  %467 = vrot.lane.b32.xlu0 %v5544_v53, %s5287_s18  ;;  %v5579_v42 = vld [vmem:[#allocation2 + $0x50] sm:$0xff]  ;;  %v5587_v47 = vld [vmem:[#allocation2 + $0x68] sm:$0xff] }
  0x35   : > { %305 = vst.msk [vmem:[#allocation2 + $0xd1] sm:$0x1] %vm260_vm1, %v287_v48  ;;  %306 = vst.msk [vmem:[#allocation2 + $0xe9] sm:$0x1] %vm260_vm1, %v288_v51  ;;  %469 = vrot.lane.b32.xlu1 %v5546_v54, %s5287_s18  ;;  %v293_v24 = vld [vmem:[#allocation2 + $0x15f] sm:$0x1] }
  0x36   : > { %307 = vst.msk [vmem:[#allocation2 + $0x101] sm:$0x1] %vm260_vm1, %v289_v52  ;;  %308 = vst.msk [vmem:[#allocation2 + $0x119] sm:$0x1] %vm260_vm1, %v290_v55  ;;  %v246_v45 = vld [vmem:[#allocation2 + $0x62] sm:$0x1] }
  0x37   : > { %309 = vst.msk [vmem:[#allocation2 + $0x131] sm:$0x1] %vm260_vm1, %v291_v56  ;;  %261 = vst.msk [vmem:[#allocation2] sm:$0x1] %vm260_vm1, %v242_v57  ;;  %v294_v40 = vld [vmem:[#allocation2 + $0x177] sm:$0x1] }
  0x38   : > { %262 = vst.msk [vmem:[#allocation2 + $0x18] sm:$0x1] %vm260_vm1, %v243_v58  ;;  %310 = vst.msk [vmem:[#allocation2 + $0x149] sm:$0x1] %vm260_vm1, %v292_v60  ;;  %471 = vrot.lane.b32.xlu0 %v5554_v59, %s5287_s18  ;;  %v5581_v46 = vld [vmem:[#allocation2 + $0xc9] sm:$0xff]  ;;  %v5592_v51 = vld [vmem:[#allocation2 + $0x80] sm:$0xff] }
  0x39   : > { %348 = vst.msk [vmem:[#allocation3 + $0x8] sm:$0xff] %vm204_vm0, %v316_v61  ;;  %350 = vst.msk [vmem:[#allocation3 + $0x18] sm:$0xff] %vm204_vm0, %v5562_v63  ;;  %473 = vrot.lane.b32.xlu1 %v5558_v62, %s5287_s18  ;;  %v247_v48 = vld [vmem:[#allocation2 + $0x7a] sm:$0x1]  ;;  %v248_v52 = vld [vmem:[#allocation2 + $0x92] sm:$0x1] }
  0x3a   : > { %311 = vst.msk [vmem:[#allocation2 + $0x161] sm:$0x1] %vm260_vm1, %v293_v24  ;;  %263 = vst.msk [vmem:[#allocation2 + $0x30] sm:$0x1] %vm260_vm1, %v244_v26  ;;  %v5599_v57 = vld [vmem:[#allocation2 + $0x98] sm:$0xff]  ;;  %v5612_v61 = vld [vmem:[#allocation2 + $0xb0] sm:$0xff] }
  0x3b   : > { %352 = vst.msk [vmem:[#allocation3 + $0x28] sm:$0xff] %vm204_vm0, %v5567_v38  ;;  %354 = vst.msk [vmem:[#allocation3 + $0x38] sm:$0xff] %vm204_vm0, %v5579_v42  ;;  %v5605_v58 = vld [vmem:[#allocation2 + $0xd9] sm:$0xff]  ;;  %v249_v60 = vld [vmem:[#allocation2 + $0xaa] sm:$0x1] }
  0x3c   : > { %312 = vst.msk [vmem:[#allocation2 + $0x179] sm:$0x1] %vm260_vm1, %v294_v40  ;;  %264 = vst.msk [vmem:[#allocation2 + $0x48] sm:$0x1] %vm260_vm1, %v245_v41  ;;  %475 = vrot.lane.b32.xlu0 %v5569_v39, %s5287_s18  ;;  %v5614_v24 = vld [vmem:[#allocation2 + $0xe1] sm:$0xff]  ;;  %v5687_v20 = vld [vmem:[#allocation2 + $0x111] sm:$0xff] }
  0x3d   : > { %265 = vst.msk [vmem:[#allocation2 + $0x60] sm:$0x1] %vm260_vm1, %v246_v45  ;;  %266 = vst.msk [vmem:[#allocation2 + $0x78] sm:$0x1] %vm260_vm1, %v247_v48  ;;  %477 = vrot.lane.b32.xlu1 %v5581_v46, %s5287_s18  ;;  %v250_v26 = vld [vmem:[#allocation2 + $0xc2] sm:$0x1] }
  0x3e   : > { %356 = vst.msk [vmem:[#allocation3 + $0x48] sm:$0xff] %vm204_vm0, %v5587_v47  ;;  %v315_v55 = vld [vmem:[#allocation2] sm:$0xff]  ;;  %358 = vst.msk [vmem:[#allocation3 + $0x58] sm:$0xff] %vm204_vm0, %v5592_v51  ;;  %v5619_v40 = vld [vmem:[#allocation2 + $0xc8] sm:$0xff] }
  0x3f   : > { %v5594_v56 = vld [vmem:[#allocation2 + $0x18] sm:$0xff]  ;;  %267 = vst.msk [vmem:[#allocation2 + $0x90] sm:$0x1] %vm260_vm1, %v248_v52  ;;  %268 = vst.msk [vmem:[#allocation2 + $0xa8] sm:$0x1] %vm260_vm1, %v249_v60  ;;  %v5626_v48 = vld [vmem:[#allocation2 + $0xe0] sm:$0xff] }
  0x40   : > { %347 = vst.msk [vmem:[#allocation3] sm:$0xff] %vm204_vm0, %v315_v55  ;;  %349 = vst.msk [vmem:[#allocation3 + $0x10] sm:$0xff] %vm204_vm0, %v5594_v56  ;;  %v251_v45 = vld [vmem:[#allocation2 + $0xda] sm:$0x1]  ;;  %v5628_v52 = vld [vmem:[#allocation2 + $0xf1] sm:$0xff]  ;;  %479 = vrot.lane.b32.xlu0 %v5605_v58, %s5287_s18 }
  0x41   : > { %360 = vst.msk [vmem:[#allocation3 + $0x68] sm:$0xff] %vm204_vm0, %v5599_v57  ;;  %362 = vst.msk [vmem:[#allocation3 + $0x78] sm:$0xff] %vm204_vm0, %v5612_v61  ;;  %v5621_v41 = vld [vmem:[#allocation2 + $0x30] sm:$0xff]  ;;  %v5630_v55 = vld [vmem:[#allocation2 + $0xf9] sm:$0xff]  ;;  %481 = vrot.lane.b32.xlu1 %v5614_v24, %s5287_s18 }
  0x42   : > { %269 = vst.msk [vmem:[#allocation2 + $0xc0] sm:$0x1] %vm260_vm1, %v250_v26  ;;  %270 = vst.msk [vmem:[#allocation2 + $0xd8] sm:$0x1] %vm260_vm1, %v251_v45  ;;  %v252_v60 = vld [vmem:[#allocation2 + $0xf2] sm:$0x1] }
  0x43   : > { %364 = vst.msk [vmem:[#allocation3 + $0x88] sm:$0xff] %vm204_vm0, %v5619_v40  ;;  %351 = vst.msk [vmem:[#allocation3 + $0x20] sm:$0xff] %vm204_vm0, %v5621_v41  ;;  %v5637_v26 = vld [vmem:[#allocation2 + $0xf8] sm:$0xff]  ;;  %v5643_v37 = vld [vmem:[#allocation2 + $0x48] sm:$0xff] }
  0x44   : > { %366 = vst.msk [vmem:[#allocation3 + $0x98] sm:$0xff] %vm204_vm0, %v5626_v48  ;;  %v5645_v36 = vld [vmem:[#allocation2 + $0x60] sm:$0xff]  ;;  %368 = vst.msk [vmem:[#allocation3 + $0xa8] sm:$0xff] %vm204_vm0, %v5637_v26  ;;  %v253_v45 = vld [vmem:[#allocation2 + $0x10a] sm:$0x1]  ;;  %483 = vrot.lane.b32.xlu0 %v5628_v52, %s5287_s18 }
  0x45   : > { %271 = vst.msk [vmem:[#allocation2 + $0xf0] sm:$0x1] %vm260_vm1, %v252_v60  ;;  %v5654_v35 = vld [vmem:[#allocation2 + $0x78] sm:$0xff]  ;;  %272 = vst.msk [vmem:[#allocation2 + $0x108] sm:$0x1] %vm260_vm1, %v253_v45  ;;  %v5666_v31 = vld [vmem:[#allocation2 + $0x128] sm:$0xff]  ;;  %485 = vrot.lane.b32.xlu1 %v5630_v55, %s5287_s18 }
  0x46   : > { %353 = vst.msk [vmem:[#allocation3 + $0x30] sm:$0xff] %vm204_vm0, %v5643_v37  ;;  %355 = vst.msk [vmem:[#allocation3 + $0x40] sm:$0xff] %vm204_vm0, %v5645_v36  ;;  %v254_v33 = vld [vmem:[#allocation2 + $0x122] sm:$0x1]  ;;  %v5661_v60 = vld [vmem:[#allocation2 + $0x90] sm:$0xff] }
  0x47   : > { %357 = vst.msk [vmem:[#allocation3 + $0x50] sm:$0xff] %vm204_vm0, %v5654_v35  ;;  %370 = vst.msk [vmem:[#allocation3 + $0xb8] sm:$0xff] %vm204_vm0, %v5657_v34  ;;  %v255_v23 = vld [vmem:[#allocation2 + $0x13a] sm:$0x1]  ;;  %v5673_v45 = vld [vmem:[#allocation2 + $0x140] sm:$0xff] }
  0x48   : > { %273 = vst.msk [vmem:[#allocation2 + $0x120] sm:$0x1] %vm260_vm1, %v254_v33  ;;  %274 = vst.msk [vmem:[#allocation2 + $0x138] sm:$0x1] %vm260_vm1, %v255_v23  ;;  %v256_v22 = vld [vmem:[#allocation2 + $0x152] sm:$0x1] }
  0x49   : > { %359 = vst.msk [vmem:[#allocation3 + $0x60] sm:$0xff] %vm204_vm0, %v5661_v60  ;;  %372 = vst.msk [vmem:[#allocation3 + $0xc8] sm:$0xff] %vm204_vm0, %v5666_v31  ;;  %v257_v21 = vld [vmem:[#allocation2 + $0x16a] sm:$0x1]  ;;  %v5691_v19 = vld [vmem:[#allocation2 + $0xc0] sm:$0xff]  ;;  %489 = vrot.lane.b32.xlu1 %v5687_v20, %s5287_s18 }
  0x4a   : > { %v5679_v33 = vld [vmem:[#allocation2 + $0xa8] sm:$0xff]  ;;  %374 = vst.msk [vmem:[#allocation3 + $0xd8] sm:$0xff] %vm204_vm0, %v5673_v45  ;;  %363 = vst.msk [vmem:[#allocation3 + $0x80] sm:$0xff] %vm204_vm0, %v5691_v19  ;;  %v5695_v18 = vld [vmem:[#allocation2 + $0xd8] sm:$0xff] }
  0x4b   : > { %275 = vst.msk [vmem:[#allocation2 + $0x150] sm:$0x1] %vm260_vm1, %v256_v22  ;;  %276 = vst.msk [vmem:[#allocation2 + $0x168] sm:$0x1] %vm260_vm1, %v257_v21  ;;  %v5685_v23 = vld [vmem:[#allocation2 + $0x109] sm:$0xff]  ;;  %v5697_v17 = vld [vmem:[#allocation2 + $0x158] sm:$0xff] }
  0x4c   : > { %361 = vst.msk [vmem:[#allocation3 + $0x70] sm:$0xff] %vm204_vm0, %v5679_v33  ;;  %365 = vst.msk [vmem:[#allocation3 + $0x90] sm:$0xff] %vm204_vm0, %v5695_v18  ;;  %v5701_v21 = vld [vmem:[#allocation2 + $0xf0] sm:$0xff]  ;;  %487 = vrot.lane.b32.xlu0 %v5685_v23, %s5287_s18  ;;  %v5714_v16 = vld [vmem:[#allocation2 + $0x108] sm:$0xff] }
  0x4d   : > { %376 = vst.msk [vmem:[#allocation3 + $0xe8] sm:$0xff] %vm204_vm0, %v5697_v17  ;;  %v5706_v22 = vld [vmem:[%s5331_s17 + $0xf0] sm:$0xff]  ;;  %367 = vst.msk [vmem:[#allocation3 + $0xa0] sm:$0xff] %vm204_vm0, %v5701_v21  ;;  %v5718_v15 = vld [vmem:[#allocation2 + $0x121] sm:$0xff] }
  0x4e   : > { %8142 = vst [vmem:[#allocation34_spill] sm:$0xff] %v5706_v22  ;;  %235 = vst.msk [vmem:[#allocation2 + $0x181] sm:$0xff] %vm204_vm0, %v5706_v22  ;;  %v5720_v14 = vld [vmem:[#allocation2 + $0x129] sm:$0xff]  ;;  %v5748_v9 = vld [vmem:[#allocation2 + $0x139] sm:$0xff] }
  0x4f   : > { %369 = vst.msk [vmem:[#allocation3 + $0xb0] sm:$0xff] %vm204_vm0, %v5714_v16  ;;  %v5724_v13 = vld [vmem:[#allocation2 + $0x120] sm:$0xff]  ;;  %v5728_v12 = vld [vmem:[#allocation2 + $0x138] sm:$0xff]  ;;  %v5730_v11 = vld [vmem:[#allocation2 + $0x170] sm:$0xff]  ;;  %493 = vrot.lane.b32.xlu1 %v5720_v14, %s5287_s18 }
  0x50   : > { %371 = vst.msk [vmem:[#allocation3 + $0xc0] sm:$0xff] %vm204_vm0, %v5724_v13  ;;  %373 = vst.msk [vmem:[#allocation3 + $0xd0] sm:$0xff] %vm204_vm0, %v5728_v12  ;;  %491 = vrot.lane.b32.xlu0 %v5718_v15, %s5287_s18  ;;  %v5750_v8 = vld [vmem:[#allocation2 + $0x141] sm:$0xff]  ;;  %v5760_v5 = vld [vmem:[#allocation2 + $0x151] sm:$0xff] }
  0x51   : > { %378 = vst.msk [vmem:[#allocation3 + $0xf8] sm:$0xff] %vm204_vm0, %v5730_v11  ;;  %8143 = vst [vmem:[#allocation35_spill] sm:$0xff] %v5748_v9  ;;  %v5762_v4 = vld [vmem:[#allocation2 + $0x159] sm:$0xff]  ;;  %v5770_v2 = vld [vmem:[#allocation2 + $0x169] sm:$0xff] }
  0x52   : > { %v5734_v22 = vld [vmem:[#allocation2 + $0x150] sm:$0xff]  ;;  %v5736_v10 = vld [vmem:[#allocation2 + $0x168] sm:$0xff]  ;;  %8144 = vst [vmem:[#allocation36_spill] sm:$0xff] %v5750_v8  ;;  %8145 = vst [vmem:[#allocation37_spill] sm:$0xff] %v5758_v6 }
  0x53   : > { %375 = vst.msk [vmem:[#allocation3 + $0xe0] sm:$0xff] %vm204_vm0, %v5734_v22  ;;  %377 = vst.msk [vmem:[#allocation3 + $0xf0] sm:$0xff] %vm204_vm0, %v5736_v10  ;;  %497 = vrot.lane.b32.xlu1 %v5750_v8, %s5287_s18  ;;  %v5772_v0 = vld [vmem:[#allocation2 + $0x171] sm:$0xff]  ;;  %v5782_v1 = vld [vmem:[#allocation2 + $0x22] sm:$0xff] }
  0x54   : > { %495 = vrot.lane.b32.xlu0 %v5748_v9, %s5287_s18  ;;  %8146 = vst [vmem:[#allocation38_spill] sm:$0xff] %v5760_v5  ;;  %8147 = vst [vmem:[#allocation39_spill] sm:$0xff] %v5762_v4  ;;  %v573_v3 = vld [vmem:[#allocation2 + $0xa] sm:$0xff] }
  0x55   : > { %v258_v7 = vld [vmem:[#allocation2 + $0x182] sm:$0x1]  ;;  %236 = vst.msk [vmem:[#allocation2 + $0x189] sm:$0xff] %vm204_vm0, %v5758_v6  ;;  %8148 = vst [vmem:[#allocation40_spill] sm:$0xff] %v5770_v2  ;;  %v5780_v6 = vld [vmem:[#allocation2 + $0x1a] sm:$0xff] }
  0x56   : > { %277 = vst.msk [vmem:[#allocation2 + $0x180] sm:$0x1] %vm260_vm1, %v258_v7  ;;  %8149 = vst [vmem:[#allocation41_spill] sm:$0xff] %v5772_v0  ;;  %v572_v7 = vld [vmem:[#allocation2 + $0x2] sm:$0xff] }
  0x57   : > { %501 = vrot.lane.b32.xlu1 %v5762_v4, %s5287_s18  ;;  %8150 = vst [vmem:[#allocation42_spill] sm:$0xff] %v5780_v6  ;;  %8151 = vst [vmem:[#allocation43_spill] sm:$0xff] %v5782_v1  ;;  %v583_v4 = vld [vmem:[#allocation2 + $0x82] sm:$0xff] }
  0x58   : > { %499 = vrot.lane.b32.xlu0 %v5760_v5, %s5287_s18  ;;  %v585_v5 = vld [vmem:[#allocation2 + $0x9a] sm:$0xff] }
  0x5b   : > { %505 = vrot.lane.b32.xlu1 %v5772_v0, %s5287_s18  ;;  %v5790_v0 = vld [vmem:[#allocation2 + $0x3a] sm:$0xff] }
  0x5c   : > { %503 = vrot.lane.b32.xlu0 %v5770_v2, %s5287_s18  ;;  %v5788_v2 = vld [vmem:[#allocation2 + $0x32] sm:$0xff]  ;;  %8153 = vst [vmem:[#allocation45_spill] sm:$0xff] %v5790_v0 }
  0x5d   : > { %8152 = vst [vmem:[#allocation44_spill] sm:$0xff] %v5788_v2 }
  0x5f   : > { %638 = vrot.lane.b32.xlu1 %v573_v3, %s5288_s19  ;;  %v5796_v3 = vld [vmem:[#allocation2 + $0x4a] sm:$0xff] }
  0x60   : > { %636 = vrot.lane.b32.xlu0 %v572_v7, %s5288_s19  ;;  %8154 = vst [vmem:[#allocation46_spill] sm:$0xff] %v5796_v3  ;;  %v5798_v7 = vld [vmem:[#allocation2 + $0x52] sm:$0xff] }
  0x61   : > { %8155 = vst [vmem:[#allocation47_spill] sm:$0xff] %v5798_v7 }
  0x63   : > { %642 = vrot.lane.b32.xlu1 %v5782_v1, %s5288_s19  ;;  %v580_v1 = vld [vmem:[#allocation2 + $0x62] sm:$0xff] }
  0x64   : > { %640 = vrot.lane.b32.xlu0 %v5780_v6, %s5288_s19  ;;  %v581_v6 = vld [vmem:[#allocation2 + $0x6a] sm:$0xff] }
  0x67   : > { %646 = vrot.lane.b32.xlu1 %v5790_v0, %s5288_s19  ;;  %v584_v0 = vld [vmem:[#allocation2 + $0x92] sm:$0xff] }
  0x68   : > { %644 = vrot.lane.b32.xlu0 %v5788_v2, %s5288_s19  ;;  %v582_v2 = vld [vmem:[#allocation2 + $0x7a] sm:$0xff] }
  0x6b   : > { %650 = vrot.lane.b32.xlu1 %v5798_v7, %s5288_s19  ;;  %v587_v7 = vld [vmem:[#allocation2 + $0xb2] sm:$0xff] }
  0x6c   : > { %648 = vrot.lane.b32.xlu0 %v5796_v3, %s5288_s19  ;;  %v586_v3 = vld [vmem:[#allocation2 + $0xaa] sm:$0xff] }
  0x6f   : > { %654 = vrot.lane.b32.xlu1 %v581_v6, %s5288_s19  ;;  %v589_v6 = vld [vmem:[#allocation2 + $0xca] sm:$0xff] }
  0x70   : > { %652 = vrot.lane.b32.xlu0 %v580_v1, %s5288_s19  ;;  %v588_v1 = vld [vmem:[#allocation2 + $0xc2] sm:$0xff] }
  0x73   : > { %658 = vrot.lane.b32.xlu1 %v583_v4, %s5288_s19  ;;  %v591_v4 = vld [vmem:[#allocation2 + $0xe2] sm:$0xff] }
  0x74   : > { %656 = vrot.lane.b32.xlu0 %v582_v2, %s5288_s19  ;;  %v590_v2 = vld [vmem:[#allocation2 + $0xda] sm:$0xff] }
  0x77   : > { %662 = vrot.lane.b32.xlu1 %v585_v5, %s5288_s19  ;;  %v593_v5 = vld [vmem:[#allocation2 + $0xfa] sm:$0xff] }
  0x78   : > { %660 = vrot.lane.b32.xlu0 %v584_v0, %s5288_s19  ;;  %v592_v0 = vld [vmem:[#allocation2 + $0xf2] sm:$0xff] }
  0x7b   : > { %666 = vrot.lane.b32.xlu1 %v587_v7, %s5288_s19  ;;  %v595_v7 = vld [vmem:[#allocation2 + $0x112] sm:$0xff] }
  0x7c   : > { %664 = vrot.lane.b32.xlu0 %v586_v3, %s5288_s19  ;;  %v594_v3 = vld [vmem:[#allocation2 + $0x10a] sm:$0xff] }
  0x7f   : > { %670 = vrot.lane.b32.xlu1 %v589_v6, %s5288_s19  ;;  %v597_v6 = vld [vmem:[#allocation2 + $0x12a] sm:$0xff] }
  0x80   : > { %668 = vrot.lane.b32.xlu0 %v588_v1, %s5288_s19  ;;  %v596_v1 = vld [vmem:[#allocation2 + $0x122] sm:$0xff] }
  0x83   : > { %674 = vrot.lane.b32.xlu1 %v591_v4, %s5288_s19  ;;  %v599_v4 = vld [vmem:[#allocation2 + $0x142] sm:$0xff] }
  0x84   : > { %672 = vrot.lane.b32.xlu0 %v590_v2, %s5288_s19  ;;  %v598_v2 = vld [vmem:[#allocation2 + $0x13a] sm:$0xff] }
  0x87   : > { %678 = vrot.lane.b32.xlu1 %v593_v5, %s5288_s19  ;;  %v601_v5 = vld [vmem:[#allocation2 + $0x15a] sm:$0xff] }
  0x88   : > { %676 = vrot.lane.b32.xlu0 %v592_v0, %s5288_s19  ;;  %v600_v0 = vld [vmem:[#allocation2 + $0x152] sm:$0xff] }
  0x8b   : > { %682 = vrot.lane.b32.xlu1 %v595_v7, %s5288_s19 }
  0x8c   : > { %680 = vrot.lane.b32.xlu0 %v594_v3, %s5288_s19 }
  0x8e   : > { %v444_v8 = vpop.permute.xlu0 %443 }
  0x8f   : > { %686 = vrot.lane.b32.xlu1 %v597_v6, %s5288_s19  ;;  %v448_v9 = vpop.permute.xlu1 %447  ;;  %540 = vst.msk [vmem:[#allocation3] sm:$0xff] %vm539_vm2, %v444_v8  ;;  %v603_v8 = vld [vmem:[#allocation2 + $0x172] sm:$0xff] }
  0x90   : > { %684 = vrot.lane.b32.xlu0 %v596_v1, %s5288_s19  ;;  %542 = vst.msk [vmem:[#allocation3 + $0x10] sm:$0xff] %vm539_vm2, %v448_v9  ;;  %v602_v1 = vld [vmem:[#allocation2 + $0x16a] sm:$0xff] }
  0x92   : > { %v446_v3 = vpop.permute.xlu0 %445 }
  0x93   : > { %690 = vrot.lane.b32.xlu1 %v599_v4, %s5288_s19  ;;  %v450_v7 = vpop.permute.xlu1 %449  ;;  %541 = vst.msk [vmem:[#allocation3 + $0x8] sm:$0xff] %vm539_vm2, %v446_v3 }
  0x94   : > { %688 = vrot.lane.b32.xlu0 %v598_v2, %s5288_s19  ;;  %543 = vst.msk [vmem:[#allocation3 + $0x18] sm:$0xff] %vm539_vm2, %v450_v7 }
  0x96   : > { %v452_v6 = vpop.permute.xlu0 %451 }
  0x97   : > { %694 = vrot.lane.b32.xlu1 %v601_v5, %s5288_s19  ;;  %v454_v9 = vpop.permute.xlu1 %453  ;;  %544 = vst.msk [vmem:[#allocation3 + $0x20] sm:$0xff] %vm539_vm2, %v452_v6 }
  0x98   : > { %692 = vrot.lane.b32.xlu0 %v600_v0, %s5288_s19  ;;  %545 = vst.msk [vmem:[#allocation3 + $0x28] sm:$0xff] %vm539_vm2, %v454_v9 }
  0x9a   : > { %v456_v2 = vpop.permute.xlu0 %455 }
  0x9b   : > { %698 = vrot.lane.b32.xlu1 %v603_v8, %s5288_s19  ;;  %v458_v4 = vpop.permute.xlu1 %457  ;;  %546 = vst.msk [vmem:[#allocation3 + $0x30] sm:$0xff] %vm539_vm2, %v456_v2 }
  0x9c   : > { %696 = vrot.lane.b32.xlu0 %v602_v1, %s5288_s19  ;;  %547 = vst.msk [vmem:[#allocation3 + $0x38] sm:$0xff] %vm539_vm2, %v458_v4 }
  0x9e   : > { %v460_v0 = vpop.permute.xlu0 %459 }
  0x9f   : > { %831 = vrot.lane.b32.xlu1 %v5562_v63, %s5289_s20  ;;  %v462_v5 = vpop.permute.xlu1 %461  ;;  %548 = vst.msk [vmem:[#allocation3 + $0x40] sm:$0xff] %vm539_vm2, %v460_v0 }
  0xa0   : > { %829 = vrot.lane.b32.xlu0 %v5594_v56, %s5289_s20  ;;  %549 = vst.msk [vmem:[#allocation3 + $0x48] sm:$0xff] %vm539_vm2, %v462_v5 }
  0xa2   : > { %v464_v3 = vpop.permute.xlu0 %463 }
  0xa3   : > { %835 = vrot.lane.b32.xlu1 %v5567_v38, %s5289_s20  ;;  %v466_v7 = vpop.permute.xlu1 %465  ;;  %550 = vst.msk [vmem:[#allocation3 + $0x50] sm:$0xff] %vm539_vm2, %v464_v3 }
  0xa4   : > { %833 = vrot.lane.b32.xlu0 %v5621_v41, %s5289_s20  ;;  %551 = vst.msk [vmem:[#allocation3 + $0x58] sm:$0xff] %vm539_vm2, %v466_v7 }
  0xa6   : > { %v468_v63 = vpop.permute.xlu0 %467 }
  0xa7   : > { %839 = vrot.lane.b32.xlu1 %v5579_v42, %s5289_s20  ;;  %v470_v56 = vpop.permute.xlu1 %469  ;;  %552 = vst.msk [vmem:[#allocation3 + $0x60] sm:$0xff] %vm539_vm2, %v468_v63 }
  0xa8   : > { %837 = vrot.lane.b32.xlu0 %v5643_v37, %s5289_s20  ;;  %553 = vst.msk [vmem:[#allocation3 + $0x68] sm:$0xff] %vm539_vm2, %v470_v56 }
  0xaa   : > { %v472_v1 = vpop.permute.xlu0 %471 }
  0xab   : > { %843 = vrot.lane.b32.xlu1 %v5587_v47, %s5289_s20  ;;  %v474_v8 = vpop.permute.xlu1 %473  ;;  %554 = vst.msk [vmem:[#allocation3 + $0x70] sm:$0xff] %vm539_vm2, %v472_v1 }
  0xac   : > { %841 = vrot.lane.b32.xlu0 %v5645_v36, %s5289_s20  ;;  %555 = vst.msk [vmem:[#allocation3 + $0x78] sm:$0xff] %vm539_vm2, %v474_v8 }
  0xae   : > { %v476_v6 = vpop.permute.xlu0 %475 }
  0xaf   : > { %847 = vrot.lane.b32.xlu1 %v5592_v51, %s5289_s20  ;;  %v478_v9 = vpop.permute.xlu1 %477  ;;  %556 = vst.msk [vmem:[#allocation3 + $0x80] sm:$0xff] %vm539_vm2, %v476_v6 }
  0xb0   : > { %845 = vrot.lane.b32.xlu0 %v5654_v35, %s5289_s20  ;;  %557 = vst.msk [vmem:[#allocation3 + $0x88] sm:$0xff] %vm539_vm2, %v478_v9 }
  0xb2   : > { %v480_v2 = vpop.permute.xlu0 %479 }
  0xb3   : > { %851 = vrot.lane.b32.xlu1 %v5599_v57, %s5289_s20  ;;  %v482_v4 = vpop.permute.xlu1 %481  ;;  %558 = vst.msk [vmem:[#allocation3 + $0x90] sm:$0xff] %vm539_vm2, %v480_v2 }
  0xb4   : > { %849 = vrot.lane.b32.xlu0 %v5661_v60, %s5289_s20  ;;  %559 = vst.msk [vmem:[#allocation3 + $0x98] sm:$0xff] %vm539_vm2, %v482_v4 }
  0xb6   : > { %v484_v0 = vpop.permute.xlu0 %483 }
  0xb7   : > { %855 = vrot.lane.b32.xlu1 %v5612_v61, %s5289_s20  ;;  %v486_v5 = vpop.permute.xlu1 %485  ;;  %560 = vst.msk [vmem:[#allocation3 + $0xa0] sm:$0xff] %vm539_vm2, %v484_v0 }
  0xb8   : > { %853 = vrot.lane.b32.xlu0 %v5679_v33, %s5289_s20  ;;  %561 = vst.msk [vmem:[#allocation3 + $0xa8] sm:$0xff] %vm539_vm2, %v486_v5 }
  0xbb   : > { %859 = vrot.lane.b32.xlu1 %v5619_v40, %s5289_s20  ;;  %v490_v7 = vpop.permute.xlu1 %489 }
  0xbc   : > { %857 = vrot.lane.b32.xlu0 %v5691_v19, %s5289_s20  ;;  %563 = vst.msk [vmem:[#allocation3 + $0xb8] sm:$0xff] %vm539_vm2, %v490_v7 }
  0xbe   : > { %v488_v3 = vpop.permute.xlu0 %487 }
  0xbf   : > { %562 = vst.msk [vmem:[#allocation3 + $0xb0] sm:$0xff] %vm539_vm2, %v488_v3  ;;  %863 = vrot.lane.b32.xlu1 %v5626_v48, %s5289_s20 }
  0xc0   : > { %861 = vrot.lane.b32.xlu0 %v5695_v18, %s5289_s20 }
  0xc1   : > { %v494_v56 = vpop.permute.xlu1 %493 }
  0xc2   : > { %v492_v63 = vpop.permute.xlu0 %491  ;;  %565 = vst.msk [vmem:[#allocation3 + $0xc8] sm:$0xff] %vm539_vm2, %v494_v56 }
  0xc3   : > { %564 = vst.msk [vmem:[#allocation3 + $0xc0] sm:$0xff] %vm539_vm2, %v492_v63  ;;  %867 = vrot.lane.b32.xlu1 %v5637_v26, %s5289_s20 }
  0xc4   : > { %865 = vrot.lane.b32.xlu0 %v5701_v21, %s5289_s20 }
  0xc5   : > { %v498_v8 = vpop.permute.xlu1 %497 }
  0xc6   : > { %v496_v1 = vpop.permute.xlu0 %495  ;;  %567 = vst.msk [vmem:[#allocation3 + $0xd8] sm:$0xff] %vm539_vm2, %v498_v8  ;;  %v8161_v8 = vld [vmem:[#allocation41_spill] sm:$0xff] }
  0xc7   : > { %566 = vst.msk [vmem:[#allocation3 + $0xd0] sm:$0xff] %vm539_vm2, %v496_v1  ;;  %871 = vrot.lane.b32.xlu1 %v5657_v34, %s5289_s20  ;;  %v8160_v1 = vld [vmem:[#allocation40_spill] sm:$0xff] }
  0xc8   : > { %869 = vrot.lane.b32.xlu0 %v5714_v16, %s5289_s20 }
  0xc9   : > { %v502_v9 = vpop.permute.xlu1 %501 }
  0xca   : > { %v500_v6 = vpop.permute.xlu0 %499  ;;  %569 = vst.msk [vmem:[#allocation3 + $0xe8] sm:$0xff] %vm539_vm2, %v502_v9  ;;  %v989_v9 = vld [vmem:[#allocation2 + $0x189] sm:$0xff] }
  0xcb   : > { %568 = vst.msk [vmem:[#allocation3 + $0xe0] sm:$0xff] %vm539_vm2, %v500_v6  ;;  %875 = vrot.lane.b32.xlu1 %v5666_v31, %s5289_s20  ;;  %v988_v6 = vld [vmem:[#allocation2 + $0x181] sm:$0xff] }
  0xcc   : > { %873 = vrot.lane.b32.xlu0 %v5724_v13, %s5289_s20 }
  0xcd   : > { %v506_v21 = vpop.permute.xlu1 %505 }
  0xce   : > { %v504_v26 = vpop.permute.xlu0 %503  ;;  %571 = vst.msk [vmem:[#allocation3 + $0xf8] sm:$0xff] %vm539_vm2, %v506_v21 }
  0xcf   : > { %570 = vst.msk [vmem:[#allocation3 + $0xf0] sm:$0xff] %vm539_vm2, %v504_v26  ;;  %879 = vrot.lane.b32.xlu1 %v5673_v45, %s5289_s20  ;;  %v796_v45 = vld [vmem:[#allocation2 + $0x188] sm:$0xff] }
  0xd0   : > { %877 = vrot.lane.b32.xlu0 %v5728_v12, %s5289_s20  ;;  %v795_v12 = vld [vmem:[#allocation2 + $0x180] sm:$0xff] }
  0xd1   : > { %v639_v34 = vpop.permute.xlu1 %638 }
  0xd2   : > { %v637_v16 = vpop.permute.xlu0 %636  ;;  %734 = vst.msk [vmem:[#allocation3 + $0x8] sm:$0xff] %vm732_vm3, %v639_v34 }
  0xd3   : > { %733 = vst.msk [vmem:[#allocation3] sm:$0xff] %vm732_vm3, %v637_v16  ;;  %883 = vrot.lane.b32.xlu1 %v5697_v17, %s5289_s20 }
  0xd4   : > { %881 = vrot.lane.b32.xlu0 %v5734_v22, %s5289_s20 }
  0xd5   : > { %v643_v31 = vpop.permute.xlu1 %642 }
  0xd6   : > { %v641_v13 = vpop.permute.xlu0 %640  ;;  %736 = vst.msk [vmem:[#allocation3 + $0x18] sm:$0xff] %vm732_vm3, %v643_v31  ;;  %v8163_v31 = vld [vmem:[#allocation43_spill] sm:$0xff] }
  0xd7   : > { %735 = vst.msk [vmem:[#allocation3 + $0x10] sm:$0xff] %vm732_vm3, %v641_v13  ;;  %887 = vrot.lane.b32.xlu1 %v5730_v11, %s5289_s20  ;;  %v8162_v13 = vld [vmem:[#allocation42_spill] sm:$0xff] }
  0xd8   : > { %885 = vrot.lane.b32.xlu0 %v5736_v10, %s5289_s20 }
  0xd9   : > { %v647_v4 = vpop.permute.xlu1 %646 }
  0xda   : > { %v645_v2 = vpop.permute.xlu0 %644  ;;  %738 = vst.msk [vmem:[#allocation3 + $0x28] sm:$0xff] %vm732_vm3, %v647_v4  ;;  %v8165_v4 = vld [vmem:[#allocation45_spill] sm:$0xff] }
  0xdb   : > { %737 = vst.msk [vmem:[#allocation3 + $0x20] sm:$0xff] %vm732_vm3, %v645_v2  ;;  %891 = vrot.lane.b32.xlu1 %v796_v45, %s5289_s20  ;;  %v8164_v2 = vld [vmem:[#allocation44_spill] sm:$0xff] }
  0xdc   : > { %889 = vrot.lane.b32.xlu0 %v795_v12, %s5289_s20 }
  0xdd   : > { %v651_v22 = vpop.permute.xlu1 %650 }
  0xde   : > { %v649_v17 = vpop.permute.xlu0 %648  ;;  %740 = vst.msk [vmem:[#allocation3 + $0x38] sm:$0xff] %vm732_vm3, %v651_v22 }
  0xdf   : > { %739 = vst.msk [vmem:[#allocation3 + $0x30] sm:$0xff] %vm732_vm3, %v649_v17  ;;  %1024 = vrot.lane.b32.xlu1 %v5462_v27, %s5290_s21  ;;  %v1960_v17 = vld [vmem:[%s8063_s1 + $0x20] sm:$0xf] }
  0xe0   : > { %1022 = vrot.lane.b32.xlu0 %v5451_v25, %s5290_s21  ;;  %5143 = vmatprep.subr.msk.mxu0 %vm2058_vm5, %v1960_v17 }
  0xe1   : > { %v655_v11 = vpop.permute.xlu1 %654  ;;  %5144 = vmatpush3.msk.msra.mxu0 %vm2058_vm5, %v1960_v17 }
  0xe2   : > { %v653_v10 = vpop.permute.xlu0 %652  ;;  %742 = vst.msk [vmem:[#allocation3 + $0x48] sm:$0xff] %vm732_vm3, %v655_v11  ;;  %v1959_v11 = vld [vmem:[%s8063_s1 + $0x18] sm:$0xff] }
  0xe3   : > { %741 = vst.msk [vmem:[#allocation3 + $0x40] sm:$0xff] %vm732_vm3, %v653_v10  ;;  %1028 = vrot.lane.b32.xlu1 %v5469_v29, %s5290_s21  ;;  %5145 = vmatprep.subr.mxu0 %v1959_v11 }
  0xe4   : > { %1026 = vrot.lane.b32.xlu0 %v5467_v28, %s5290_s21  ;;  %5146 = vmatpush3.msra.mxu0 %v1959_v11 }
  0xe5   : > { %v659_v5 = vpop.permute.xlu1 %658 }
  0xe6   : > { %v657_v0 = vpop.permute.xlu0 %656  ;;  %744 = vst.msk [vmem:[#allocation3 + $0x58] sm:$0xff] %vm732_vm3, %v659_v5  ;;  %v8167_v5 = vld [vmem:[#allocation47_spill] sm:$0xff] }
  0xe7   : > { %743 = vst.msk [vmem:[#allocation3 + $0x50] sm:$0xff] %vm732_vm3, %v657_v0  ;;  %1032 = vrot.lane.b32.xlu1 %v5480_v32, %s5290_s21  ;;  %v8166_v0 = vld [vmem:[#allocation46_spill] sm:$0xff] }
  0xe8   : > { %1030 = vrot.lane.b32.xlu0 %v5471_v30, %s5290_s21 }
  0xe9   : > { %v663_v27 = vpop.permute.xlu1 %662 }
  0xea   : > { %v661_v25 = vpop.permute.xlu0 %660  ;;  %746 = vst.msk [vmem:[#allocation3 + $0x68] sm:$0xff] %vm732_vm3, %v663_v27 }
  0xeb   : > { %745 = vst.msk [vmem:[#allocation3 + $0x60] sm:$0xff] %vm732_vm3, %v661_v25  ;;  %1036 = vrot.lane.b32.xlu1 %v5522_v44, %s5290_s21  ;;  %v1958_v25 = vld [vmem:[%s8063_s1 + $0x10] sm:$0xff] }
  0xec   : > { %1034 = vrot.lane.b32.xlu0 %v5520_v43, %s5290_s21  ;;  %5147 = vmatprep.subr.mxu0 %v1958_v25 }
  0xed   : > { %v667_v29 = vpop.permute.xlu1 %666  ;;  %5148 = vmatpush3.msra.mxu0 %v1958_v25 }
  0xee   : > { %v665_v28 = vpop.permute.xlu0 %664  ;;  %748 = vst.msk [vmem:[#allocation3 + $0x78] sm:$0xff] %vm732_vm3, %v667_v29  ;;  %v1957_v29 = vld [vmem:[%s8063_s1 + $0x8] sm:$0xff] }
  0xef   : > { %747 = vst.msk [vmem:[#allocation3 + $0x70] sm:$0xff] %vm732_vm3, %v665_v28  ;;  %1040 = vrot.lane.b32.xlu1 %v5536_v50, %s5290_s21  ;;  %5149 = vmatprep.subr.mxu0 %v1957_v29 }
  0xf0   : > { %1038 = vrot.lane.b32.xlu0 %v5534_v49, %s5290_s21  ;;  %5150 = vmatpush3.msra.mxu0 %v1957_v29 }
  0xf1   : > { %v671_v32 = vpop.permute.xlu1 %670 }
  0xf2   : > { %v669_v30 = vpop.permute.xlu0 %668  ;;  %750 = vst.msk [vmem:[#allocation3 + $0x88] sm:$0xff] %vm732_vm3, %v671_v32  ;;  %v1539_v32 = vld [vmem:[#allocation2 + $0x39] sm:$0xff] }
  0xf3   : > { %749 = vst.msk [vmem:[#allocation3 + $0x80] sm:$0xff] %vm732_vm3, %v669_v30  ;;  %1044 = vrot.lane.b32.xlu1 %v5546_v54, %s5290_s21  ;;  %v1538_v30 = vld [vmem:[#allocation2 + $0x31] sm:$0xff] }
  0xf4   : > { %1042 = vrot.lane.b32.xlu0 %v5544_v53, %s5290_s21 }
  0xf5   : > { %v675_v44 = vpop.permute.xlu1 %674 }
  0xf6   : > { %v673_v43 = vpop.permute.xlu0 %672  ;;  %752 = vst.msk [vmem:[#allocation3 + $0x98] sm:$0xff] %vm732_vm3, %v675_v44 }
  0xf7   : > { %751 = vst.msk [vmem:[#allocation3 + $0x90] sm:$0xff] %vm732_vm3, %v673_v43  ;;  %1048 = vrot.lane.b32.xlu1 %v5558_v62, %s5290_s21 }
  0xf8   : > { %1046 = vrot.lane.b32.xlu0 %v5554_v59, %s5290_s21 }
  0xf9   : > { %v679_v50 = vpop.permute.xlu1 %678 }
  0xfa   : > { %v677_v49 = vpop.permute.xlu0 %676  ;;  %754 = vst.msk [vmem:[#allocation3 + $0xa8] sm:$0xff] %vm732_vm3, %v679_v50 }
  0xfb   : > { %753 = vst.msk [vmem:[#allocation3 + $0xa0] sm:$0xff] %vm732_vm3, %v677_v49  ;;  %1052 = vrot.lane.b32.xlu1 %v5581_v46, %s5290_s21  ;;  %v1956_v49 = vld [vmem:[%s8063_s1] sm:$0xff] }
  0xfc   : > { %1050 = vrot.lane.b32.xlu0 %v5569_v39, %s5290_s21  ;;  %5151 = vmatprep.subr.mxu0 %v1956_v49 }
  0xfd   : > { %v683_v54 = vpop.permute.xlu1 %682  ;;  %5152 = vmatpush3.msra.mxu0 %v1956_v49 }
  0xfe   : > { %v681_v53 = vpop.permute.xlu0 %680  ;;  %756 = vst.msk [vmem:[#allocation3 + $0xb8] sm:$0xff] %vm732_vm3, %v683_v54  ;;  %v1540_v54 = vld [vmem:[#allocation2 + $0x49] sm:$0xff] }
  0xff   : > { %755 = vst.msk [vmem:[#allocation3 + $0xb0] sm:$0xff] %vm732_vm3, %v681_v53  ;;  %1056 = vrot.lane.b32.xlu1 %v5614_v24, %s5290_s21 }
 0x100   : > { %1054 = vrot.lane.b32.xlu0 %v5605_v58, %s5290_s21 }
 0x101   : > { %v687_v62 = vpop.permute.xlu1 %686 }
 0x102   : > { %v685_v59 = vpop.permute.xlu0 %684  ;;  %758 = vst.msk [vmem:[#allocation3 + $0xc8] sm:$0xff] %vm732_vm3, %v687_v62 }
 0x103   : > { %757 = vst.msk [vmem:[#allocation3 + $0xc0] sm:$0xff] %vm732_vm3, %v685_v59  ;;  %1060 = vrot.lane.b32.xlu1 %v5630_v55, %s5290_s21  ;;  %v1541_v59 = vld [vmem:[#allocation2 + $0x51] sm:$0xff] }
 0x104   : > { %1058 = vrot.lane.b32.xlu0 %v5628_v52, %s5290_s21 }
 0x105   : > { %v691_v46 = vpop.permute.xlu1 %690 }
 0x106   : > { %v689_v39 = vpop.permute.xlu0 %688  ;;  %760 = vst.msk [vmem:[#allocation3 + $0xd8] sm:$0xff] %vm732_vm3, %v691_v46  ;;  %v1733_v46 = vld [vmem:[#allocation2 + $0x4a] sm:$0xff] }
 0x107   : > { %759 = vst.msk [vmem:[#allocation3 + $0xd0] sm:$0xff] %vm732_vm3, %v689_v39  ;;  %1064 = vrot.lane.b32.xlu1 %v5687_v20, %s5290_s21  ;;  %v8156_v20 = vld [vmem:[#allocation35_spill] sm:$0xff] }
 0x108   : > { %1062 = vrot.lane.b32.xlu0 %v5685_v23, %s5290_s21  ;;  %v8157_v23 = vld [vmem:[#allocation36_spill] sm:$0xff] }
 0x109   : > { %v695_v24 = vpop.permute.xlu1 %694 }
 0x10a   : > { %v693_v58 = vpop.permute.xlu0 %692  ;;  %762 = vst.msk [vmem:[#allocation3 + $0xe8] sm:$0xff] %vm732_vm3, %v695_v24 }
 0x10b   : > { %761 = vst.msk [vmem:[#allocation3 + $0xe0] sm:$0xff] %vm732_vm3, %v693_v58  ;;  %1068 = vrot.lane.b32.xlu1 %v5720_v14, %s5290_s21  ;;  %v8158_v14 = vld [vmem:[#allocation38_spill] sm:$0xff]  ;;  %v1734_v58 = vld [vmem:[#allocation2 + $0x52] sm:$0xff] }
 0x10c   : > { %1066 = vrot.lane.b32.xlu0 %v5718_v15, %s5290_s21  ;;  %v8159_v15 = vld [vmem:[#allocation39_spill] sm:$0xff] }
 0x10d   : > { %v699_v55 = vpop.permute.xlu1 %698 }
 0x10e   : > { %v697_v52 = vpop.permute.xlu0 %696  ;;  %764 = vst.msk [vmem:[#allocation3 + $0xf8] sm:$0xff] %vm732_vm3, %v699_v55  ;;  %v1542_v55 = vld [vmem:[#allocation2 + $0x61] sm:$0xff] }
 0x10f   : > { %763 = vst.msk [vmem:[#allocation3 + $0xf0] sm:$0xff] %vm732_vm3, %v697_v52  ;;  %1072 = vrot.lane.b32.xlu1 %v8157_v23, %s5290_s21 }
 0x110   : > { %1070 = vrot.lane.b32.xlu0 %v8156_v20, %s5290_s21  ;;  %v1543_v20 = vld [vmem:[#allocation2 + $0x69] sm:$0xff] }
 0x111   : > { %v832_v7 = vpop.permute.xlu1 %831 }
 0x112   : > { %v830_v3 = vpop.permute.xlu0 %829  ;;  %927 = vst.msk [vmem:[#allocation3 + $0x8] sm:$0xff] %vm925_vm4, %v832_v7  ;;  %v1735_v7 = vld [vmem:[#allocation2 + $0x62] sm:$0xff] }
 0x113   : > { %926 = vst.msk [vmem:[#allocation3] sm:$0xff] %vm925_vm4, %v830_v3  ;;  %1076 = vrot.lane.b32.xlu1 %v8159_v15, %s5290_s21 }
 0x114   : > { %1074 = vrot.lane.b32.xlu0 %v8158_v14, %s5290_s21 }
 0x115   : > { %v836_v56 = vpop.permute.xlu1 %835 }
 0x116   : > { %v834_v63 = vpop.permute.xlu0 %833  ;;  %929 = vst.msk [vmem:[#allocation3 + $0x18] sm:$0xff] %vm925_vm4, %v836_v56 }
 0x117   : > { %928 = vst.msk [vmem:[#allocation3 + $0x10] sm:$0xff] %vm925_vm4, %v834_v63  ;;  %1080 = vrot.lane.b32.xlu1 %v8161_v8, %s5290_s21  ;;  %v1544_v8 = vld [vmem:[#allocation2 + $0x79] sm:$0xff] }
 0x118   : > { %1078 = vrot.lane.b32.xlu0 %v8160_v1, %s5290_s21 }
 0x119   : > { %v840_v21 = vpop.permute.xlu1 %839 }
 0x11a   : > { %v838_v26 = vpop.permute.xlu0 %837  ;;  %931 = vst.msk [vmem:[#allocation3 + $0x28] sm:$0xff] %vm925_vm4, %v840_v21  ;;  %v1737_v21 = vld [vmem:[#allocation2 + $0x7a] sm:$0xff] }
 0x11b   : > { %930 = vst.msk [vmem:[#allocation3 + $0x20] sm:$0xff] %vm925_vm4, %v838_v26  ;;  %1084 = vrot.lane.b32.xlu1 %v989_v9, %s5290_s21 }
 0x11c   : > { %1082 = vrot.lane.b32.xlu0 %v988_v6, %s5290_s21  ;;  %v1545_v6 = vld [vmem:[#allocation2 + $0x81] sm:$0xff] }
 0x11d   : > { %v844_v34 = vpop.permute.xlu1 %843 }
 0x11e   : > { %v842_v16 = vpop.permute.xlu0 %841  ;;  %933 = vst.msk [vmem:[#allocation3 + $0x38] sm:$0xff] %vm925_vm4, %v844_v34 }
 0x11f   : > { %932 = vst.msk [vmem:[#allocation3 + $0x30] sm:$0xff] %vm925_vm4, %v842_v16  ;;  %1217 = vrot.lane.b32.xlu1 %v8163_v31, %s5291_s22 }
 0x120   : > { %1215 = vrot.lane.b32.xlu0 %v8162_v13, %s5291_s22 }
 0x121   : > { %v848_v45 = vpop.permute.xlu1 %847 }
 0x122   : > { %v846_v12 = vpop.permute.xlu0 %845  ;;  %935 = vst.msk [vmem:[#allocation3 + $0x48] sm:$0xff] %vm925_vm4, %v848_v45  ;;  %v1546_v45 = vld [vmem:[#allocation2 + $0x91] sm:$0xff] }
 0x123   : > { %934 = vst.msk [vmem:[#allocation3 + $0x40] sm:$0xff] %vm925_vm4, %v846_v12  ;;  %1221 = vrot.lane.b32.xlu1 %v8165_v4, %s5291_s22 }
 0x124   : > { %1219 = vrot.lane.b32.xlu0 %v8164_v2, %s5291_s22 }
 0x125   : > { %v852_v10 = vpop.permute.xlu1 %851 }
 0x126   : > { %v850_v22 = vpop.permute.xlu0 %849  ;;  %937 = vst.msk [vmem:[#allocation3 + $0x58] sm:$0xff] %vm925_vm4, %v852_v10 }
 0x127   : > { %936 = vst.msk [vmem:[#allocation3 + $0x50] sm:$0xff] %vm925_vm4, %v850_v22  ;;  %1225 = vrot.lane.b32.xlu1 %v8167_v5, %s5291_s22  ;;  %v1739_v22 = vld [vmem:[#allocation2 + $0x92] sm:$0xff] }
 0x128   : > { %1223 = vrot.lane.b32.xlu0 %v8166_v0, %s5291_s22 }
 0x129   : > { %v856_v28 = vpop.permute.xlu1 %855 }
 0x12a   : > { %v854_v27 = vpop.permute.xlu0 %853  ;;  %939 = vst.msk [vmem:[#allocation3 + $0x68] sm:$0xff] %vm925_vm4, %v856_v28  ;;  %v1549_v28 = vld [vmem:[#allocation2 + $0xb1] sm:$0xff] }
 0x12b   : > { %938 = vst.msk [vmem:[#allocation3 + $0x60] sm:$0xff] %vm925_vm4, %v854_v27  ;;  %1411 = vrot.lane.b32.xlu1 %v5567_v38, %s5292_s4  ;;  %v1548_v27 = vld [vmem:[#allocation2 + $0xa9] sm:$0xff] }
 0x12c   : > { %1409 = vrot.lane.b32.xlu0 %v5621_v41, %s5292_s4 }
 0x12d   : > { %v860_v44 = vpop.permute.xlu1 %859 }
 0x12e   : > { %v858_v43 = vpop.permute.xlu0 %857  ;;  %941 = vst.msk [vmem:[#allocation3 + $0x78] sm:$0xff] %vm925_vm4, %v860_v44 }
 0x12f   : > { %940 = vst.msk [vmem:[#allocation3 + $0x70] sm:$0xff] %vm925_vm4, %v858_v43  ;;  %1604 = vrot.lane.b32.xlu1 %v1539_v32, %s5293_s7  ;;  %v1741_v32 = vld [vmem:[#allocation2 + $0xaa] sm:$0xff] }
 0x130   : > { %1602 = vrot.lane.b32.xlu0 %v1538_v30, %s5293_s7 }
 0x131   : > { %v864_v41 = vpop.permute.xlu1 %863 }
 0x132   : > { %v862_v38 = vpop.permute.xlu0 %861  ;;  %943 = vst.msk [vmem:[#allocation3 + $0x88] sm:$0xff] %vm925_vm4, %v864_v41 }
 0x133   : > { %942 = vst.msk [vmem:[#allocation3 + $0x80] sm:$0xff] %vm925_vm4, %v862_v38  ;;  %1797 = vrot.lane.b32.xlu1 %v8165_v4, %s5294_s8 }
 0x134   : > { %1795 = vrot.lane.b32.xlu0 %v8164_v2, %s5294_s8  ;;  %v1547_v2 = vld [vmem:[#allocation2 + $0x99] sm:$0xff] }
 0x135   : > { %v868_v53 = vpop.permute.xlu1 %867 }
 0x136   : > { %v866_v50 = vpop.permute.xlu0 %865  ;;  %945 = vst.msk [vmem:[#allocation3 + $0x98] sm:$0xff] %vm925_vm4, %v868_v53  ;;  %v1551_v53 = vld [vmem:[#allocation2 + $0xc9] sm:$0xff] }
 0x137   : > { %944 = vst.msk [vmem:[#allocation3 + $0x90] sm:$0xff] %vm925_vm4, %v866_v50  ;;  %1415 = vrot.lane.b32.xlu1 %v5579_v42, %s5292_s4  ;;  %v1550_v50 = vld [vmem:[#allocation2 + $0xc1] sm:$0xff] }
 0x138   : > { %1413 = vrot.lane.b32.xlu0 %v5643_v37, %s5292_s4 }
 0x139   : > { %v872_v39 = vpop.permute.xlu1 %871 }
 0x13a   : > { %v870_v62 = vpop.permute.xlu0 %869  ;;  %947 = vst.msk [vmem:[#allocation3 + $0xa8] sm:$0xff] %vm925_vm4, %v872_v39  ;;  %v1743_v39 = vld [vmem:[#allocation2 + $0xc2] sm:$0xff] }
 0x13b   : > { %946 = vst.msk [vmem:[#allocation3 + $0xa0] sm:$0xff] %vm925_vm4, %v870_v62  ;;  %1608 = vrot.lane.b32.xlu1 %v1541_v59, %s5293_s7  ;;  %v295_v62 = vld [vmem:[#allocation2 + $0x18f] sm:$0x1] }
 0x13c   : > { %1606 = vrot.lane.b32.xlu0 %v1540_v54, %s5293_s7  ;;  %313 = vst.msk [vmem:[#allocation2 + $0x191] sm:$0x1] %vm260_vm1, %v295_v62 }
 0x13d   : > { %v876_v52 = vpop.permute.xlu1 %875 }
 0x13e   : > { %v874_v24 = vpop.permute.xlu0 %873  ;;  %949 = vst.msk [vmem:[#allocation3 + $0xb8] sm:$0xff] %vm925_vm4, %v876_v52 }
 0x13f   : > { %948 = vst.msk [vmem:[#allocation3 + $0xb0] sm:$0xff] %vm925_vm4, %v874_v24  ;;  %1801 = vrot.lane.b32.xlu1 %v1734_v58, %s5294_s8  ;;  %v1744_v58 = vld [vmem:[#allocation2 + $0xca] sm:$0xff] }
 0x140   : > { %1799 = vrot.lane.b32.xlu0 %v1733_v46, %s5294_s8 }
 0x141   : > { %v880_v42 = vpop.permute.xlu1 %879 }
 0x142   : > { %v878_v37 = vpop.permute.xlu0 %877  ;;  %951 = vst.msk [vmem:[#allocation3 + $0xc8] sm:$0xff] %vm925_vm4, %v880_v42 }
 0x143   : > { %950 = vst.msk [vmem:[#allocation3 + $0xc0] sm:$0xff] %vm925_vm4, %v878_v37  ;;  %1419 = vrot.lane.b32.xlu1 %v5587_v47, %s5292_s4 }
 0x144   : > { %1417 = vrot.lane.b32.xlu0 %v5645_v36, %s5292_s4  ;;  %v1736_v36 = vld [vmem:[#allocation2 + $0x6a] sm:$0xff] }
 0x145   : > { %v884_v3 = vpop.permute.xlu1 %883 }
 0x146   : > { %v882_v23 = vpop.permute.xlu0 %881  ;;  %953 = vst.msk [vmem:[#allocation3 + $0xd8] sm:$0xff] %vm925_vm4, %v884_v3 }
 0x147   : > { %952 = vst.msk [vmem:[#allocation3 + $0xd0] sm:$0xff] %vm925_vm4, %v882_v23  ;;  %1612 = vrot.lane.b32.xlu1 %v1543_v20, %s5293_s7  ;;  %v1552_v20 = vld [vmem:[#allocation2 + $0xd9] sm:$0xff]  ;;  %v1553_v23 = vld [vmem:[#allocation2 + $0xe1] sm:$0xff] }
 0x148   : > { %1610 = vrot.lane.b32.xlu0 %v1542_v55, %s5293_s7  ;;  %v296_v55 = vld [vmem:[#allocation2 + $0x1a7] sm:$0x1] }
 0x149   : > { %v888_v15 = vpop.permute.xlu1 %887  ;;  %314 = vst.msk [vmem:[#allocation2 + $0x1a9] sm:$0x1] %vm260_vm1, %v296_v55 }
 0x14a   : > { %v886_v14 = vpop.permute.xlu0 %885  ;;  %955 = vst.msk [vmem:[#allocation3 + $0xe8] sm:$0xff] %vm925_vm4, %v888_v15 }
 0x14b   : > { %954 = vst.msk [vmem:[#allocation3 + $0xe0] sm:$0xff] %vm925_vm4, %v886_v14  ;;  %1227 = vrot.lane.b32.xlu1 %v1735_v7, %s5291_s22  ;;  %v1745_v14 = vld [vmem:[#allocation2 + $0xda] sm:$0xff] }
 0x14c   : > { %1803 = vrot.lane.b32.xlu0 %v1735_v7, %s5294_s8 }
 0x14d   : > { %v892_v63 = vpop.permute.xlu1 %891 }
 0x14e   : > { %v890_v47 = vpop.permute.xlu0 %889  ;;  %957 = vst.msk [vmem:[#allocation3 + $0xf8] sm:$0xff] %vm925_vm4, %v892_v63  ;;  %v1361_v63 = vld [vmem:[#allocation2 + $0xf0] sm:$0xff] }
 0x14f   : > { %956 = vst.msk [vmem:[#allocation3 + $0xf0] sm:$0xff] %vm925_vm4, %v890_v47  ;;  %1229 = vrot.lane.b32.xlu1 %v1736_v36, %s5291_s22 }
 0x150   : > { %1805 = vrot.lane.b32.xlu0 %v1736_v36, %s5294_s8 }
 0x151   : > { %v1025_v1 = vpop.permute.xlu1 %1024 }
 0x152   : > { %v1023_v56 = vpop.permute.xlu0 %1022  ;;  %1120 = vst.msk [vmem:[#allocation3 + $0x8] sm:$0xff] %vm1118_vm6, %v1025_v1 }
 0x153   : > { %1119 = vst.msk [vmem:[#allocation3] sm:$0xff] %vm1118_vm6, %v1023_v56  ;;  %1423 = vrot.lane.b32.xlu1 %v5592_v51, %s5292_s4  ;;  %v1362_v56 = vld [vmem:[#allocation2 + $0xf8] sm:$0xff] }
 0x154   : > { %1421 = vrot.lane.b32.xlu0 %v5654_v35, %s5292_s4  ;;  %v1738_v35 = vld [vmem:[#allocation2 + $0x82] sm:$0xff] }
 0x155   : > { %v1029_v26 = vpop.permute.xlu1 %1028 }
 0x156   : > { %v1027_v9 = vpop.permute.xlu0 %1026  ;;  %1122 = vst.msk [vmem:[#allocation3 + $0x18] sm:$0xff] %vm1118_vm6, %v1029_v26 }
 0x157   : > { %1121 = vst.msk [vmem:[#allocation3 + $0x10] sm:$0xff] %vm1118_vm6, %v1027_v9  ;;  %1616 = vrot.lane.b32.xlu1 %v1545_v6, %s5293_s7  ;;  %v1554_v6 = vld [vmem:[#allocation2 + $0xf1] sm:$0xff]  ;;  %v1555_v9 = vld [vmem:[#allocation2 + $0xf9] sm:$0xff] }
 0x158   : > { %1614 = vrot.lane.b32.xlu0 %v1544_v8, %s5293_s7 }
 0x159   : > { %v1033_v34 = vpop.permute.xlu1 %1032 }
 0x15a   : > { %v1031_v16 = vpop.permute.xlu0 %1030  ;;  %1124 = vst.msk [vmem:[#allocation3 + $0x28] sm:$0xff] %vm1118_vm6, %v1033_v34 }
 0x15b   : > { %1123 = vst.msk [vmem:[#allocation3 + $0x20] sm:$0xff] %vm1118_vm6, %v1031_v16  ;;  %1231 = vrot.lane.b32.xlu1 %v1737_v21, %s5291_s22  ;;  %v1747_v16 = vld [vmem:[#allocation2 + $0xf2] sm:$0xff] }
 0x15c   : > { %1807 = vrot.lane.b32.xlu0 %v1737_v21, %s5294_s8 }
 0x15d   : > { %v1037_v13 = vpop.permute.xlu1 %1036 }
 0x15e   : > { %v1035_v51 = vpop.permute.xlu0 %1034  ;;  %1126 = vst.msk [vmem:[#allocation3 + $0x38] sm:$0xff] %vm1118_vm6, %v1037_v13 }
 0x15f   : > { %1125 = vst.msk [vmem:[#allocation3 + $0x30] sm:$0xff] %vm1118_vm6, %v1035_v51  ;;  %1233 = vrot.lane.b32.xlu1 %v1738_v35, %s5291_s22  ;;  %v1748_v51 = vld [vmem:[#allocation2 + $0xfa] sm:$0xff] }
 0x160   : > { %1809 = vrot.lane.b32.xlu0 %v1738_v35, %s5294_s8 }
 0x161   : > { %v1041_v12 = vpop.permute.xlu1 %1040 }
 0x162   : > { %v1039_v31 = vpop.permute.xlu0 %1038  ;;  %1128 = vst.msk [vmem:[#allocation3 + $0x48] sm:$0xff] %vm1118_vm6, %v1041_v12 }
 0x163   : > { %1127 = vst.msk [vmem:[#allocation3 + $0x40] sm:$0xff] %vm1118_vm6, %v1039_v31  ;;  %1427 = vrot.lane.b32.xlu1 %v5599_v57, %s5292_s4  ;;  %v1740_v57 = vld [vmem:[#allocation2 + $0x9a] sm:$0xff] }
 0x164   : > { %1425 = vrot.lane.b32.xlu0 %v5661_v60, %s5292_s4 }
 0x165   : > { %v1045_v17 = vpop.permute.xlu1 %1044 }
 0x166   : > { %v1043_v4 = vpop.permute.xlu0 %1042  ;;  %1130 = vst.msk [vmem:[#allocation3 + $0x58] sm:$0xff] %vm1118_vm6, %v1045_v17 }
 0x167   : > { %1129 = vst.msk [vmem:[#allocation3 + $0x50] sm:$0xff] %vm1118_vm6, %v1043_v4  ;;  %1620 = vrot.lane.b32.xlu1 %v1547_v2, %s5293_s7  ;;  %v1363_v2 = vld [vmem:[#allocation2 + $0x108] sm:$0xff] }
 0x168   : > { %1618 = vrot.lane.b32.xlu0 %v1546_v45, %s5293_s7 }
 0x169   : > { %v1049_v11 = vpop.permute.xlu1 %1048 }
 0x16a   : > { %v1047_v10 = vpop.permute.xlu0 %1046  ;;  %1132 = vst.msk [vmem:[#allocation3 + $0x68] sm:$0xff] %vm1118_vm6, %v1049_v11 }
 0x16b   : > { %1131 = vst.msk [vmem:[#allocation3 + $0x60] sm:$0xff] %vm1118_vm6, %v1047_v10  ;;  %1235 = vrot.lane.b32.xlu1 %v1739_v22, %s5291_s22  ;;  %v1556_v10 = vld [vmem:[#allocation2 + $0x109] sm:$0xff] }
 0x16c   : > { %1811 = vrot.lane.b32.xlu0 %v1739_v22, %s5294_s8  ;;  %v1364_v22 = vld [vmem:[#allocation2 + $0x110] sm:$0xff] }
 0x16d   : > { %v1053_v0 = vpop.permute.xlu1 %1052 }
 0x16e   : > { %v1051_v60 = vpop.permute.xlu0 %1050  ;;  %1134 = vst.msk [vmem:[#allocation3 + $0x78] sm:$0xff] %vm1118_vm6, %v1053_v0  ;;  %v1749_v0 = vld [vmem:[#allocation2 + $0x10a] sm:$0xff] }
 0x16f   : > { %1133 = vst.msk [vmem:[#allocation3 + $0x70] sm:$0xff] %vm1118_vm6, %v1051_v60  ;;  %1237 = vrot.lane.b32.xlu1 %v1740_v57, %s5291_s22  ;;  %v1557_v60 = vld [vmem:[#allocation2 + $0x111] sm:$0xff] }
 0x170   : > { %1813 = vrot.lane.b32.xlu0 %v1740_v57, %s5294_s8 }
 0x171   : > { %v1057_v25 = vpop.permute.xlu1 %1056 }
 0x172   : > { %v1055_v5 = vpop.permute.xlu0 %1054  ;;  %1136 = vst.msk [vmem:[#allocation3 + $0x88] sm:$0xff] %vm1118_vm6, %v1057_v25 }
 0x173   : > { %1135 = vst.msk [vmem:[#allocation3 + $0x80] sm:$0xff] %vm1118_vm6, %v1055_v5  ;;  %1431 = vrot.lane.b32.xlu1 %v5612_v61, %s5292_s4  ;;  %v1742_v61 = vld [vmem:[#allocation2 + $0xb2] sm:$0xff] }
 0x174   : > { %1429 = vrot.lane.b32.xlu0 %v5679_v33, %s5292_s4 }
 0x175   : > { %v1061_v30 = vpop.permute.xlu1 %1060 }
 0x176   : > { %v1059_v29 = vpop.permute.xlu0 %1058  ;;  %1138 = vst.msk [vmem:[#allocation3 + $0x98] sm:$0xff] %vm1118_vm6, %v1061_v30 }
 0x177   : > { %1137 = vst.msk [vmem:[#allocation3 + $0x90] sm:$0xff] %vm1118_vm6, %v1059_v29  ;;  %1624 = vrot.lane.b32.xlu1 %v1549_v28, %s5293_s7  ;;  %v1750_v29 = vld [vmem:[#allocation2 + $0x112] sm:$0xff] }
 0x178   : > { %1622 = vrot.lane.b32.xlu0 %v1548_v27, %s5293_s7 }
 0x179   : > { %v1065_v44 = vpop.permute.xlu1 %1064 }
 0x17a   : > { %v1063_v43 = vpop.permute.xlu0 %1062  ;;  %1140 = vst.msk [vmem:[#allocation3 + $0xa8] sm:$0xff] %vm1118_vm6, %v1065_v44 }
 0x17b   : > { %1139 = vst.msk [vmem:[#allocation3 + $0xa0] sm:$0xff] %vm1118_vm6, %v1063_v43  ;;  %1239 = vrot.lane.b32.xlu1 %v1741_v32, %s5291_s22  ;;  %v1365_v43 = vld [vmem:[#allocation2 + $0x120] sm:$0xff] }
 0x17c   : > { %1815 = vrot.lane.b32.xlu0 %v1741_v32, %s5294_s8 }
 0x17d   : > { %v1069_v49 = vpop.permute.xlu1 %1068 }
 0x17e   : > { %v1067_v33 = vpop.permute.xlu0 %1066  ;;  %1142 = vst.msk [vmem:[#allocation3 + $0xb8] sm:$0xff] %vm1118_vm6, %v1069_v49  ;;  %v1558_v49 = vld [vmem:[#allocation2 + $0x121] sm:$0xff] }
 0x17f   : > { %1141 = vst.msk [vmem:[#allocation3 + $0xb0] sm:$0xff] %vm1118_vm6, %v1067_v33  ;;  %1241 = vrot.lane.b32.xlu1 %v1742_v61, %s5291_s22  ;;  %v1366_v33 = vld [vmem:[#allocation2 + $0x128] sm:$0xff] }
 0x180   : > { %1817 = vrot.lane.b32.xlu0 %v1742_v61, %s5294_s8 }
 0x181   : > { %v1073_v41 = vpop.permute.xlu1 %1072 }
 0x182   : > { %v1071_v38 = vpop.permute.xlu0 %1070  ;;  %1144 = vst.msk [vmem:[#allocation3 + $0xc8] sm:$0xff] %vm1118_vm6, %v1073_v41 }
 0x183   : > { %1143 = vst.msk [vmem:[#allocation3 + $0xc0] sm:$0xff] %vm1118_vm6, %v1071_v38  ;;  %1435 = vrot.lane.b32.xlu1 %v5619_v40, %s5292_s4  ;;  %v259_v40 = vld [vmem:[#allocation2 + $0x19a] sm:$0x1] }
 0x184   : > { %1433 = vrot.lane.b32.xlu0 %v5691_v19, %s5292_s4  ;;  %278 = vst.msk [vmem:[#allocation2 + $0x198] sm:$0x1] %vm260_vm1, %v259_v40 }
 0x185   : > { %v1077_v59 = vpop.permute.xlu1 %1076 }
 0x186   : > { %v1075_v54 = vpop.permute.xlu0 %1074  ;;  %1146 = vst.msk [vmem:[#allocation3 + $0xd8] sm:$0xff] %vm1118_vm6, %v1077_v59 }
 0x187   : > { %1145 = vst.msk [vmem:[#allocation3 + $0xd0] sm:$0xff] %vm1118_vm6, %v1075_v54  ;;  %1628 = vrot.lane.b32.xlu1 %v1551_v53, %s5293_s7  ;;  %v1559_v53 = vld [vmem:[#allocation2 + $0x129] sm:$0xff] }
 0x188   : > { %1626 = vrot.lane.b32.xlu0 %v1550_v50, %s5293_s7  ;;  %v1751_v54 = vld [vmem:[#allocation2 + $0x122] sm:$0xff] }
 0x189   : > { %v1081_v46 = vpop.permute.xlu1 %1080 }
 0x18a   : > { %v1079_v19 = vpop.permute.xlu0 %1078  ;;  %1148 = vst.msk [vmem:[#allocation3 + $0xe8] sm:$0xff] %vm1118_vm6, %v1081_v46 }
 0x18b   : > { %1147 = vst.msk [vmem:[#allocation3 + $0xe0] sm:$0xff] %vm1118_vm6, %v1079_v19  ;;  %1243 = vrot.lane.b32.xlu1 %v1743_v39, %s5291_s22  ;;  %v1752_v19 = vld [vmem:[#allocation2 + $0x12a] sm:$0xff] }
 0x18c   : > { %1819 = vrot.lane.b32.xlu0 %v1743_v39, %s5294_s8 }
 0x18d   : > { %v1085_v52 = vpop.permute.xlu1 %1084 }
 0x18e   : > { %v1083_v24 = vpop.permute.xlu0 %1082  ;;  %1150 = vst.msk [vmem:[#allocation3 + $0xf8] sm:$0xff] %vm1118_vm6, %v1085_v52 }
 0x18f   : > { %1149 = vst.msk [vmem:[#allocation3 + $0xf0] sm:$0xff] %vm1118_vm6, %v1083_v24  ;;  %1245 = vrot.lane.b32.xlu1 %v1744_v58, %s5291_s22 }
 0x190   : > { %1821 = vrot.lane.b32.xlu0 %v1744_v58, %s5294_s8  ;;  %v1367_v58 = vld [vmem:[#allocation2 + $0x138] sm:$0xff] }
 0x191   : > { %v1218_v42 = vpop.permute.xlu1 %1217 }
 0x192   : > { %v1216_v37 = vpop.permute.xlu0 %1215  ;;  %1313 = vst.msk [vmem:[#allocation3 + $0x8] sm:$0xff] %vm1311_vm7, %v1218_v42  ;;  %v1560_v42 = vld [vmem:[#allocation2 + $0x139] sm:$0xff] }
 0x193   : > { %1312 = vst.msk [vmem:[#allocation3] sm:$0xff] %vm1311_vm7, %v1216_v37  ;;  %1439 = vrot.lane.b32.xlu1 %v5626_v48, %s5292_s4  ;;  %v1746_v48 = vld [vmem:[#allocation2 + $0xe2] sm:$0xff] }
 0x194   : > { %1437 = vrot.lane.b32.xlu0 %v5695_v18, %s5292_s4  ;;  %v1368_v37 = vld [vmem:[#allocation2 + $0x140] sm:$0xff] }
 0x195   : > { %v1222_v7 = vpop.permute.xlu1 %1221 }
 0x196   : > { %v1220_v3 = vpop.permute.xlu0 %1219  ;;  %1315 = vst.msk [vmem:[#allocation3 + $0x18] sm:$0xff] %vm1311_vm7, %v1222_v7  ;;  %v1753_v7 = vld [vmem:[#allocation2 + $0x13a] sm:$0xff] }
 0x197   : > { %1314 = vst.msk [vmem:[#allocation3 + $0x10] sm:$0xff] %vm1311_vm7, %v1220_v3  ;;  %1632 = vrot.lane.b32.xlu1 %v1553_v23, %s5293_s7  ;;  %v1561_v3 = vld [vmem:[#allocation2 + $0x141] sm:$0xff] }
 0x198   : > { %1630 = vrot.lane.b32.xlu0 %v1552_v20, %s5293_s7 }
 0x199   : > { %v1226_v15 = vpop.permute.xlu1 %1225 }
 0x19a   : > { %v1224_v18 = vpop.permute.xlu0 %1223  ;;  %1317 = vst.msk [vmem:[#allocation3 + $0x28] sm:$0xff] %vm1311_vm7, %v1226_v15 }
 0x19b   : > { %1316 = vst.msk [vmem:[#allocation3 + $0x20] sm:$0xff] %vm1311_vm7, %v1224_v18  ;;  %1247 = vrot.lane.b32.xlu1 %v1745_v14, %s5291_s22 }
 0x19c   : > { %1823 = vrot.lane.b32.xlu0 %v1745_v14, %s5294_s8 }
 0x19d   : > { %v1412_v47 = vpop.permute.xlu1 %1411 }
 0x19e   : > { %v1410_v36 = vpop.permute.xlu0 %1409  ;;  %1507 = vst.msk [vmem:[#allocation3 + $0x8] sm:$0xff] %vm1505_vm8, %v1412_v47 }
 0x19f   : > { %1506 = vst.msk [vmem:[#allocation3] sm:$0xff] %vm1505_vm8, %v1410_v36  ;;  %1249 = vrot.lane.b32.xlu1 %v1746_v48, %s5291_s22 }
 0x1a0   : > { %1825 = vrot.lane.b32.xlu0 %v1746_v48, %s5294_s8  ;;  %v1754_v48 = vld [vmem:[#allocation2 + $0x142] sm:$0xff] }
 0x1a1   : > { %v1605_v8 = vpop.permute.xlu1 %1604 }
 0x1a2   : > { %v1603_v1 = vpop.permute.xlu0 %1602  ;;  %1700 = vst.msk [vmem:[#allocation3 + $0x8] sm:$0xff] %vm1698_vm9, %v1605_v8  ;;  %v1370_v8 = vld [vmem:[#allocation2 + $0x158] sm:$0xff] }
 0x1a3   : > { %1699 = vst.msk [vmem:[#allocation3] sm:$0xff] %vm1698_vm9, %v1603_v1  ;;  %1443 = vrot.lane.b32.xlu1 %v1362_v56, %s5292_s4 }
 0x1a4   : > { %1441 = vrot.lane.b32.xlu0 %v1361_v63, %s5292_s4  ;;  %v1369_v63 = vld [vmem:[#allocation2 + $0x150] sm:$0xff] }
 0x1a5   : > { %v1798_v21 = vpop.permute.xlu1 %1797 }
 0x1a6   : > { %v1796_v26 = vpop.permute.xlu0 %1795  ;;  %1893 = vst.msk [vmem:[#allocation3 + $0x8] sm:$0xff] %vm1891_vm10, %v1798_v21 }
 0x1a7   : > { %1892 = vst.msk [vmem:[#allocation3] sm:$0xff] %vm1891_vm10, %v1796_v26  ;;  %1636 = vrot.lane.b32.xlu1 %v1555_v9, %s5293_s7 }
 0x1a8   : > { %1634 = vrot.lane.b32.xlu0 %v1554_v6, %s5293_s7  ;;  %v1562_v6 = vld [vmem:[#allocation2 + $0x151] sm:$0xff] }
 0x1a9   : > { %v1416_v35 = vpop.permute.xlu1 %1415 }
 0x1aa   : > { %v1414_v34 = vpop.permute.xlu0 %1413  ;;  %1509 = vst.msk [vmem:[#allocation3 + $0x18] sm:$0xff] %vm1505_vm8, %v1416_v35 }
 0x1ab   : > { %1508 = vst.msk [vmem:[#allocation3 + $0x10] sm:$0xff] %vm1505_vm8, %v1414_v34  ;;  %1251 = vrot.lane.b32.xlu1 %v1747_v16, %s5291_s22  ;;  %v1755_v34 = vld [vmem:[#allocation2 + $0x152] sm:$0xff] }
 0x1ac   : > { %1827 = vrot.lane.b32.xlu0 %v1747_v16, %s5294_s8  ;;  %v1563_v16 = vld [vmem:[#allocation2 + $0x159] sm:$0xff] }
 0x1ad   : > { %v1609_v31 = vpop.permute.xlu1 %1608  ;;  %v1925_v45 = vld [vmem:[#allocation3 + $0x8] sm:$0xff] }
 0x1ae   : > { %v1607_v13 = vpop.permute.xlu0 %1606  ;;  %v1924_v12 = vld [vmem:[#allocation3] sm:$0xff]  ;;  %1702 = vst.msk [vmem:[#allocation3 + $0x18] sm:$0xff] %vm1698_vm9, %v1609_v31  ;;  %v1756_v31 = vld [vmem:[#allocation2 + $0x15a] sm:$0xff] }
 0x1af   : > { %1701 = vst.msk [vmem:[#allocation3 + $0x10] sm:$0xff] %vm1698_vm9, %v1607_v13  ;;  %5153 = vmatprep.mubr.msk.f32.mxu0 %vm1961_vm11, %v1924_v12  ;;  %1253 = vrot.lane.b32.xlu1 %v1748_v51, %s5291_s22 }
 0x1b0   : > { %1829 = vrot.lane.b32.xlu0 %v1748_v51, %s5294_s8  ;;  %5154 = vmatmul.mubr.msk.f32.vlgmr.msra.gmra.mxu0 %vm1961_vm11, %v1925_v45 }
 0x1b1   : > { %v1802_v17 = vpop.permute.xlu1 %1801 }
 0x1b2   : > { %v1800_v4 = vpop.permute.xlu0 %1799  ;;  %1895 = vst.msk [vmem:[#allocation3 + $0x18] sm:$0xff] %vm1891_vm10, %v1802_v17 }
 0x1b3   : > { %1894 = vst.msk [vmem:[#allocation3 + $0x10] sm:$0xff] %vm1891_vm10, %v1800_v4  ;;  %1447 = vrot.lane.b32.xlu1 %v1364_v22, %s5292_s4  ;;  %v1372_v22 = vld [vmem:[#allocation2 + $0x170] sm:$0xff] }
 0x1b4   : > { %1445 = vrot.lane.b32.xlu0 %v1363_v2, %s5292_s4  ;;  %v1371_v2 = vld [vmem:[#allocation2 + $0x168] sm:$0xff] }
 0x1b5   : > { %v1420_v57 = vpop.permute.xlu1 %1419 }
 0x1b6   : > { %v1418_v11 = vpop.permute.xlu0 %1417  ;;  %1511 = vst.msk [vmem:[#allocation3 + $0x28] sm:$0xff] %vm1505_vm8, %v1420_v57 }
 0x1b7   : > { %1510 = vst.msk [vmem:[#allocation3 + $0x20] sm:$0xff] %vm1505_vm8, %v1418_v11  ;;  %1640 = vrot.lane.b32.xlu1 %v1557_v60, %s5293_s7 }
 0x1b8   : > { %1638 = vrot.lane.b32.xlu0 %v1556_v10, %s5293_s7  ;;  %v1564_v10 = vld [vmem:[#allocation2 + $0x169] sm:$0xff] }
 0x1b9   : > { %v1613_v25 = vpop.permute.xlu1 %1612  ;;  %v1927_v28 = vld [vmem:[#allocation3 + $0x18] sm:$0xff] }
 0x1ba   : > { %v1611_v5 = vpop.permute.xlu0 %1610  ;;  %v1926_v27 = vld [vmem:[#allocation3 + $0x10] sm:$0xff]  ;;  %1704 = vst.msk [vmem:[#allocation3 + $0x28] sm:$0xff] %vm1698_vm9, %v1613_v25 }
 0x1bb   : > { %1703 = vst.msk [vmem:[#allocation3 + $0x20] sm:$0xff] %vm1698_vm9, %v1611_v5  ;;  %5156 = vmatprep.mubr.msk.f32.mxu0 %vm1961_vm11, %v1926_v27  ;;  %1255 = vrot.lane.b32.xlu1 %v1749_v0, %s5291_s22  ;;  %v1757_v5 = vld [vmem:[#allocation2 + $0x16a] sm:$0xff] }
 0x1bc   : > { %1831 = vrot.lane.b32.xlu0 %v1749_v0, %s5294_s8  ;;  %5157 = vmatmul.mubr.msk.f32.gmra.mxu0 %vm1961_vm11, %v1927_v28  ;;  %v1565_v0 = vld [vmem:[#allocation2 + $0x171] sm:$0xff] }
 0x1bd   : > { %v1228_v32 = vpop.permute.xlu1 %1227 }
 0x1be   : > { %v1804_v30 = vpop.permute.xlu0 %1803  ;;  %1318 = vst.msk [vmem:[#allocation3 + $0x30] sm:$0xff] %vm1311_vm7, %v1228_v32 }
 0x1bf   : > { %1896 = vst.msk [vmem:[#allocation3 + $0x20] sm:$0xff] %vm1891_vm10, %v1804_v30  ;;  %1257 = vrot.lane.b32.xlu1 %v1750_v29, %s5291_s22 }
 0x1c0   : > { %1833 = vrot.lane.b32.xlu0 %v1750_v29, %s5294_s8  ;;  %v1758_v29 = vld [vmem:[#allocation2 + $0x172] sm:$0xff] }
 0x1c1   : > { %v1230_v61 = vpop.permute.xlu1 %1229 }
 0x1c2   : > { %v1806_v44 = vpop.permute.xlu0 %1805  ;;  %1319 = vst.msk [vmem:[#allocation3 + $0x38] sm:$0xff] %vm1311_vm7, %v1230_v61 }
 0x1c3   : > { %1897 = vst.msk [vmem:[#allocation3 + $0x28] sm:$0xff] %vm1891_vm10, %v1806_v44  ;;  %1451 = vrot.lane.b32.xlu1 %v1366_v33, %s5292_s4  ;;  %v1374_v33 = vld [vmem:[#allocation2 + $0x188] sm:$0xff] }
 0x1c4   : > { %1449 = vrot.lane.b32.xlu0 %v1365_v43, %s5292_s4  ;;  %v1373_v43 = vld [vmem:[#allocation2 + $0x180] sm:$0xff] }
 0x1c5   : > { %v1424_v41 = vpop.permute.xlu1 %1423 }
 0x1c6   : > { %v1422_v38 = vpop.permute.xlu0 %1421  ;;  %v1928_v50 = vld [vmem:[#allocation3 + $0x20] sm:$0xff]  ;;  %1513 = vst.msk [vmem:[#allocation3 + $0x38] sm:$0xff] %vm1505_vm8, %v1424_v41 }
 0x1c7   : > { %1512 = vst.msk [vmem:[#allocation3 + $0x30] sm:$0xff] %vm1505_vm8, %v1422_v38  ;;  %5159 = vmatprep.mubr.msk.f32.mxu0 %vm1961_vm11, %v1928_v50  ;;  %1644 = vrot.lane.b32.xlu1 %v1559_v53, %s5293_s7  ;;  %v1567_v53 = vld [vmem:[#allocation2 + $0x189] sm:$0xff] }
 0x1c8   : > { %1642 = vrot.lane.b32.xlu0 %v1558_v49, %s5293_s7  ;;  %v1566_v49 = vld [vmem:[#allocation2 + $0x181] sm:$0xff] }
 0x1c9   : > { %v1617_v62 = vpop.permute.xlu1 %1616 }
 0x1ca   : > { %v1615_v59 = vpop.permute.xlu0 %1614  ;;  %v1929_v39 = vld [vmem:[#allocation3 + $0x28] sm:$0xff]  ;;  %1706 = vst.msk [vmem:[#allocation3 + $0x38] sm:$0xff] %vm1698_vm9, %v1617_v62 }
 0x1cb   : > { %1705 = vst.msk [vmem:[#allocation3 + $0x30] sm:$0xff] %vm1698_vm9, %v1615_v59  ;;  %5160 = vmatmul.mubr.msk.f32.gmra.mxu0 %vm1961_vm11, %v1929_v39  ;;  %1259 = vrot.lane.b32.xlu1 %v1751_v54, %s5291_s22 }
 0x1cc   : > { %1835 = vrot.lane.b32.xlu0 %v1751_v54, %s5294_s8  ;;  %v1759_v54 = vld [vmem:[#allocation2 + $0x182] sm:$0xff] }
 0x1cd   : > { %v1232_v40 = vpop.permute.xlu1 %1231 }
 0x1ce   : > { %v1808_v46 = vpop.permute.xlu0 %1807  ;;  %1320 = vst.msk [vmem:[#allocation3 + $0x40] sm:$0xff] %vm1311_vm7, %v1232_v40 }
 0x1cf   : > { %1898 = vst.msk [vmem:[#allocation3 + $0x30] sm:$0xff] %vm1891_vm10, %v1808_v46  ;;  %1261 = vrot.lane.b32.xlu1 %v1752_v19, %s5291_s22 }
 0x1d0   : > { %1837 = vrot.lane.b32.xlu0 %v1752_v19, %s5294_s8  ;;  %v1760_v19 = vld [vmem:[#allocation2 + $0x18a] sm:$0xff] }
 0x1d1   : > { %v1234_v52 = vpop.permute.xlu1 %1233 }
 0x1d2   : > { %v1810_v24 = vpop.permute.xlu0 %1809  ;;  %1321 = vst.msk [vmem:[#allocation3 + $0x48] sm:$0xff] %vm1311_vm7, %v1234_v52 }
 0x1d3   : > { %1899 = vst.msk [vmem:[#allocation3 + $0x38] sm:$0xff] %vm1891_vm10, %v1810_v24  ;;  %1455 = vrot.lane.b32.xlu1 %v1368_v37, %s5292_s4  ;;  %v1376_v37 = vld [vmem:[#allocation2 + $0x1a0] sm:$0xff] }
 0x1d4   : > { %1453 = vrot.lane.b32.xlu0 %v1367_v58, %s5292_s4  ;;  %v1375_v58 = vld [vmem:[#allocation2 + $0x198] sm:$0xff] }
 0x1d5   : > { %v1428_v20 = vpop.permute.xlu1 %1427 }
 0x1d6   : > { %v1426_v55 = vpop.permute.xlu0 %1425  ;;  %v1930_v23 = vld [vmem:[#allocation3 + $0x30] sm:$0xff]  ;;  %1515 = vst.msk [vmem:[#allocation3 + $0x48] sm:$0xff] %vm1505_vm8, %v1428_v20 }
 0x1d7   : > { %1514 = vst.msk [vmem:[#allocation3 + $0x40] sm:$0xff] %vm1505_vm8, %v1426_v55  ;;  %5162 = vmatprep.mubr.msk.f32.mxu0 %vm1961_vm11, %v1930_v23  ;;  %1648 = vrot.lane.b32.xlu1 %v1561_v3, %s5293_s7  ;;  %v1569_v3 = vld [vmem:[#allocation2 + $0x1a1] sm:$0xff] }
 0x1d8   : > { %1646 = vrot.lane.b32.xlu0 %v1560_v42, %s5293_s7  ;;  %v1568_v42 = vld [vmem:[#allocation2 + $0x199] sm:$0xff] }
 0x1d9   : > { %v1621_v18 = vpop.permute.xlu1 %1620 }
 0x1da   : > { %v1619_v14 = vpop.permute.xlu0 %1618  ;;  %v1931_v15 = vld [vmem:[#allocation3 + $0x38] sm:$0xff]  ;;  %1708 = vst.msk [vmem:[#allocation3 + $0x48] sm:$0xff] %vm1698_vm9, %v1621_v18 }
 0x1db   : > { %1707 = vst.msk [vmem:[#allocation3 + $0x40] sm:$0xff] %vm1698_vm9, %v1619_v14  ;;  %5163 = vmatmul.mubr.msk.f32.gmra.mxu0 %vm1961_vm11, %v1931_v15  ;;  %1263 = vrot.lane.b32.xlu1 %v1753_v7, %s5291_s22 }
 0x1dc   : > { %1839 = vrot.lane.b32.xlu0 %v1753_v7, %s5294_s8  ;;  %v1761_v7 = vld [vmem:[#allocation2 + $0x19a] sm:$0xff] }
 0x1dd   : > { %v1236_v47 = vpop.permute.xlu1 %1235 }
 0x1de   : > { %v1812_v36 = vpop.permute.xlu0 %1811  ;;  %1322 = vst.msk [vmem:[#allocation3 + $0x50] sm:$0xff] %vm1311_vm7, %v1236_v47 }
 0x1df   : > { %1900 = vst.msk [vmem:[#allocation3 + $0x40] sm:$0xff] %vm1891_vm10, %v1812_v36  ;;  %1265 = vrot.lane.b32.xlu1 %v1754_v48, %s5291_s22 }
 0x1e0   : > { %1841 = vrot.lane.b32.xlu0 %v1754_v48, %s5294_s8  ;;  %v1762_v48 = vld [vmem:[#allocation2 + $0x1a2] sm:$0xff] }
 0x1e1   : > { %v1238_v1 = vpop.permute.xlu1 %1237 }
 0x1e2   : > { %v1814_v56 = vpop.permute.xlu0 %1813  ;;  %1323 = vst.msk [vmem:[#allocation3 + $0x58] sm:$0xff] %vm1311_vm7, %v1238_v1 }
 0x1e3   : > { %1901 = vst.msk [vmem:[#allocation3 + $0x48] sm:$0xff] %vm1891_vm10, %v1814_v56  ;;  %1459 = vrot.lane.b32.xlu1 %v1370_v8, %s5292_s4 }
 0x1e4   : > { %1457 = vrot.lane.b32.xlu0 %v1369_v63, %s5292_s4 }
 0x1e5   : > { %v1432_v26 = vpop.permute.xlu1 %1431 }
 0x1e6   : > { %v1430_v9 = vpop.permute.xlu0 %1429  ;;  %v1932_v21 = vld [vmem:[#allocation3 + $0x40] sm:$0xff]  ;;  %1517 = vst.msk [vmem:[#allocation3 + $0x58] sm:$0xff] %vm1505_vm8, %v1432_v26 }
 0x1e7   : > { %1516 = vst.msk [vmem:[#allocation3 + $0x50] sm:$0xff] %vm1505_vm8, %v1430_v9  ;;  %5165 = vmatprep.mubr.msk.f32.mxu0 %vm1961_vm11, %v1932_v21  ;;  %1652 = vrot.lane.b32.xlu1 %v1563_v16, %s5293_s7 }
 0x1e8   : > { %1650 = vrot.lane.b32.xlu0 %v1562_v6, %s5293_s7 }
 0x1e9   : > { %v1625_v51 = vpop.permute.xlu1 %1624 }
 0x1ea   : > { %v1623_v35 = vpop.permute.xlu0 %1622  ;;  %v1933_v13 = vld [vmem:[#allocation3 + $0x48] sm:$0xff]  ;;  %1710 = vst.msk [vmem:[#allocation3 + $0x58] sm:$0xff] %vm1698_vm9, %v1625_v51 }
 0x1eb   : > { %1709 = vst.msk [vmem:[#allocation3 + $0x50] sm:$0xff] %vm1698_vm9, %v1623_v35  ;;  %5166 = vmatmul.mubr.msk.f32.gmra.mxu0 %vm1961_vm11, %v1933_v13  ;;  %1267 = vrot.lane.b32.xlu1 %v1755_v34, %s5291_s22 }
 0x1ec   : > { %1843 = vrot.lane.b32.xlu0 %v1755_v34, %s5294_s8 }
 0x1ed   : > { %v1240_v45 = vpop.permute.xlu1 %1239 }
 0x1ee   : > { %v1816_v12 = vpop.permute.xlu0 %1815  ;;  %1324 = vst.msk [vmem:[#allocation3 + $0x60] sm:$0xff] %vm1311_vm7, %v1240_v45 }
 0x1ef   : > { %1902 = vst.msk [vmem:[#allocation3 + $0x50] sm:$0xff] %vm1891_vm10, %v1816_v12  ;;  %1269 = vrot.lane.b32.xlu1 %v1756_v31, %s5291_s22 }
 0x1f0   : > { %1845 = vrot.lane.b32.xlu0 %v1756_v31, %s5294_s8 }
 0x1f1   : > { %v1242_v17 = vpop.permute.xlu1 %1241 }
 0x1f2   : > { %v1818_v4 = vpop.permute.xlu0 %1817  ;;  %1325 = vst.msk [vmem:[#allocation3 + $0x68] sm:$0xff] %vm1311_vm7, %v1242_v17 }
 0x1f3   : > { %1903 = vst.msk [vmem:[#allocation3 + $0x58] sm:$0xff] %vm1891_vm10, %v1818_v4  ;;  %1463 = vrot.lane.b32.xlu1 %v1372_v22, %s5292_s4 }
 0x1f4   : > { %1461 = vrot.lane.b32.xlu0 %v1371_v2, %s5292_s4 }
 0x1f5   : > { %v1436_v57 = vpop.permute.xlu1 %1435 }
 0x1f6   : > { %v1434_v11 = vpop.permute.xlu0 %1433  ;;  %v1934_v60 = vld [vmem:[#allocation3 + $0x50] sm:$0xff]  ;;  %1519 = vst.msk [vmem:[#allocation3 + $0x68] sm:$0xff] %vm1505_vm8, %v1436_v57 }
 0x1f7   : > { %1518 = vst.msk [vmem:[#allocation3 + $0x60] sm:$0xff] %vm1505_vm8, %v1434_v11  ;;  %5168 = vmatprep.mubr.msk.f32.mxu0 %vm1961_vm11, %v1934_v60  ;;  %1656 = vrot.lane.b32.xlu1 %v1565_v0, %s5293_s7 }
 0x1f8   : > { %1654 = vrot.lane.b32.xlu0 %v1564_v10, %s5293_s7 }
 0x1f9   : > { %v1629_v27 = vpop.permute.xlu1 %1628 }
 0x1fa   : > { %v1627_v25 = vpop.permute.xlu0 %1626  ;;  %v1935_v28 = vld [vmem:[#allocation3 + $0x58] sm:$0xff]  ;;  %1712 = vst.msk [vmem:[#allocation3 + $0x68] sm:$0xff] %vm1698_vm9, %v1629_v27 }
 0x1fb   : > { %1711 = vst.msk [vmem:[#allocation3 + $0x60] sm:$0xff] %vm1698_vm9, %v1627_v25  ;;  %5169 = vmatmul.mubr.msk.f32.gmra.mxu0 %vm1961_vm11, %v1935_v28  ;;  %1271 = vrot.lane.b32.xlu1 %v1757_v5, %s5291_s22 }
 0x1fc   : > { %1847 = vrot.lane.b32.xlu0 %v1757_v5, %s5294_s8 }
 0x1fd   : > { %v1244_v32 = vpop.permute.xlu1 %1243 }
 0x1fe   : > { %v1820_v30 = vpop.permute.xlu0 %1819  ;;  %1326 = vst.msk [vmem:[#allocation3 + $0x70] sm:$0xff] %vm1311_vm7, %v1244_v32 }
 0x1ff   : > { %1904 = vst.msk [vmem:[#allocation3 + $0x60] sm:$0xff] %vm1891_vm10, %v1820_v30  ;;  %1273 = vrot.lane.b32.xlu1 %v1758_v29, %s5291_s22 }
 0x200   : > { %1849 = vrot.lane.b32.xlu0 %v1758_v29, %s5294_s8 }
 0x201   : > { %v1246_v61 = vpop.permute.xlu1 %1245 }
 0x202   : > { %v1822_v44 = vpop.permute.xlu0 %1821  ;;  %1327 = vst.msk [vmem:[#allocation3 + $0x78] sm:$0xff] %vm1311_vm7, %v1246_v61 }
 0x203   : > { %1905 = vst.msk [vmem:[#allocation3 + $0x68] sm:$0xff] %vm1891_vm10, %v1822_v44  ;;  %1467 = vrot.lane.b32.xlu1 %v1374_v33, %s5292_s4 }
 0x204   : > { %1465 = vrot.lane.b32.xlu0 %v1373_v43, %s5292_s4 }
 0x205   : > { %v1440_v41 = vpop.permute.xlu1 %1439 }
 0x206   : > { %v1438_v38 = vpop.permute.xlu0 %1437  ;;  %v1936_v50 = vld [vmem:[#allocation3 + $0x60] sm:$0xff]  ;;  %1521 = vst.msk [vmem:[#allocation3 + $0x78] sm:$0xff] %vm1505_vm8, %v1440_v41 }
 0x207   : > { %1520 = vst.msk [vmem:[#allocation3 + $0x70] sm:$0xff] %vm1505_vm8, %v1438_v38  ;;  %5171 = vmatprep.mubr.msk.f32.mxu0 %vm1961_vm11, %v1936_v50  ;;  %1660 = vrot.lane.b32.xlu1 %v1567_v53, %s5293_s7 }
 0x208   : > { %1658 = vrot.lane.b32.xlu0 %v1566_v49, %s5293_s7 }
 0x209   : > { %v1633_v62 = vpop.permute.xlu1 %1632 }
 0x20a   : > { %v1631_v59 = vpop.permute.xlu0 %1630  ;;  %v1937_v39 = vld [vmem:[#allocation3 + $0x68] sm:$0xff]  ;;  %1714 = vst.msk [vmem:[#allocation3 + $0x78] sm:$0xff] %vm1698_vm9, %v1633_v62 }
 0x20b   : > { %1713 = vst.msk [vmem:[#allocation3 + $0x70] sm:$0xff] %vm1698_vm9, %v1631_v59  ;;  %5172 = vmatmul.mubr.msk.f32.gmra.mxu0 %vm1961_vm11, %v1937_v39  ;;  %1275 = vrot.lane.b32.xlu1 %v1759_v54, %s5291_s22 }
 0x20c   : > { %1851 = vrot.lane.b32.xlu0 %v1759_v54, %s5294_s8 }
 0x20d   : > { %v1248_v40 = vpop.permute.xlu1 %1247 }
 0x20e   : > { %v1824_v46 = vpop.permute.xlu0 %1823  ;;  %1328 = vst.msk [vmem:[#allocation3 + $0x80] sm:$0xff] %vm1311_vm7, %v1248_v40 }
 0x20f   : > { %1906 = vst.msk [vmem:[#allocation3 + $0x70] sm:$0xff] %vm1891_vm10, %v1824_v46  ;;  %1277 = vrot.lane.b32.xlu1 %v1760_v19, %s5291_s22 }
 0x210   : > { %1853 = vrot.lane.b32.xlu0 %v1760_v19, %s5294_s8 }
 0x211   : > { %v1250_v52 = vpop.permute.xlu1 %1249 }
 0x212   : > { %v1826_v24 = vpop.permute.xlu0 %1825  ;;  %1329 = vst.msk [vmem:[#allocation3 + $0x88] sm:$0xff] %vm1311_vm7, %v1250_v52 }
 0x213   : > { %1907 = vst.msk [vmem:[#allocation3 + $0x78] sm:$0xff] %vm1891_vm10, %v1826_v24  ;;  %1471 = vrot.lane.b32.xlu1 %v1376_v37, %s5292_s4 }
 0x214   : > { %1469 = vrot.lane.b32.xlu0 %v1375_v58, %s5292_s4 }
 0x215   : > { %v1444_v20 = vpop.permute.xlu1 %1443 }
 0x216   : > { %v1442_v55 = vpop.permute.xlu0 %1441  ;;  %v1938_v23 = vld [vmem:[#allocation3 + $0x70] sm:$0xff]  ;;  %1523 = vst.msk [vmem:[#allocation3 + $0x88] sm:$0xff] %vm1505_vm8, %v1444_v20 }
 0x217   : > { %1522 = vst.msk [vmem:[#allocation3 + $0x80] sm:$0xff] %vm1505_vm8, %v1442_v55  ;;  %5174 = vmatprep.mubr.msk.f32.mxu0 %vm1961_vm11, %v1938_v23  ;;  %1664 = vrot.lane.b32.xlu1 %v1569_v3, %s5293_s7 }
 0x218   : > { %1662 = vrot.lane.b32.xlu0 %v1568_v42, %s5293_s7 }
 0x219   : > { %v1637_v18 = vpop.permute.xlu1 %1636 }
 0x21a   : > { %v1635_v14 = vpop.permute.xlu0 %1634  ;;  %v1939_v15 = vld [vmem:[#allocation3 + $0x78] sm:$0xff]  ;;  %1716 = vst.msk [vmem:[#allocation3 + $0x88] sm:$0xff] %vm1698_vm9, %v1637_v18 }
 0x21b   : > { %1715 = vst.msk [vmem:[#allocation3 + $0x80] sm:$0xff] %vm1698_vm9, %v1635_v14  ;;  %5175 = vmatmul.mubr.msk.f32.gmra.mxu0 %vm1961_vm11, %v1939_v15  ;;  %1857 = vrot.lane.b32.xlu1 %v1762_v48, %s5294_s8 }
 0x21c   : > { %1855 = vrot.lane.b32.xlu0 %v1761_v7, %s5294_s8 }
 0x21d   : > { %v1252_v47 = vpop.permute.xlu1 %1251 }
 0x21e   : > { %v1828_v36 = vpop.permute.xlu0 %1827  ;;  %1330 = vst.msk [vmem:[#allocation3 + $0x90] sm:$0xff] %vm1311_vm7, %v1252_v47 }
 0x21f   : > { %1908 = vst.msk [vmem:[#allocation3 + $0x80] sm:$0xff] %vm1891_vm10, %v1828_v36 }
 0x221   : > { %v1254_v56 = vpop.permute.xlu1 %1253 }
 0x222   : > { %v1830_v63 = vpop.permute.xlu0 %1829  ;;  %1331 = vst.msk [vmem:[#allocation3 + $0x98] sm:$0xff] %vm1311_vm7, %v1254_v56 }
 0x223   : > { %1909 = vst.msk [vmem:[#allocation3 + $0x88] sm:$0xff] %vm1891_vm10, %v1830_v63 }
 0x225   : > { %v1448_v6 = vpop.permute.xlu1 %1447 }
 0x226   : > { %v1446_v1 = vpop.permute.xlu0 %1445  ;;  %v1940_v8 = vld [vmem:[#allocation3 + $0x80] sm:$0xff]  ;;  %1525 = vst.msk [vmem:[#allocation3 + $0x98] sm:$0xff] %vm1505_vm8, %v1448_v6 }
 0x227   : > { %1524 = vst.msk [vmem:[#allocation3 + $0x90] sm:$0xff] %vm1505_vm8, %v1446_v1  ;;  %5177 = vmatprep.mubr.msk.f32.mxu0 %vm1961_vm11, %v1940_v8 }
 0x229   : > { %v1641_v21 = vpop.permute.xlu1 %1640 }
 0x22a   : > { %v1639_v9 = vpop.permute.xlu0 %1638  ;;  %v1941_v26 = vld [vmem:[#allocation3 + $0x88] sm:$0xff]  ;;  %1718 = vst.msk [vmem:[#allocation3 + $0x98] sm:$0xff] %vm1698_vm9, %v1641_v21 }
 0x22b   : > { %1717 = vst.msk [vmem:[#allocation3 + $0x90] sm:$0xff] %vm1698_vm9, %v1639_v9  ;;  %5178 = vmatmul.mubr.msk.f32.gmra.mxu0 %vm1961_vm11, %v1941_v26 }
 0x22d   : > { %v1256_v34 = vpop.permute.xlu1 %1255 }
 0x22e   : > { %v1832_v16 = vpop.permute.xlu0 %1831  ;;  %1332 = vst.msk [vmem:[#allocation3 + $0xa0] sm:$0xff] %vm1311_vm7, %v1256_v34 }
 0x22f   : > { %1910 = vst.msk [vmem:[#allocation3 + $0x90] sm:$0xff] %vm1891_vm10, %v1832_v16 }
 0x231   : > { %v1258_v51 = vpop.permute.xlu1 %1257 }
 0x232   : > { %v1834_v35 = vpop.permute.xlu0 %1833  ;;  %1333 = vst.msk [vmem:[#allocation3 + $0xa8] sm:$0xff] %vm1311_vm7, %v1258_v51 }
 0x233   : > { %1911 = vst.msk [vmem:[#allocation3 + $0x98] sm:$0xff] %vm1891_vm10, %v1834_v35 }
 0x235   : > { %v1452_v12 = vpop.permute.xlu1 %1451 }
 0x236   : > { %v1450_v13 = vpop.permute.xlu0 %1449  ;;  %v1942_v31 = vld [vmem:[#allocation3 + $0x90] sm:$0xff]  ;;  %1527 = vst.msk [vmem:[#allocation3 + $0xa8] sm:$0xff] %vm1505_vm8, %v1452_v12 }
 0x237   : > { %1526 = vst.msk [vmem:[#allocation3 + $0xa0] sm:$0xff] %vm1505_vm8, %v1450_v13  ;;  %5180 = vmatprep.mubr.msk.f32.mxu0 %vm1961_vm11, %v1942_v31 }
 0x239   : > { %v1645_v4 = vpop.permute.xlu1 %1644 }
 0x23a   : > { %v1643_v45 = vpop.permute.xlu0 %1642  ;;  %v1943_v2 = vld [vmem:[#allocation3 + $0x98] sm:$0xff]  ;;  %1720 = vst.msk [vmem:[#allocation3 + $0xa8] sm:$0xff] %vm1698_vm9, %v1645_v4 }
 0x23b   : > { %1719 = vst.msk [vmem:[#allocation3 + $0xa0] sm:$0xff] %vm1698_vm9, %v1643_v45  ;;  %5181 = vmatmul.mubr.msk.f32.gmra.mxu0 %vm1961_vm11, %v1943_v2 }
 0x23d   : > { %v1260_v22 = vpop.permute.xlu1 %1259 }
 0x23e   : > { %v1836_v17 = vpop.permute.xlu0 %1835  ;;  %1334 = vst.msk [vmem:[#allocation3 + $0xb0] sm:$0xff] %vm1311_vm7, %v1260_v22 }
 0x23f   : > { %1912 = vst.msk [vmem:[#allocation3 + $0xa0] sm:$0xff] %vm1891_vm10, %v1836_v17 }
 0x241   : > { %v1262_v11 = vpop.permute.xlu1 %1261 }
 0x242   : > { %v1838_v10 = vpop.permute.xlu0 %1837  ;;  %1335 = vst.msk [vmem:[#allocation3 + $0xb8] sm:$0xff] %vm1311_vm7, %v1262_v11 }
 0x243   : > { %1913 = vst.msk [vmem:[#allocation3 + $0xa8] sm:$0xff] %vm1891_vm10, %v1838_v10 }
 0x245   : > { %v1456_v0 = vpop.permute.xlu1 %1455 }
 0x246   : > { %v1454_v57 = vpop.permute.xlu0 %1453  ;;  %v1944_v60 = vld [vmem:[#allocation3 + $0xa0] sm:$0xff]  ;;  %1529 = vst.msk [vmem:[#allocation3 + $0xb8] sm:$0xff] %vm1505_vm8, %v1456_v0 }
 0x247   : > { %1528 = vst.msk [vmem:[#allocation3 + $0xb0] sm:$0xff] %vm1505_vm8, %v1454_v57  ;;  %5183 = vmatprep.mubr.msk.f32.mxu0 %vm1961_vm11, %v1944_v60 }
 0x249   : > { %v1649_v27 = vpop.permute.xlu1 %1648 }
 0x24a   : > { %v1647_v5 = vpop.permute.xlu0 %1646  ;;  %v1945_v25 = vld [vmem:[#allocation3 + $0xa8] sm:$0xff]  ;;  %1722 = vst.msk [vmem:[#allocation3 + $0xb8] sm:$0xff] %vm1698_vm9, %v1649_v27 }
 0x24b   : > { %1721 = vst.msk [vmem:[#allocation3 + $0xb0] sm:$0xff] %vm1698_vm9, %v1647_v5  ;;  %5184 = vmatmul.mubr.msk.f32.gmra.mxu0 %vm1961_vm11, %v1945_v25 }
 0x24d   : > { %v1264_v29 = vpop.permute.xlu1 %1263 }
 0x24e   : > { %v1840_v28 = vpop.permute.xlu0 %1839  ;;  %1336 = vst.msk [vmem:[#allocation3 + $0xc0] sm:$0xff] %vm1311_vm7, %v1264_v29 }
 0x24f   : > { %1914 = vst.msk [vmem:[#allocation3 + $0xb0] sm:$0xff] %vm1891_vm10, %v1840_v28 }
 0x251   : > { %v1266_v32 = vpop.permute.xlu1 %1265 }
 0x252   : > { %v1842_v30 = vpop.permute.xlu0 %1841  ;;  %1337 = vst.msk [vmem:[#allocation3 + $0xc8] sm:$0xff] %vm1311_vm7, %v1266_v32 }
 0x253   : > { %1915 = vst.msk [vmem:[#allocation3 + $0xb8] sm:$0xff] %vm1891_vm10, %v1842_v30 }
 0x255   : > { %v1460_v61 = vpop.permute.xlu1 %1459 }
 0x256   : > { %v1458_v43 = vpop.permute.xlu0 %1457  ;;  %v1946_v44 = vld [vmem:[#allocation3 + $0xb0] sm:$0xff]  ;;  %1531 = vst.msk [vmem:[#allocation3 + $0xc8] sm:$0xff] %vm1505_vm8, %v1460_v61 }
 0x257   : > { %1530 = vst.msk [vmem:[#allocation3 + $0xc0] sm:$0xff] %vm1505_vm8, %v1458_v43  ;;  %5186 = vmatprep.mubr.msk.f32.mxu0 %vm1961_vm11, %v1946_v44 }
 0x259   : > { %v1653_v38 = vpop.permute.xlu1 %1652 }
 0x25a   : > { %v1651_v33 = vpop.permute.xlu0 %1650  ;;  %v1947_v49 = vld [vmem:[#allocation3 + $0xb8] sm:$0xff]  ;;  %1724 = vst.msk [vmem:[#allocation3 + $0xc8] sm:$0xff] %vm1698_vm9, %v1653_v38 }
 0x25b   : > { %1723 = vst.msk [vmem:[#allocation3 + $0xc0] sm:$0xff] %vm1698_vm9, %v1651_v33  ;;  %5187 = vmatmul.mubr.msk.f32.gmra.mxu0 %vm1961_vm11, %v1947_v49 }
 0x25d   : > { %v1268_v50 = vpop.permute.xlu1 %1267 }
 0x25e   : > { %v1844_v41 = vpop.permute.xlu0 %1843  ;;  %1338 = vst.msk [vmem:[#allocation3 + $0xd0] sm:$0xff] %vm1311_vm7, %v1268_v50 }
 0x25f   : > { %1916 = vst.msk [vmem:[#allocation3 + $0xc0] sm:$0xff] %vm1891_vm10, %v1844_v41 }
 0x261   : > { %v1270_v54 = vpop.permute.xlu1 %1269 }
 0x262   : > { %v1846_v53 = vpop.permute.xlu0 %1845  ;;  %1339 = vst.msk [vmem:[#allocation3 + $0xd8] sm:$0xff] %vm1311_vm7, %v1270_v54 }
 0x263   : > { %1917 = vst.msk [vmem:[#allocation3 + $0xc8] sm:$0xff] %vm1891_vm10, %v1846_v53 }
 0x265   : > { %v1464_v39 = vpop.permute.xlu1 %1463 }
 0x266   : > { %v1462_v59 = vpop.permute.xlu0 %1461  ;;  %v1948_v62 = vld [vmem:[#allocation3 + $0xc0] sm:$0xff]  ;;  %1533 = vst.msk [vmem:[#allocation3 + $0xd8] sm:$0xff] %vm1505_vm8, %v1464_v39 }
 0x267   : > { %1532 = vst.msk [vmem:[#allocation3 + $0xd0] sm:$0xff] %vm1505_vm8, %v1462_v59  ;;  %5189 = vmatprep.mubr.msk.f32.mxu0 %vm1961_vm11, %v1948_v62 }
 0x269   : > { %v1657_v40 = vpop.permute.xlu1 %1656 }
 0x26a   : > { %v1655_v19 = vpop.permute.xlu0 %1654  ;;  %v1949_v46 = vld [vmem:[#allocation3 + $0xc8] sm:$0xff]  ;;  %1726 = vst.msk [vmem:[#allocation3 + $0xd8] sm:$0xff] %vm1698_vm9, %v1657_v40 }
 0x26b   : > { %1725 = vst.msk [vmem:[#allocation3 + $0xd0] sm:$0xff] %vm1698_vm9, %v1655_v19  ;;  %5190 = vmatmul.mubr.msk.f32.gmra.mxu0 %vm1961_vm11, %v1949_v46 }
 0x26d   : > { %v1272_v24 = vpop.permute.xlu1 %1271 }
 0x26e   : > { %v1848_v58 = vpop.permute.xlu0 %1847  ;;  %1340 = vst.msk [vmem:[#allocation3 + $0xe0] sm:$0xff] %vm1311_vm7, %v1272_v24 }
 0x26f   : > { %1918 = vst.msk [vmem:[#allocation3 + $0xd0] sm:$0xff] %vm1891_vm10, %v1848_v58 }
 0x270   : > { %v6412_v16 = vpop.f32.mrf.mxu0 }
 0x271   : > { %v1274_v37 = vpop.permute.xlu1 %1273  ;;  %v2357_v12 = vmul.f32 %v6412_v16, %v6412_v16  ;;  %v2288_v4 = vsel %vm204_vm0, %v6412_v16, 0.0 }
 0x272   : > { %v1850_v52 = vpop.permute.xlu0 %1849  ;;  %1341 = vst.msk [vmem:[#allocation3 + $0xe8] sm:$0xff] %vm1311_vm7, %v1274_v37  ;;  %v6414_v34 = vpop.f32.mrf.mxu0 }
 0x273   : > { %1919 = vst.msk [vmem:[#allocation3 + $0xd8] sm:$0xff] %vm1891_vm10, %v1850_v52  ;;  %v2356_v13 = vmul.f32 %v6414_v34, %v6414_v34  ;;  %v2287_v45 = vsel %vm204_vm0, %v6414_v34, 0.0  ;;  %v2389_v57 = vsel %vm204_vm0, %v2357_v12, 0.0 }
 0x274   : > { %v2289_v10 = vadd.f32 %v2288_v4, %v2287_v45 }
 0x275   : > { %v1468_v20 = vpop.permute.xlu1 %1467  ;;  %v2388_v17 = vsel %vm204_vm0, %v2356_v13, 0.0 }
 0x276   : > { %v1466_v42 = vpop.permute.xlu0 %1465  ;;  %v1950_v55 = vld [vmem:[#allocation3 + $0xd0] sm:$0xff]  ;;  %1535 = vst.msk [vmem:[#allocation3 + $0xe8] sm:$0xff] %vm1505_vm8, %v1468_v20  ;;  %v2390_v0 = vadd.f32 %v2389_v57, %v2388_v17 }
 0x277   : > { %1534 = vst.msk [vmem:[#allocation3 + $0xe0] sm:$0xff] %vm1505_vm8, %v1466_v42  ;;  %5192 = vmatprep.mubr.msk.f32.mxu0 %vm1961_vm11, %v1950_v55 }
 0x279   : > { %v1661_v7 = vpop.permute.xlu1 %1660 }
 0x27a   : > { %v1659_v23 = vpop.permute.xlu0 %1658  ;;  %v1951_v3 = vld [vmem:[#allocation3 + $0xd8] sm:$0xff]  ;;  %1728 = vst.msk [vmem:[#allocation3 + $0xe8] sm:$0xff] %vm1698_vm9, %v1661_v7 }
 0x27b   : > { %1727 = vst.msk [vmem:[#allocation3 + $0xe0] sm:$0xff] %vm1698_vm9, %v1659_v23  ;;  %5193 = vmatmul.mubr.msk.f32.gmra.mxu0 %vm1961_vm11, %v1951_v3 }
 0x27c   : > { %v6416_v35 = vpop.f32.mrf.mxu0 }
 0x27d   : > { %v1276_v18 = vpop.permute.xlu1 %1275  ;;  %v2359_v27 = vmul.f32 %v6416_v35, %v6416_v35  ;;  %v2292_v30 = vsel %vm204_vm0, %v6416_v35, 0.0 }
 0x27e   : > { %v1852_v14 = vpop.permute.xlu0 %1851  ;;  %1342 = vst.msk [vmem:[#allocation3 + $0xf0] sm:$0xff] %vm1311_vm7, %v1276_v18  ;;  %v6418_v51 = vpop.f32.mrf.mxu0 }
 0x27f   : > { %1920 = vst.msk [vmem:[#allocation3 + $0xe0] sm:$0xff] %vm1891_vm10, %v1852_v14  ;;  %v2358_v2 = vmul.f32 %v6418_v51, %v6418_v51  ;;  %v2290_v22 = vsel %vm204_vm0, %v6418_v51, 0.0  ;;  %v2393_v61 = vsel %vm204_vm0, %v2359_v27, 0.0 }
 0x280   : > { %v2291_v5 = vadd.f32 %v2290_v22, %v2289_v10 }
 0x281   : > { %v1278_v48 = vpop.permute.xlu1 %1277  ;;  %v2391_v60 = vsel %vm204_vm0, %v2358_v2, 0.0 }
 0x282   : > { %v1854_v15 = vpop.permute.xlu0 %1853  ;;  %1343 = vst.msk [vmem:[#allocation3 + $0xf8] sm:$0xff] %vm1311_vm7, %v1278_v48  ;;  %v2392_v29 = vadd.f32 %v2391_v60, %v2390_v0  ;;  %v2293_v43 = vadd.f32 %v2292_v30, %v2291_v5 }
 0x283   : > { %1921 = vst.msk [vmem:[#allocation3 + $0xe8] sm:$0xff] %vm1891_vm10, %v1854_v15 }
 0x284   : > { %v2394_v38 = vadd.f32 %v2393_v61, %v2392_v29 }
 0x285   : > { %v1472_v63 = vpop.permute.xlu1 %1471 }
 0x286   : > { %v1470_v36 = vpop.permute.xlu0 %1469  ;;  %v1952_v47 = vld [vmem:[#allocation3 + $0xe0] sm:$0xff]  ;;  %1537 = vst.msk [vmem:[#allocation3 + $0xf8] sm:$0xff] %vm1505_vm8, %v1472_v63 }
 0x287   : > { %1536 = vst.msk [vmem:[#allocation3 + $0xf0] sm:$0xff] %vm1505_vm8, %v1470_v36  ;;  %5195 = vmatprep.mubr.msk.f32.mxu0 %vm1961_vm11, %v1952_v47 }
 0x289   : > { %v1665_v8 = vpop.permute.xlu1 %1664 }
 0x28a   : > { %v1663_v56 = vpop.permute.xlu0 %1662  ;;  %v1953_v1 = vld [vmem:[#allocation3 + $0xe8] sm:$0xff]  ;;  %1730 = vst.msk [vmem:[#allocation3 + $0xf8] sm:$0xff] %vm1698_vm9, %v1665_v8 }
 0x28b   : > { %1729 = vst.msk [vmem:[#allocation3 + $0xf0] sm:$0xff] %vm1698_vm9, %v1663_v56  ;;  %5196 = vmatmul.mubr.msk.f32.gmra.mxu0 %vm1961_vm11, %v1953_v1  ;;  %v6422_v31 = vpop.f32.mrf.mxu0 }
 0x28c   : > { %v2361_v50 = vmul.f32 %v6422_v31, %v6422_v31  ;;  %v2296_v59 = vsel %vm204_vm0, %v6422_v31, 0.0 }
 0x28d   : > { %v1858_v9 = vpop.permute.xlu1 %1857  ;;  %v6435_v11 = vpop.f32.mrf.mxu0 }
 0x28e   : > { %v1856_v6 = vpop.permute.xlu0 %1855  ;;  %1923 = vst.msk [vmem:[#allocation3 + $0xf8] sm:$0xff] %vm1891_vm10, %v1858_v9  ;;  %v2360_v28 = vmul.f32 %v6435_v11, %v6435_v11  ;;  %v2294_v32 = vsel %vm204_vm0, %v6435_v11, 0.0  ;;  %v2397_v46 = vsel %vm204_vm0, %v2361_v50, 0.0 }
 0x28f   : > { %1922 = vst.msk [vmem:[#allocation3 + $0xf0] sm:$0xff] %vm1891_vm10, %v1856_v6  ;;  %v2295_v49 = vadd.f32 %v2294_v32, %v2293_v43 }
 0x290   : > { %v2395_v33 = vsel %vm204_vm0, %v2360_v28, 0.0 }
 0x291   : > { %v2396_v54 = vadd.f32 %v2395_v33, %v2394_v38  ;;  %v2297_v39 = vadd.f32 %v2296_v59, %v2295_v49 }
 0x293   : > { %v2398_v24 = vadd.f32 %v2397_v46, %v2396_v54 }
 0x295   : > { %v1955_v21 = vld [vmem:[#allocation3 + $0xf8] sm:$0xff] }
 0x296   : > { %v1954_v26 = vld [vmem:[#allocation3 + $0xf0] sm:$0xff] }
 0x297   : > { %5198 = vmatprep.mubr.msk.f32.mxu0 %vm1961_vm11, %v1954_v26 }
 0x298   : > { %5199 = vmatmul.mubr.msk.f32.gmra.mxu0 %vm1961_vm11, %v1955_v21 }
 0x29b   : > { %v6439_v25 = vpop.f32.mrf.mxu0 }
 0x29c   : > { %v2363_v37 = vmul.f32 %v6439_v25, %v6439_v25  ;;  %v2300_v20 = vsel %vm204_vm0, %v6439_v25, 0.0 }
 0x29d   : > { %v6449_v44 = vpop.f32.mrf.mxu0 }
 0x29e   : > { %v2362_v53 = vmul.f32 %v6449_v44, %v6449_v44  ;;  %v2298_v62 = vsel %vm204_vm0, %v6449_v44, 0.0  ;;  %v2401_v14 = vsel %vm204_vm0, %v2363_v37, 0.0 }
 0x29f   : > { %v2299_v58 = vadd.f32 %v2298_v62, %v2297_v39 }
 0x2a0   : > { %v2399_v40 = vsel %vm204_vm0, %v2362_v53, 0.0 }
 0x2a1   : > { %v2400_v55 = vadd.f32 %v2399_v40, %v2398_v24  ;;  %v2301_v3 = vadd.f32 %v2300_v20, %v2299_v58 }
 0x2a3   : > { %v2402_v48 = vadd.f32 %v2401_v14, %v2400_v55 }
 0x2ab   : > { %v6453_v41 = vpop.f32.mrf.mxu0 }
 0x2ac   : > { %v2365_v47 = vmul.f32 %v6453_v41, %v6453_v41  ;;  %v2304_v1 = vsel %vm204_vm0, %v6453_v41, 0.0 }
 0x2ad   : > { %v6463_v19 = vpop.f32.mrf.mxu0 }
 0x2ae   : > { %v2364_v42 = vmul.f32 %v6463_v19, %v6463_v19  ;;  %v2302_v23 = vsel %vm204_vm0, %v6463_v19, 0.0  ;;  %v2405_v26 = vsel %vm204_vm0, %v2365_v47, 0.0 }
 0x2af   : > { %v2303_v15 = vadd.f32 %v2302_v23, %v2301_v3 }
 0x2b0   : > { %v2403_v18 = vsel %vm204_vm0, %v2364_v42, 0.0 }
 0x2b1   : > { %v2404_v56 = vadd.f32 %v2403_v18, %v2402_v48  ;;  %v2305_v6 = vadd.f32 %v2304_v1, %v2303_v15 }
 0x2b3   : > { %v2406_v12 = vadd.f32 %v2405_v26, %v2404_v56 }
 0x2bb   : > { %v6467_v52 = vpop.f32.mrf.mxu0 }
 0x2bc   : > { %v2367_v2 = vmul.f32 %v6467_v52, %v6467_v52  ;;  %v2308_v22 = vsel %vm204_vm0, %v6467_v52, 0.0 }
 0x2bd   : > { %v6477_v7 = vpop.f32.mrf.mxu0 }
 0x2be   : > { %v2366_v63 = vmul.f32 %v6477_v7, %v6477_v7  ;;  %v2306_v8 = vsel %vm204_vm0, %v6477_v7, 0.0  ;;  %v2409_v0 = vsel %vm204_vm0, %v2367_v2, 0.0 }
 0x2bf   : > { %v2307_v13 = vadd.f32 %v2306_v8, %v2305_v6 }
 0x2c0   : > { %v2407_v21 = vsel %vm204_vm0, %v2366_v63, 0.0 }
 0x2c1   : > { %v2408_v17 = vadd.f32 %v2407_v21, %v2406_v12  ;;  %v2309_v57 = vadd.f32 %v2308_v22, %v2307_v13 }
 0x2c3   : > { %v2410_v28 = vadd.f32 %v2409_v0, %v2408_v17 }
 0x2cb   : > { %v6481_v36 = vpop.f32.mrf.mxu0 }
 0x2cc   : > { %v2369_v30 = vmul.f32 %v6481_v36, %v6481_v36  ;;  %v2312_v61 = vsel %vm204_vm0, %v6481_v36, 0.0 }
 0x2cd   : > { %v6491_v9 = vpop.f32.mrf.mxu0 }
 0x2ce   : > { %v2368_v4 = vmul.f32 %v6491_v9, %v6491_v9  ;;  %v2310_v10 = vsel %vm204_vm0, %v6491_v9, 0.0  ;;  %v2413_v50 = vsel %vm204_vm0, %v2369_v30, 0.0 }
 0x2cf   : > { %v2311_v27 = vadd.f32 %v2310_v10, %v2309_v57 }
 0x2d0   : > { %v2411_v5 = vsel %vm204_vm0, %v2368_v4, 0.0 }
 0x2d1   : > { %v2412_v43 = vadd.f32 %v2411_v5, %v2410_v28  ;;  %v2313_v49 = vadd.f32 %v2312_v61, %v2311_v27 }
 0x2d3   : > { %v2414_v59 = vadd.f32 %v2413_v50, %v2412_v43 }
 0x2db   : > { %v6495_v45 = vpop.f32.mrf.mxu0 }
 0x2dc   : > { %v2371_v39 = vmul.f32 %v6495_v45, %v6495_v45  ;;  %v2316_v58 = vsel %vm204_vm0, %v6495_v45, 0.0 }
 0x2dd   : > { %v6505_v60 = vpop.f32.mrf.mxu0 }
 0x2de   : > { %v2370_v32 = vmul.f32 %v6505_v60, %v6505_v60  ;;  %v2314_v33 = vsel %vm204_vm0, %v6505_v60, 0.0  ;;  %v2417_v55 = vsel %vm204_vm0, %v2371_v39, 0.0 }
 0x2df   : > { %v2315_v54 = vadd.f32 %v2314_v33, %v2313_v49 }
 0x2e0   : > { %v2415_v53 = vsel %vm204_vm0, %v2370_v32, 0.0 }
 0x2e1   : > { %v2416_v40 = vadd.f32 %v2415_v53, %v2414_v59  ;;  %v2317_v37 = vadd.f32 %v2316_v58, %v2315_v54 }
 0x2e3   : > { %v2418_v3 = vadd.f32 %v2417_v55, %v2416_v40 }
 0x2eb   : > { %v6509_v29 = vpop.f32.mrf.mxu0 }
 0x2ec   : > { %v2373_v18 = vmul.f32 %v6509_v29, %v6509_v29  ;;  %v2320_v47 = vsel %vm204_vm0, %v6509_v29, 0.0 }
 0x2ed   : > { %v6519_v38 = vpop.f32.mrf.mxu0 }
 0x2ee   : > { %v2372_v46 = vmul.f32 %v6519_v38, %v6519_v38  ;;  %v2318_v24 = vsel %vm204_vm0, %v6519_v38, 0.0  ;;  %v2421_v8 = vsel %vm204_vm0, %v2373_v18, 0.0 }
 0x2ef   : > { %v2319_v23 = vadd.f32 %v2318_v24, %v2317_v37 }
 0x2f0   : > { %v2419_v20 = vsel %vm204_vm0, %v2372_v46, 0.0 }
 0x2f1   : > { %v2420_v48 = vadd.f32 %v2419_v20, %v2418_v3  ;;  %v2321_v56 = vadd.f32 %v2320_v47, %v2319_v23 }
 0x2f3   : > { %v2422_v21 = vadd.f32 %v2421_v8, %v2420_v48 }
 0x2fb   : > { %v6523_v62 = vpop.f32.mrf.mxu0 }
 0x2fc   : > { %v2375_v12 = vmul.f32 %v6523_v62, %v6523_v62  ;;  %v2324_v17 = vsel %vm204_vm0, %v6523_v62, 0.0 }
 0x2fd   : > { %v6533_v42 = vpop.f32.mrf.mxu0 }
 0x2fe   : > { %v2374_v15 = vmul.f32 %v6533_v42, %v6533_v42  ;;  %v2322_v63 = vsel %vm204_vm0, %v6533_v42, 0.0  ;;  %v2425_v0 = vsel %vm204_vm0, %v2375_v12, 0.0 }
 0x2ff   : > { %v2323_v26 = vadd.f32 %v2322_v63, %v2321_v56 }
 0x300   : > { %v2423_v6 = vsel %vm204_vm0, %v2374_v15, 0.0 }
 0x301   : > { %v2424_v4 = vadd.f32 %v2423_v6, %v2422_v21  ;;  %v2325_v10 = vadd.f32 %v2324_v17, %v2323_v26 }
 0x303   : > { %v2426_v28 = vadd.f32 %v2425_v0, %v2424_v4 }
 0x30b   : > { %v6537_v14 = vpop.f32.mrf.mxu0 }
 0x30c   : > { %v2377_v32 = vmul.f32 %v6537_v14, %v6537_v14  ;;  %v2328_v33 = vsel %vm204_vm0, %v6537_v14, 0.0 }
 0x30d   : > { %v6547_v1 = vpop.f32.mrf.mxu0 }
 0x30e   : > { %v2376_v2 = vmul.f32 %v6547_v1, %v6547_v1  ;;  %v2326_v22 = vsel %vm204_vm0, %v6547_v1, 0.0  ;;  %v2429_v54 = vsel %vm204_vm0, %v2377_v32, 0.0 }
 0x30f   : > { %v2327_v27 = vadd.f32 %v2326_v22, %v2325_v10 }
 0x310   : > { %v2427_v5 = vsel %vm204_vm0, %v2376_v2, 0.0 }
 0x311   : > { %v2428_v61 = vadd.f32 %v2427_v5, %v2426_v28  ;;  %v2329_v50 = vadd.f32 %v2328_v33, %v2327_v27 }
 0x313   : > { %v2430_v46 = vadd.f32 %v2429_v54, %v2428_v61 }
 0x31b   : > { %v6551_v13 = vpop.f32.mrf.mxu0 }
 0x31c   : > { %v2379_v58 = vmul.f32 %v6551_v13, %v6551_v13  ;;  %v2332_v55 = vsel %vm204_vm0, %v6551_v13, 0.0 }
 0x31d   : > { %v6561_v57 = vpop.f32.mrf.mxu0 }
 0x31e   : > { %v2378_v43 = vmul.f32 %v6561_v57, %v6561_v57  ;;  %v2330_v49 = vsel %vm204_vm0, %v6561_v57, 0.0  ;;  %v2433_v18 = vsel %vm204_vm0, %v2379_v58, 0.0 }
 0x31f   : > { %v2331_v39 = vadd.f32 %v2330_v49, %v2329_v50 }
 0x320   : > { %v2431_v59 = vsel %vm204_vm0, %v2378_v43, 0.0 }
 0x321   : > { %v2432_v37 = vadd.f32 %v2431_v59, %v2430_v46  ;;  %v2333_v23 = vadd.f32 %v2332_v55, %v2331_v39 }
 0x323   : > { %v2434_v47 = vadd.f32 %v2433_v18, %v2432_v37 }
 0x32b   : > { %v6565_v30 = vpop.f32.mrf.mxu0 }
 0x32c   : > { %v2381_v63 = vmul.f32 %v6565_v30, %v6565_v30  ;;  %v2336_v26 = vsel %vm204_vm0, %v6565_v30, 0.0 }
 0x32d   : > { %v6575_v53 = vpop.f32.mrf.mxu0 }
 0x32e   : > { %v2380_v24 = vmul.f32 %v6575_v53, %v6575_v53  ;;  %v2334_v20 = vsel %vm204_vm0, %v6575_v53, 0.0  ;;  %v2437_v4 = vsel %vm204_vm0, %v2381_v63, 0.0 }
 0x32f   : > { %v2335_v48 = vadd.f32 %v2334_v20, %v2333_v23 }
 0x330   : > { %v2435_v15 = vsel %vm204_vm0, %v2380_v24, 0.0 }
 0x331   : > { %v2436_v6 = vadd.f32 %v2435_v15, %v2434_v47  ;;  %v2337_v12 = vadd.f32 %v2336_v26, %v2335_v48 }
 0x333   : > { %v2438_v10 = vadd.f32 %v2437_v4, %v2436_v6 }
 0x33b   : > { %v6579_v40 = vpop.f32.mrf.mxu0 }
 0x33c   : > { %v2383_v0 = vmul.f32 %v6579_v40, %v6579_v40  ;;  %v2340_v28 = vsel %vm204_vm0, %v6579_v40, 0.0 }
 0x33d   : > { %v6589_v3 = vpop.f32.mrf.mxu0 }
 0x33e   : > { %v2382_v56 = vmul.f32 %v6589_v3, %v6589_v3  ;;  %v2338_v21 = vsel %vm204_vm0, %v6589_v3, 0.0  ;;  %v2441_v61 = vsel %vm204_vm0, %v2383_v0, 0.0 }
 0x33f   : > { %v2339_v22 = vadd.f32 %v2338_v21, %v2337_v12 }
 0x340   : > { %v2439_v17 = vsel %vm204_vm0, %v2382_v56, 0.0 }
 0x341   : > { %v2440_v27 = vadd.f32 %v2439_v17, %v2438_v10  ;;  %v2341_v43 = vadd.f32 %v2340_v28, %v2339_v22 }
 0x343   : > { %v2442_v50 = vadd.f32 %v2441_v61, %v2440_v27 }
 0x34b   : > { %v6597_v8 = vpop.f32.mrf.mxu0 }
 0x34c   : > { %v2385_v54 = vmul.f32 %v6597_v8, %v6597_v8  ;;  %v2344_v46 = vsel %vm204_vm0, %v6597_v8, 0.0 }
 0x34d   : > { %v6603_v2 = vpop.f32.mrf.mxu0 }
 0x34e   : > { %v2384_v5 = vmul.f32 %v6603_v2, %v6603_v2  ;;  %v2342_v32 = vsel %vm204_vm0, %v6603_v2, 0.0  ;;  %v2445_v37 = vsel %vm204_vm0, %v2385_v54, 0.0 }
 0x34f   : > { %v2343_v49 = vadd.f32 %v2342_v32, %v2341_v43 }
 0x350   : > { %v2443_v33 = vsel %vm204_vm0, %v2384_v5, 0.0 }
 0x351   : > { %v2444_v59 = vadd.f32 %v2443_v33, %v2442_v50  ;;  %v2345_v24 = vadd.f32 %v2344_v46, %v2343_v49 }
 0x353   : > { %v2446_v15 = vadd.f32 %v2445_v37, %v2444_v59 }
 0x358   : > { %v6619_v39 = vpop.f32.mrf.mxu0 }
 0x359   : > { %v2387_v55 = vmul.f32 %v6619_v39, %v6619_v39  ;;  %v2348_v48 = vsel %vm204_vm0, %v6619_v39, 0.0 }
 0x35a   : > { %v6623_v58 = vpop.f32.mrf.mxu0 }
 0x35b   : > { %v2346_v20 = vsel %vm204_vm0, %v6623_v58, 0.0  ;;  %v2386_v23 = vmul.f32 %v6623_v58, %v6623_v58  ;;  %v2449_v6 = vsel %vm204_vm0, %v2387_v55, 0.0 }
 0x35c   : > { %v2347_v18 = vadd.f32 %v2346_v20, %v2345_v24 }
 0x35d   : > { %v2447_v47 = vsel %vm204_vm0, %v2386_v23, 0.0 }
 0x35e   : > { %v2349_v63 = vadd.f32 %v2348_v48, %v2347_v18  ;;  %v2448_v56 = vadd.f32 %v2447_v47, %v2446_v15 }
 0x360   : > { %v2350_v26 = vrot.slane %v2349_v63, 4  ;;  %v2450_v21 = vadd.f32 %v2449_v6, %v2448_v56 }
 0x362   : > { %v2351_v12 = vadd.f32 %v2350_v26, %v2349_v63  ;;  %v2451_v4 = vrot.slane %v2450_v21, 4 }
 0x364   : > { %v2352_v17 = vrot.slane %v2351_v12, 2  ;;  %v2452_v22 = vadd.f32 %v2451_v4, %v2450_v21 }
 0x366   : > { %v2353_v10 = vadd.f32 %v2352_v17, %v2351_v12  ;;  %v2453_v0 = vrot.slane %v2452_v22, 2 }
 0x368   : > { %v2354_v5 = vrot.slane %v2353_v10, 1  ;;  %v2454_v27 = vadd.f32 %v2453_v0, %v2452_v22 }
 0x36a   : > { %v2355_v28 = vadd.f32 %v2354_v5, %v2353_v10  ;;  %v2455_v32 = vrot.slane %v2454_v27, 1 }
 0x36c   : > { %v2456_v43 = vadd.f32 %v2455_v32, %v2454_v27  ;;  %v6636_v61 = vmul.f32 0.00390625, %v2355_v28 }
 0x36e   : > { %v2459_v33 = vmul.f32 0.00390625, %v2456_v43  ;;  %v2460_v49 = vmul.f32 %v6636_v61, %v6636_v61  ;;  %v2495_v46 = vsub.f32 %v6623_v58, %v6636_v61  ;;  %v2465_v24 = vsub.f32 %v6414_v34, %v6636_v61 }
 0x36f   : > { %v2466_v37 = vsub.f32 %v6412_v16, %v6636_v61  ;;  %v2467_v55 = vsub.f32 %v6418_v51, %v6636_v61  ;;  %v2468_v20 = vsub.f32 %v6416_v35, %v6636_v61  ;;  %v2469_v23 = vsub.f32 %v6435_v11, %v6636_v61 }
 0x370   : > { %v2461_v50 = vsub.f32 %v2459_v33, %v2460_v49  ;;  %v2470_v18 = vsub.f32 %v6422_v31, %v6636_v61  ;;  %v2471_v58 = vsub.f32 %v6449_v44, %v6636_v61  ;;  %v2472_v34 = vsub.f32 %v6439_v25, %v6636_v61 }
 0x371   : > { %v2473_v16 = vsub.f32 %v6463_v19, %v6636_v61  ;;  %v2474_v51 = vsub.f32 %v6453_v41, %v6636_v61  ;;  %v2475_v35 = vsub.f32 %v6477_v7, %v6636_v61  ;;  %v2476_v11 = vsub.f32 %v6467_v52, %v6636_v61 }
 0x372   : > { %v2462_v54 = vmax.f32 %v2461_v50, 0.0  ;;  %v2477_v31 = vsub.f32 %v6491_v9, %v6636_v61  ;;  %v2478_v44 = vsub.f32 %v6481_v36, %v6636_v61  ;;  %v2479_v25 = vsub.f32 %v6505_v60, %v6636_v61 }
 0x373   : > { %v2480_v19 = vsub.f32 %v6495_v45, %v6636_v61  ;;  %v2481_v41 = vsub.f32 %v6519_v38, %v6636_v61  ;;  %v2482_v7 = vsub.f32 %v6509_v29, %v6636_v61  ;;  %v2483_v52 = vsub.f32 %v6533_v42, %v6636_v61 }
 0x374   : > { %v2463_v59 = vadd.f32 1e-05, %v2462_v54  ;;  %v2484_v9 = vsub.f32 %v6523_v62, %v6636_v61  ;;  %v2485_v36 = vsub.f32 %v6547_v1, %v6636_v61  ;;  %v2486_v60 = vsub.f32 %v6537_v14, %v6636_v61 }
 0x375   : > { %v2487_v45 = vsub.f32 %v6561_v57, %v6636_v61  ;;  %v2488_v38 = vsub.f32 %v6551_v13, %v6636_v61  ;;  %v2489_v29 = vsub.f32 %v6575_v53, %v6636_v61  ;;  %v2490_v42 = vsub.f32 %v6565_v30, %v6636_v61 }
 0x376   : > { %5275 = vrsqrt.f32 %v2463_v59  ;;  %v2491_v62 = vsub.f32 %v6589_v3, %v6636_v61  ;;  %v2492_v1 = vsub.f32 %v6579_v40, %v6636_v61  ;;  %v2493_v14 = vsub.f32 %v6603_v2, %v6636_v61 }
 0x377   : > { %v2494_v57 = vsub.f32 %v6597_v8, %v6636_v61  ;;  %v2496_v13 = vsub.f32 %v6619_v39, %v6636_v61 }
 0x383   : > { %v5276_v15 = vpop.eup %5275 }
 0x384   : > { %v2527_v53 = vmul.f32 %v5276_v15, %v2495_v46  ;;  %v2500_v48 = vmul.f32 %v5276_v15, %v2468_v20  ;;  %v2497_v47 = vmul.f32 %v5276_v15, %v2465_v24  ;;  %v2498_v30 = vmul.f32 %v5276_v15, %v2466_v37 }
 0x385   : > { %v2499_v63 = vmul.f32 %v5276_v15, %v2467_v55  ;;  %v2501_v56 = vmul.f32 %v5276_v15, %v2469_v23  ;;  %v2502_v3 = vmul.f32 %v5276_v15, %v2470_v18  ;;  %v2503_v6 = vmul.f32 %v5276_v15, %v2471_v58 }
 0x386   : > { %v2559_v26 = vmax.f32 %v2527_v53, 0.0  ;;  %v2532_v21 = vmax.f32 %v2500_v48, 0.0  ;;  %v2504_v40 = vmul.f32 %v5276_v15, %v2472_v34  ;;  %v2505_v12 = vmul.f32 %v5276_v15, %v2473_v16 }
 0x387   : > { %v2506_v4 = vmul.f32 %v5276_v15, %v2474_v51  ;;  %v2507_v2 = vmul.f32 %v5276_v15, %v2475_v35  ;;  %v2508_v17 = vmul.f32 %v5276_v15, %v2476_v11  ;;  %v2509_v22 = vmul.f32 %v5276_v15, %v2477_v31 }
 0x388   : > { %2591 = vst.msk [vmem:[#allocation2 + $0x181] sm:$0xff] %vm204_vm0, %v2559_v26  ;;  %2594 = vst.msk [vmem:[#allocation2 + $0x9] sm:$0xff] %vm204_vm0, %v2532_v21  ;;  %v2510_v8 = vmul.f32 %v5276_v15, %v2478_v44  ;;  %v2511_v39 = vmul.f32 %v5276_v15, %v2479_v25  ;;  %v6706_v10 = vmul.f32 %v5276_v15, %v2480_v19  ;;  %v2531_v55 = vmax.f32 %v2499_v63, 0.0 }
 0x389   : > { %v6708_v0 = vmul.f32 %v5276_v15, %v2481_v41  ;;  %2564 = vst.msk [vmem:[#allocation2 + $0x39] sm:$0xff] %vm204_vm0, %v2532_v21  ;;  %v6711_v5 = vmul.f32 %v5276_v15, %v2482_v7  ;;  %v6713_v27 = vmul.f32 %v5276_v15, %v2483_v52  ;;  %v6715_v28 = vmul.f32 %v5276_v15, %v2484_v9 }
 0x38a   : > { %v6717_v32 = vmul.f32 %v5276_v15, %v2485_v36  ;;  %v6719_v43 = vmul.f32 %v5276_v15, %v2486_v60  ;;  %v6721_v61 = vmul.f32 %v5276_v15, %v2487_v45  ;;  %v6723_v33 = vmul.f32 %v5276_v15, %v2488_v38  ;;  %2593 = vst.msk [vmem:[#allocation2 + $0x1] sm:$0xff] %vm204_vm0, %v2531_v55 }
 0x38b   : > { %v6725_v49 = vmul.f32 %v5276_v15, %v2489_v29  ;;  %v6727_v50 = vmul.f32 %v5276_v15, %v2490_v42  ;;  %v6729_v54 = vmul.f32 %v5276_v15, %v2491_v62  ;;  %v6731_v59 = vmul.f32 %v5276_v15, %v2492_v1  ;;  %2563 = vst.msk [vmem:[#allocation2 + $0x31] sm:$0xff] %vm204_vm0, %v2531_v55 }
 0x38c   : > { %v6733_v46 = vmul.f32 %v5276_v15, %v2493_v14  ;;  %v6735_v24 = vmul.f32 %v5276_v15, %v2494_v57  ;;  %v6737_v37 = vmul.f32 %v5276_v15, %v2496_v13  ;;  %v2529_v20 = vmax.f32 %v2497_v47, 0.0 }
 0x38d   : > { %v2530_v23 = vmax.f32 %v2498_v30, 0.0  ;;  %v2533_v18 = vmax.f32 %v2501_v56, 0.0  ;;  %v2534_v58 = vmax.f32 %v2502_v3, 0.0  ;;  %v2535_v34 = vmax.f32 %v2503_v6, 0.0 }
 0x38e   : > { %v2536_v16 = vmax.f32 %v2504_v40, 0.0  ;;  %v2537_v51 = vmax.f32 %v2505_v12, 0.0  ;;  %v2538_v35 = vmax.f32 %v2506_v4, 0.0  ;;  %v2539_v11 = vmax.f32 %v2507_v2, 0.0  ;;  %2561 = vst.msk [vmem:[#allocation2 + $0x19] sm:$0xff] %vm204_vm0, %v2529_v20 }
 0x38f   : > { %v2734_v31 = vld [vmem:[#allocation2 + $0x9] sm:$0xff]  ;;  %v2540_v44 = vmax.f32 %v2508_v17, 0.0  ;;  %v2541_v25 = vmax.f32 %v2509_v22, 0.0  ;;  %v2542_v19 = vmax.f32 %v2510_v8, 0.0  ;;  %v2543_v41 = vmax.f32 %v2511_v39, 0.0  ;;  %2562 = vst.msk [vmem:[#allocation2 + $0x21] sm:$0xff] %vm204_vm0, %v2530_v23 }
 0x390   : > { %2565 = vst.msk [vmem:[#allocation2 + $0x49] sm:$0xff] %vm204_vm0, %v2533_v18  ;;  %2566 = vst.msk [vmem:[#allocation2 + $0x51] sm:$0xff] %vm204_vm0, %v2534_v58  ;;  %2799 = vrot.lane.b32.xlu1 %v2734_v31, %s5287_s18  ;;  %v2544_v7 = vmax.f32 %v6706_v10, 0.0  ;;  %v2545_v52 = vmax.f32 %v6708_v0, 0.0  ;;  %v2546_v9 = vmax.f32 %v6711_v5, 0.0  ;;  %v2547_v36 = vmax.f32 %v6713_v27, 0.0 }
 0x391   : > { %2567 = vst.msk [vmem:[#allocation2 + $0x61] sm:$0xff] %vm204_vm0, %v2535_v34  ;;  %2568 = vst.msk [vmem:[#allocation2 + $0x69] sm:$0xff] %vm204_vm0, %v2536_v16  ;;  %v2633_v60 = vld [vmem:[#allocation2 + $0xf] sm:$0x1]  ;;  %v2548_v45 = vmax.f32 %v6715_v28, 0.0  ;;  %v2549_v38 = vmax.f32 %v6717_v32, 0.0 }
 0x392   : > { %2569 = vst.msk [vmem:[#allocation2 + $0x79] sm:$0xff] %vm204_vm0, %v2537_v51  ;;  %2570 = vst.msk [vmem:[#allocation2 + $0x81] sm:$0xff] %vm204_vm0, %v2538_v35  ;;  %v2550_v29 = vmax.f32 %v6719_v43, 0.0  ;;  %v2551_v42 = vmax.f32 %v6721_v61, 0.0  ;;  %v2635_v62 = vld [vmem:[#allocation2 + $0x3f] sm:$0x1] }
 0x393   : > { %2571 = vst.msk [vmem:[#allocation2 + $0x91] sm:$0xff] %vm204_vm0, %v2539_v11  ;;  %2572 = vst.msk [vmem:[#allocation2 + $0x99] sm:$0xff] %vm204_vm0, %v2540_v44  ;;  %v2552_v15 = vmax.f32 %v6723_v33, 0.0  ;;  %v2553_v1 = vmax.f32 %v6725_v49, 0.0  ;;  %v2554_v14 = vmax.f32 %v6727_v50, 0.0  ;;  %v2555_v57 = vmax.f32 %v6729_v54, 0.0 }
 0x394   : > { %2573 = vst.msk [vmem:[#allocation2 + $0xa9] sm:$0xff] %vm204_vm0, %v2541_v25  ;;  %2574 = vst.msk [vmem:[#allocation2 + $0xb1] sm:$0xff] %vm204_vm0, %v2542_v19  ;;  %v2613_v13 = vld [vmem:[#allocation2 + $0x182] sm:$0x1]  ;;  %v2556_v53 = vmax.f32 %v6731_v59, 0.0  ;;  %v2557_v48 = vmax.f32 %v6733_v46, 0.0 }
 0x395   : > { %2575 = vst.msk [vmem:[#allocation2 + $0xc1] sm:$0xff] %vm204_vm0, %v2543_v41  ;;  %2576 = vst.msk [vmem:[#allocation2 + $0xc9] sm:$0xff] %vm204_vm0, %v2544_v7  ;;  %v2558_v47 = vmax.f32 %v6735_v24, 0.0  ;;  %v2560_v30 = vmax.f32 %v6737_v37, 0.0  ;;  %v2733_v63 = vld [vmem:[#allocation2 + $0x1] sm:$0xff]  ;;  %v6797_v3 = vld [vmem:[#allocation2 + $0x19] sm:$0xff] }
 0x396   : > { %2651 = vst.msk [vmem:[#allocation2 + $0x11] sm:$0x1] %vm260_vm1, %v2633_v60  ;;  %2653 = vst.msk [vmem:[#allocation2 + $0x41] sm:$0x1] %vm260_vm1, %v2635_v62  ;;  %2797 = vrot.lane.b32.xlu0 %v2733_v63, %s5287_s18  ;;  %v6793_v56 = vld [vmem:[#allocation2 + $0x21] sm:$0xff]  ;;  %v6801_v6 = vld [vmem:[#allocation2 + $0x39] sm:$0xff] }
 0x397   : > { %2577 = vst.msk [vmem:[#allocation2 + $0xd9] sm:$0xff] %vm204_vm0, %v2545_v52  ;;  %2578 = vst.msk [vmem:[#allocation2 + $0xe1] sm:$0xff] %vm204_vm0, %v2546_v9  ;;  %2803 = vrot.lane.b32.xlu1 %v6793_v56, %s5287_s18  ;;  %v6805_v26 = vld [vmem:[#allocation2 + $0x31] sm:$0xff]  ;;  %v2634_v40 = vld [vmem:[#allocation2 + $0x27] sm:$0x1] }
 0x398   : > { %2579 = vst.msk [vmem:[#allocation2 + $0xf1] sm:$0xff] %vm204_vm0, %v2547_v36  ;;  %2580 = vst.msk [vmem:[#allocation2 + $0xf9] sm:$0xff] %vm204_vm0, %v2548_v45  ;;  %v6809_v21 = vld [vmem:[#allocation2 + $0x51] sm:$0xff]  ;;  %v6814_v12 = vld [vmem:[#allocation2 + $0x49] sm:$0xff] }
 0x399   : > { %2581 = vst.msk [vmem:[#allocation2 + $0x109] sm:$0xff] %vm204_vm0, %v2549_v38  ;;  %2582 = vst.msk [vmem:[#allocation2 + $0x111] sm:$0xff] %vm204_vm0, %v2550_v29  ;;  %v2636_v4 = vld [vmem:[#allocation2 + $0x57] sm:$0x1]  ;;  %v2637_v2 = vld [vmem:[#allocation2 + $0x6f] sm:$0x1] }
 0x39a   : > { %2583 = vst.msk [vmem:[#allocation2 + $0x121] sm:$0xff] %vm204_vm0, %v2551_v42  ;;  %2584 = vst.msk [vmem:[#allocation2 + $0x129] sm:$0xff] %vm204_vm0, %v2552_v15  ;;  %2801 = vrot.lane.b32.xlu0 %v6797_v3, %s5287_s18  ;;  %v6818_v17 = vld [vmem:[#allocation2 + $0x69] sm:$0xff]  ;;  %v2638_v22 = vld [vmem:[#allocation2 + $0x87] sm:$0x1] }
 0x39b   : > { %2631 = vst.msk [vmem:[#allocation2 + $0x180] sm:$0x1] %vm260_vm1, %v2613_v13  ;;  %2807 = vrot.lane.b32.xlu1 %v6801_v6, %s5287_s18  ;;  %2652 = vst.msk [vmem:[#allocation2 + $0x29] sm:$0x1] %vm260_vm1, %v2634_v40  ;;  %v2639_v8 = vld [vmem:[#allocation2 + $0x9f] sm:$0x1] }
 0x39c   : > { %2585 = vst.msk [vmem:[#allocation2 + $0x139] sm:$0xff] %vm204_vm0, %v2553_v1  ;;  %2586 = vst.msk [vmem:[#allocation2 + $0x141] sm:$0xff] %vm204_vm0, %v2554_v14  ;;  %v2640_v39 = vld [vmem:[#allocation2 + $0xb7] sm:$0x1]  ;;  %v2641_v10 = vld [vmem:[#allocation2 + $0xcf] sm:$0x1] }
 0x39d   : > { %2587 = vst.msk [vmem:[#allocation2 + $0x151] sm:$0xff] %vm204_vm0, %v2555_v57  ;;  %2588 = vst.msk [vmem:[#allocation2 + $0x159] sm:$0xff] %vm204_vm0, %v2556_v53  ;;  %v6827_v0 = vld [vmem:[#allocation2 + $0x61] sm:$0xff]  ;;  %v6840_v50 = vld [vmem:[#allocation2 + $0x79] sm:$0xff] }
 0x39e   : > { %2589 = vst.msk [vmem:[#allocation2 + $0x169] sm:$0xff] %vm204_vm0, %v2557_v48  ;;  %2590 = vst.msk [vmem:[#allocation2 + $0x171] sm:$0xff] %vm204_vm0, %v2558_v47  ;;  %2805 = vrot.lane.b32.xlu0 %v6805_v26, %s5287_s18  ;;  %v2642_v5 = vld [vmem:[#allocation2 + $0xe7] sm:$0x1]  ;;  %v2670_v61 = vld [vmem:[#allocation2 + $0x8] sm:$0xff] }
 0x39f   : > { %2592 = vst.msk [vmem:[#allocation2 + $0x189] sm:$0xff] %vm204_vm0, %v2560_v30  ;;  %2595 = vst.msk [vmem:[#allocation2 + $0x199] sm:$0xff] %vm204_vm0, %v2557_v48  ;;  %2811 = vrot.lane.b32.xlu1 %v6809_v21, %s5287_s18  ;;  %v2643_v27 = vld [vmem:[#allocation2 + $0xff] sm:$0x1]  ;;  %v6832_v28 = vld [vmem:[#allocation2 + $0x81] sm:$0xff] }
 0x3a0   : > { %2596 = vst.msk [vmem:[#allocation2 + $0x1a1] sm:$0xff] %vm204_vm0, %v2558_v47  ;;  %v2644_v32 = vld [vmem:[#allocation2 + $0x117] sm:$0x1]  ;;  %v2597_v33 = vld [vmem:[#allocation2 + $0x2] sm:$0x1]  ;;  %2702 = vst.msk [vmem:[#allocation3 + $0x8] sm:$0xff] %vm204_vm0, %v2670_v61 }
 0x3a1   : > { %2654 = vst.msk [vmem:[#allocation2 + $0x59] sm:$0x1] %vm260_vm1, %v2636_v4  ;;  %2655 = vst.msk [vmem:[#allocation2 + $0x71] sm:$0x1] %vm260_vm1, %v2637_v2  ;;  %v2645_v43 = vld [vmem:[#allocation2 + $0x12f] sm:$0x1] }
 0x3a2   : > { %2809 = vrot.lane.b32.xlu0 %v6814_v12, %s5287_s18  ;;  %2656 = vst.msk [vmem:[#allocation2 + $0x89] sm:$0x1] %vm260_vm1, %v2638_v22  ;;  %2657 = vst.msk [vmem:[#allocation2 + $0xa1] sm:$0x1] %vm260_vm1, %v2639_v8  ;;  %v6847_v54 = vld [vmem:[#allocation2 + $0x99] sm:$0xff]  ;;  %v6859_v55 = vld [vmem:[#allocation2 + $0x91] sm:$0xff] }
 0x3a3   : > { %2815 = vrot.lane.b32.xlu1 %v6818_v17, %s5287_s18  ;;  %2658 = vst.msk [vmem:[#allocation2 + $0xb9] sm:$0x1] %vm260_vm1, %v2640_v39  ;;  %2659 = vst.msk [vmem:[#allocation2 + $0xd1] sm:$0x1] %vm260_vm1, %v2641_v10  ;;  %v2646_v49 = vld [vmem:[#allocation2 + $0x147] sm:$0x1] }
 0x3a4   : > { %2660 = vst.msk [vmem:[#allocation2 + $0xe9] sm:$0x1] %vm260_vm1, %v2642_v5  ;;  %2661 = vst.msk [vmem:[#allocation2 + $0x101] sm:$0x1] %vm260_vm1, %v2643_v27  ;;  %v6849_v59 = vld [vmem:[#allocation2 + $0x20] sm:$0xff]  ;;  %v6857_v37 = vld [vmem:[#allocation2 + $0x38] sm:$0xff] }
 0x3a5   : > { %2662 = vst.msk [vmem:[#allocation2 + $0x119] sm:$0x1] %vm260_vm1, %v2644_v32  ;;  %2663 = vst.msk [vmem:[#allocation2 + $0x131] sm:$0x1] %vm260_vm1, %v2645_v43  ;;  %v2598_v46 = vld [vmem:[#allocation2 + $0x1a] sm:$0x1] }
 0x3a6   : > { %2813 = vrot.lane.b32.xlu0 %v6827_v0, %s5287_s18  ;;  %2615 = vst.msk [vmem:[#allocation2] sm:$0x1] %vm260_vm1, %v2597_v33  ;;  %2664 = vst.msk [vmem:[#allocation2 + $0x149] sm:$0x1] %vm260_vm1, %v2646_v49  ;;  %v2647_v24 = vld [vmem:[#allocation2 + $0x15f] sm:$0x1] }
 0x3a7   : > { %2819 = vrot.lane.b32.xlu1 %v6832_v28, %s5287_s18  ;;  %2704 = vst.msk [vmem:[#allocation3 + $0x18] sm:$0xff] %vm204_vm0, %v6849_v59  ;;  %2706 = vst.msk [vmem:[#allocation3 + $0x28] sm:$0xff] %vm204_vm0, %v6857_v37  ;;  %v2599_v20 = vld [vmem:[#allocation2 + $0x32] sm:$0x1]  ;;  %v2648_v18 = vld [vmem:[#allocation2 + $0x177] sm:$0x1] }
 0x3a8   : > { %2616 = vst.msk [vmem:[#allocation2 + $0x18] sm:$0x1] %vm260_vm1, %v2598_v46  ;;  %2665 = vst.msk [vmem:[#allocation2 + $0x161] sm:$0x1] %vm260_vm1, %v2647_v24  ;;  %v2748_v23 = vld [vmem:[#allocation2 + $0xb1] sm:$0xff]  ;;  %v2747_v58 = vld [vmem:[#allocation2 + $0xa9] sm:$0xff] }
 0x3a9   : > { %2617 = vst.msk [vmem:[#allocation2 + $0x30] sm:$0x1] %vm260_vm1, %v2599_v20  ;;  %2666 = vst.msk [vmem:[#allocation2 + $0x179] sm:$0x1] %vm260_vm1, %v2648_v18  ;;  %v6868_v34 = vld [vmem:[#allocation2 + $0x50] sm:$0xff]  ;;  %v6873_v11 = vld [vmem:[#allocation2 + $0x68] sm:$0xff] }
 0x3aa   : > { %2817 = vrot.lane.b32.xlu0 %v6840_v50, %s5287_s18  ;;  %v2600_v16 = vld [vmem:[#allocation2 + $0x4a] sm:$0x1]  ;;  %2708 = vst.msk [vmem:[#allocation3 + $0x38] sm:$0xff] %vm204_vm0, %v6868_v34  ;;  %2710 = vst.msk [vmem:[#allocation3 + $0x48] sm:$0xff] %vm204_vm0, %v6873_v11  ;;  %v2601_v31 = vld [vmem:[#allocation2 + $0x62] sm:$0x1] }
 0x3ab   : > { %2823 = vrot.lane.b32.xlu1 %v6847_v54, %s5287_s18  ;;  %v2750_v51 = vld [vmem:[#allocation2 + $0xc9] sm:$0xff]  ;;  %2618 = vst.msk [vmem:[#allocation2 + $0x48] sm:$0x1] %vm260_vm1, %v2600_v16  ;;  %v6878_v44 = vld [vmem:[#allocation2 + $0x80] sm:$0xff]  ;;  %v2602_v25 = vld [vmem:[#allocation2 + $0x7a] sm:$0x1] }
 0x3ac   : > { %2619 = vst.msk [vmem:[#allocation2 + $0x60] sm:$0x1] %vm260_vm1, %v2601_v31  ;;  %2620 = vst.msk [vmem:[#allocation2 + $0x78] sm:$0x1] %vm260_vm1, %v2602_v25  ;;  %v6887_v41 = vld [vmem:[#allocation2 + $0x98] sm:$0xff]  ;;  %v2749_v52 = vld [vmem:[#allocation2 + $0xc1] sm:$0xff] }
 0x3ad   : > { %v2669_v35 = vld [vmem:[#allocation2] sm:$0xff]  ;;  %2712 = vst.msk [vmem:[#allocation3 + $0x58] sm:$0xff] %vm204_vm0, %v6878_v44  ;;  %v2603_v7 = vld [vmem:[#allocation2 + $0x92] sm:$0x1]  ;;  %2714 = vst.msk [vmem:[#allocation3 + $0x68] sm:$0xff] %vm204_vm0, %v6887_v41 }
 0x3ae   : > { %2821 = vrot.lane.b32.xlu0 %v6859_v55, %s5287_s18  ;;  %2701 = vst.msk [vmem:[#allocation3] sm:$0xff] %vm204_vm0, %v2669_v35  ;;  %v6895_v9 = vld [vmem:[#allocation2 + $0xb0] sm:$0xff]  ;;  %v2604_v36 = vld [vmem:[#allocation2 + $0xaa] sm:$0x1]  ;;  %v2605_v45 = vld [vmem:[#allocation2 + $0xc2] sm:$0x1] }
 0x3af   : > { %2827 = vrot.lane.b32.xlu1 %v2748_v23, %s5287_s18  ;;  %v6881_v19 = vld [vmem:[#allocation2 + $0x18] sm:$0xff]  ;;  %2621 = vst.msk [vmem:[#allocation2 + $0x90] sm:$0x1] %vm260_vm1, %v2603_v7  ;;  %2622 = vst.msk [vmem:[#allocation2 + $0xa8] sm:$0x1] %vm260_vm1, %v2604_v36  ;;  %v6900_v60 = vld [vmem:[#allocation2 + $0xc8] sm:$0xff] }
 0x3b0   : > { %2703 = vst.msk [vmem:[#allocation3 + $0x10] sm:$0xff] %vm204_vm0, %v6881_v19  ;;  %2716 = vst.msk [vmem:[#allocation3 + $0x78] sm:$0xff] %vm204_vm0, %v6895_v9  ;;  %v6902_v38 = vld [vmem:[#allocation2 + $0xe0] sm:$0xff]  ;;  %v6904_v29 = vld [vmem:[#allocation2 + $0x30] sm:$0xff] }
 0x3b1   : > { %2718 = vst.msk [vmem:[#allocation3 + $0x88] sm:$0xff] %vm204_vm0, %v6900_v60  ;;  %2720 = vst.msk [vmem:[#allocation3 + $0x98] sm:$0xff] %vm204_vm0, %v6902_v38  ;;  %v2606_v42 = vld [vmem:[#allocation2 + $0xda] sm:$0x1]  ;;  %v2752_v15 = vld [vmem:[#allocation2 + $0xe1] sm:$0xff] }
 0x3b2   : > { %2825 = vrot.lane.b32.xlu0 %v2747_v58, %s5287_s18  ;;  %2623 = vst.msk [vmem:[#allocation2 + $0xc0] sm:$0x1] %vm260_vm1, %v2605_v45  ;;  %v6911_v62 = vld [vmem:[#allocation2 + $0xf8] sm:$0xff]  ;;  %2624 = vst.msk [vmem:[#allocation2 + $0xd8] sm:$0x1] %vm260_vm1, %v2606_v42  ;;  %v6919_v14 = vld [vmem:[#allocation2 + $0x110] sm:$0xff] }
 0x3b3   : > { %2831 = vrot.lane.b32.xlu1 %v2750_v51, %s5287_s18  ;;  %2705 = vst.msk [vmem:[#allocation3 + $0x20] sm:$0xff] %vm204_vm0, %v6904_v29  ;;  %2722 = vst.msk [vmem:[#allocation3 + $0xa8] sm:$0xff] %vm204_vm0, %v6911_v62  ;;  %v2607_v1 = vld [vmem:[#allocation2 + $0xf2] sm:$0x1]  ;;  %v2751_v57 = vld [vmem:[#allocation2 + $0xd9] sm:$0xff] }
 0x3b4   : > { %v6922_v13 = vld [vmem:[#allocation2 + $0x48] sm:$0xff]  ;;  %2625 = vst.msk [vmem:[#allocation2 + $0xf0] sm:$0x1] %vm260_vm1, %v2607_v1  ;;  %v2754_v47 = vld [vmem:[#allocation2 + $0xf9] sm:$0xff]  ;;  %v2609_v30 = vld [vmem:[#allocation2 + $0x122] sm:$0x1] }
 0x3b5   : > { %2724 = vst.msk [vmem:[#allocation3 + $0xb8] sm:$0xff] %vm204_vm0, %v6919_v14  ;;  %v2608_v53 = vld [vmem:[#allocation2 + $0x10a] sm:$0x1]  ;;  %2707 = vst.msk [vmem:[#allocation3 + $0x30] sm:$0xff] %vm204_vm0, %v6922_v13  ;;  %v2696_v63 = vld [vmem:[#allocation2 + $0x140] sm:$0xff] }
 0x3b6   : > { %2829 = vrot.lane.b32.xlu0 %v2749_v52, %s5287_s18  ;;  %v6927_v48 = vld [vmem:[#allocation2 + $0x128] sm:$0xff]  ;;  %2626 = vst.msk [vmem:[#allocation2 + $0x108] sm:$0x1] %vm260_vm1, %v2608_v53  ;;  %v2610_v40 = vld [vmem:[#allocation2 + $0x13a] sm:$0x1]  ;;  %v6934_v4 = vld [vmem:[#allocation2 + $0x60] sm:$0xff] }
 0x3b7   : > { %2835 = vrot.lane.b32.xlu1 %v2752_v15, %s5287_s18  ;;  %2726 = vst.msk [vmem:[#allocation3 + $0xc8] sm:$0xff] %vm204_vm0, %v6927_v48  ;;  %v6936_v2 = vld [vmem:[#allocation2 + $0x78] sm:$0xff]  ;;  %2728 = vst.msk [vmem:[#allocation3 + $0xd8] sm:$0xff] %vm204_vm0, %v2696_v63  ;;  %v6946_v8 = vld [vmem:[#allocation2 + $0x90] sm:$0xff] }
 0x3b8   : > { %2627 = vst.msk [vmem:[#allocation2 + $0x120] sm:$0x1] %vm260_vm1, %v2609_v30  ;;  %2628 = vst.msk [vmem:[#allocation2 + $0x138] sm:$0x1] %vm260_vm1, %v2610_v40  ;;  %v2698_v22 = vld [vmem:[#allocation2 + $0x158] sm:$0xff]  ;;  %v2700_v10 = vld [vmem:[#allocation2 + $0x170] sm:$0xff] }
 0x3b9   : > { %2709 = vst.msk [vmem:[#allocation3 + $0x40] sm:$0xff] %vm204_vm0, %v6934_v4  ;;  %2711 = vst.msk [vmem:[#allocation3 + $0x50] sm:$0xff] %vm204_vm0, %v6936_v2  ;;  %v2611_v39 = vld [vmem:[#allocation2 + $0x152] sm:$0x1]  ;;  %v6952_v5 = vld [vmem:[#allocation2 + $0xa8] sm:$0xff] }
 0x3ba   : > { %2833 = vrot.lane.b32.xlu0 %v2751_v57, %s5287_s18  ;;  %2730 = vst.msk [vmem:[#allocation3 + $0xe8] sm:$0xff] %vm204_vm0, %v2698_v22  ;;  %2713 = vst.msk [vmem:[#allocation3 + $0x60] sm:$0xff] %vm204_vm0, %v6946_v8  ;;  %v2612_v27 = vld [vmem:[#allocation2 + $0x16a] sm:$0x1]  ;;  %v6958_v32 = vld [vmem:[#allocation2 + $0xc0] sm:$0xff] }
 0x3bb   : > { %2839 = vrot.lane.b32.xlu1 %v2754_v47, %s5287_s18  ;;  %2629 = vst.msk [vmem:[#allocation2 + $0x150] sm:$0x1] %vm260_vm1, %v2611_v39  ;;  %2630 = vst.msk [vmem:[#allocation2 + $0x168] sm:$0x1] %vm260_vm1, %v2612_v27  ;;  %v2753_v43 = vld [vmem:[#allocation2 + $0xf1] sm:$0xff]  ;;  %v2755_v23 = vld [vmem:[#allocation2 + $0x109] sm:$0xff] }
 0x3bc   : > { %2732 = vst.msk [vmem:[#allocation3 + $0xf8] sm:$0xff] %vm204_vm0, %v2700_v10  ;;  %2715 = vst.msk [vmem:[#allocation3 + $0x70] sm:$0xff] %vm204_vm0, %v6952_v5  ;;  %v6963_v61 = vld [vmem:[#allocation2 + $0xd8] sm:$0xff]  ;;  %v6968_v49 = vld [vmem:[#allocation2 + $0xf0] sm:$0xff] }
 0x3bd   : > { %2717 = vst.msk [vmem:[#allocation3 + $0x80] sm:$0xff] %vm204_vm0, %v6958_v32  ;;  %v2756_v33 = vld [vmem:[#allocation2 + $0x111] sm:$0xff]  ;;  %2719 = vst.msk [vmem:[#allocation3 + $0x90] sm:$0xff] %vm204_vm0, %v6963_v61  ;;  %v6973_v46 = vld [vmem:[#allocation2 + $0x108] sm:$0xff] }
 0x3be   : > { %2837 = vrot.lane.b32.xlu0 %v2753_v43, %s5287_s18  ;;  %2721 = vst.msk [vmem:[#allocation3 + $0xa0] sm:$0xff] %vm204_vm0, %v6968_v49  ;;  %2723 = vst.msk [vmem:[#allocation3 + $0xb0] sm:$0xff] %vm204_vm0, %v6973_v46  ;;  %v2758_v18 = vld [vmem:[#allocation2 + $0x129] sm:$0xff]  ;;  %v2757_v51 = vld [vmem:[#allocation2 + $0x121] sm:$0xff] }
 0x3bf   : > { %2843 = vrot.lane.b32.xlu1 %v2756_v33, %s5287_s18  ;;  %v6977_v24 = vld [vmem:[#allocation2 + $0x120] sm:$0xff]  ;;  %v2695_v20 = vld [vmem:[#allocation2 + $0x138] sm:$0xff]  ;;  %v2649_v52 = vld [vmem:[#allocation2 + $0x18f] sm:$0x1] }
 0x3c0   : > { %2725 = vst.msk [vmem:[#allocation3 + $0xc0] sm:$0xff] %vm204_vm0, %v6977_v24  ;;  %2727 = vst.msk [vmem:[#allocation3 + $0xd0] sm:$0xff] %vm204_vm0, %v2695_v20  ;;  %v2760_v35 = vld [vmem:[#allocation2 + $0x141] sm:$0xff]  ;;  %v2759_v31 = vld [vmem:[#allocation2 + $0x139] sm:$0xff] }
 0x3c1   : > { %v2762_v25 = vld [vmem:[#allocation2 + $0x159] sm:$0xff]  ;;  %v2761_v7 = vld [vmem:[#allocation2 + $0x151] sm:$0xff]  ;;  %2667 = vst.msk [vmem:[#allocation2 + $0x191] sm:$0x1] %vm260_vm1, %v2649_v52  ;;  %v2650_v42 = vld [vmem:[#allocation2 + $0x1a7] sm:$0x1] }
 0x3c2   : > { %2841 = vrot.lane.b32.xlu0 %v2755_v23, %s5287_s18  ;;  %v2697_v58 = vld [vmem:[#allocation2 + $0x150] sm:$0xff]  ;;  %v2699_v16 = vld [vmem:[#allocation2 + $0x168] sm:$0xff]  ;;  %v2614_v45 = vld [vmem:[#allocation2 + $0x19a] sm:$0x1]  ;;  %2668 = vst.msk [vmem:[#allocation2 + $0x1a9] sm:$0x1] %vm260_vm1, %v2650_v42 }
 0x3c3   : > { %2847 = vrot.lane.b32.xlu1 %v2758_v18, %s5287_s18  ;;  %2729 = vst.msk [vmem:[#allocation3 + $0xe0] sm:$0xff] %vm204_vm0, %v2697_v58  ;;  %2731 = vst.msk [vmem:[#allocation3 + $0xf0] sm:$0xff] %vm204_vm0, %v2699_v16  ;;  %v2764_v36 = vld [vmem:[#allocation2 + $0x171] sm:$0xff]  ;;  %v2763_v15 = vld [vmem:[#allocation2 + $0x169] sm:$0xff] }
 0x3c4   : > { %2632 = vst.msk [vmem:[#allocation2 + $0x198] sm:$0x1] %vm260_vm1, %v2614_v45  ;;  %v2926_v1 = vld [vmem:[#allocation2 + $0xa] sm:$0xff]  ;;  %v2925_v57 = vld [vmem:[#allocation2 + $0x2] sm:$0xff]  ;;  %v7002_v47 = vld [vmem:[#allocation2 + $0x1a] sm:$0xff] }
 0x3c5   : > { %v6998_v53 = vld [vmem:[#allocation2 + $0x22] sm:$0xff]  ;;  %v7006_v30 = vld [vmem:[#allocation2 + $0x3a] sm:$0xff]  ;;  %v7010_v63 = vld [vmem:[#allocation2 + $0x32] sm:$0xff] }
 0x3c6   : > { %2845 = vrot.lane.b32.xlu0 %v2757_v51, %s5287_s18  ;;  %v7014_v40 = vld [vmem:[#allocation2 + $0x52] sm:$0xff]  ;;  %v7018_v22 = vld [vmem:[#allocation2 + $0x4a] sm:$0xff]  ;;  %v7026_v10 = vld [vmem:[#allocation2 + $0x62] sm:$0xff] }
 0x3c7   : > { %2851 = vrot.lane.b32.xlu1 %v2760_v35, %s5287_s18  ;;  %v7022_v39 = vld [vmem:[#allocation2 + $0x6a] sm:$0xff]  ;;  %v7030_v27 = vld [vmem:[#allocation2 + $0x82] sm:$0xff]  ;;  %v7034_v43 = vld [vmem:[#allocation2 + $0x7a] sm:$0xff] }
 0x3c8   : > { %v7038_v33 = vld [vmem:[#allocation2 + $0x9a] sm:$0xff]  ;;  %v7042_v20 = vld [vmem:[#allocation2 + $0x92] sm:$0xff]  ;;  %v7050_v18 = vld [vmem:[#allocation2 + $0xaa] sm:$0xff] }
 0x3c9   : > { %v7046_v23 = vld [vmem:[#allocation2 + $0xb2] sm:$0xff]  ;;  %v2942_v58 = vld [vmem:[#allocation2 + $0xca] sm:$0xff]  ;;  %v7055_v16 = vld [vmem:[#allocation2 + $0xc2] sm:$0xff] }
 0x3ca   : > { %2849 = vrot.lane.b32.xlu0 %v2759_v31, %s5287_s18  ;;  %v2944_v51 = vld [vmem:[#allocation2 + $0xe2] sm:$0xff]  ;;  %v2943_v35 = vld [vmem:[#allocation2 + $0xda] sm:$0xff]  ;;  %v2947_v52 = vld [vmem:[#allocation2 + $0x10a] sm:$0xff] }
 0x3cb   : > { %2855 = vrot.lane.b32.xlu1 %v2762_v25, %s5287_s18  ;;  %v2946_v31 = vld [vmem:[#allocation2 + $0xfa] sm:$0xff]  ;;  %v2945_v25 = vld [vmem:[#allocation2 + $0xf2] sm:$0xff]  ;;  %v2949_v42 = vld [vmem:[#allocation2 + $0x122] sm:$0xff] }
 0x3ce   : > { %2853 = vrot.lane.b32.xlu0 %v2761_v7, %s5287_s18  ;;  %v2948_v7 = vld [vmem:[#allocation2 + $0x112] sm:$0xff] }
 0x3cf   : > { %2859 = vrot.lane.b32.xlu1 %v2764_v36, %s5287_s18  ;;  %v2950_v36 = vld [vmem:[#allocation2 + $0x12a] sm:$0xff] }
 0x3d2   : > { %2857 = vrot.lane.b32.xlu0 %v2763_v15, %s5287_s18  ;;  %v2952_v15 = vld [vmem:[#allocation2 + $0x142] sm:$0xff] }
 0x3d3   : > { %2991 = vrot.lane.b32.xlu1 %v2926_v1, %s5288_s19 }
 0x3d6   : > { %2989 = vrot.lane.b32.xlu0 %v2925_v57, %s5288_s19  ;;  %v2951_v57 = vld [vmem:[#allocation2 + $0x13a] sm:$0xff] }
 0x3d7   : > { %2995 = vrot.lane.b32.xlu1 %v6998_v53, %s5288_s19 }
 0x3da   : > { %2993 = vrot.lane.b32.xlu0 %v7002_v47, %s5288_s19 }
 0x3db   : > { %2999 = vrot.lane.b32.xlu1 %v7006_v30, %s5288_s19 }
 0x3de   : > { %2997 = vrot.lane.b32.xlu0 %v7010_v63, %s5288_s19 }
 0x3df   : > { %3003 = vrot.lane.b32.xlu1 %v7014_v40, %s5288_s19 }
 0x3e2   : > { %3001 = vrot.lane.b32.xlu0 %v7018_v22, %s5288_s19 }
 0x3e3   : > { %3007 = vrot.lane.b32.xlu1 %v7022_v39, %s5288_s19 }
 0x3e6   : > { %3005 = vrot.lane.b32.xlu0 %v7026_v10, %s5288_s19 }
 0x3e7   : > { %3011 = vrot.lane.b32.xlu1 %v7030_v27, %s5288_s19 }
 0x3ea   : > { %3009 = vrot.lane.b32.xlu0 %v7034_v43, %s5288_s19 }
 0x3eb   : > { %3015 = vrot.lane.b32.xlu1 %v7038_v33, %s5288_s19 }
 0x3ee   : > { %3013 = vrot.lane.b32.xlu0 %v7042_v20, %s5288_s19 }
 0x3ef   : > { %3019 = vrot.lane.b32.xlu1 %v7046_v23, %s5288_s19 }
 0x3f2   : > { %3017 = vrot.lane.b32.xlu0 %v7050_v18, %s5288_s19 }
 0x3f3   : > { %3023 = vrot.lane.b32.xlu1 %v2942_v58, %s5288_s19 }
 0x3f6   : > { %3021 = vrot.lane.b32.xlu0 %v7055_v16, %s5288_s19 }
 0x3f7   : > { %3027 = vrot.lane.b32.xlu1 %v2944_v51, %s5288_s19  ;;  %v2954_v51 = vld [vmem:[#allocation2 + $0x15a] sm:$0xff] }
 0x3fa   : > { %3025 = vrot.lane.b32.xlu0 %v2943_v35, %s5288_s19 }
 0x3fb   : > { %3031 = vrot.lane.b32.xlu1 %v2946_v31, %s5288_s19  ;;  %v2953_v31 = vld [vmem:[#allocation2 + $0x152] sm:$0xff] }
 0x3fe   : > { %3029 = vrot.lane.b32.xlu0 %v2945_v25, %s5288_s19 }
 0x3ff   : > { %3035 = vrot.lane.b32.xlu1 %v2948_v7, %s5288_s19  ;;  %v2956_v7 = vld [vmem:[#allocation2 + $0x172] sm:$0xff] }
 0x402   : > { %3033 = vrot.lane.b32.xlu0 %v2947_v52, %s5288_s19  ;;  %v2800_v45 = vpop.permute.xlu1 %2799 }
 0x403   : > { %3039 = vrot.lane.b32.xlu1 %v2950_v36, %s5288_s19  ;;  %2894 = vst.msk [vmem:[#allocation3 + $0x8] sm:$0xff] %vm539_vm2, %v2800_v45  ;;  %v2955_v36 = vld [vmem:[#allocation2 + $0x16a] sm:$0xff] }
 0x406   : > { %3037 = vrot.lane.b32.xlu0 %v2949_v42, %s5288_s19 }
 0x407   : > { %3043 = vrot.lane.b32.xlu1 %v2952_v15, %s5288_s19 }
 0x408   : > { %v2798_v1 = vpop.permute.xlu0 %2797 }
 0x409   : > { %2893 = vst.msk [vmem:[#allocation3] sm:$0xff] %vm539_vm2, %v2798_v1  ;;  %v2804_v58 = vpop.permute.xlu1 %2803 }
 0x40a   : > { %3041 = vrot.lane.b32.xlu0 %v2951_v57, %s5288_s19  ;;  %2896 = vst.msk [vmem:[#allocation3 + $0x18] sm:$0xff] %vm539_vm2, %v2804_v58 }
 0x40b   : > { %3047 = vrot.lane.b32.xlu1 %v2954_v51, %s5288_s19 }
 0x40c   : > { %v2802_v35 = vpop.permute.xlu0 %2801 }
 0x40d   : > { %2895 = vst.msk [vmem:[#allocation3 + $0x10] sm:$0xff] %vm539_vm2, %v2802_v35  ;;  %v2808_v25 = vpop.permute.xlu1 %2807 }
 0x40e   : > { %3045 = vrot.lane.b32.xlu0 %v2953_v31, %s5288_s19  ;;  %2898 = vst.msk [vmem:[#allocation3 + $0x28] sm:$0xff] %vm539_vm2, %v2808_v25 }
 0x40f   : > { %3051 = vrot.lane.b32.xlu1 %v2956_v7, %s5288_s19  ;;  %v4303_v7 = vld [vmem:[%s8064_s2 + $0x10] sm:$0xff] }
 0x410   : > { %v2806_v52 = vpop.permute.xlu0 %2805 }
 0x411   : > { %2897 = vst.msk [vmem:[#allocation3 + $0x20] sm:$0xff] %vm539_vm2, %v2806_v52  ;;  %v2812_v45 = vpop.permute.xlu1 %2811 }
 0x412   : > { %3049 = vrot.lane.b32.xlu0 %v2955_v36, %s5288_s19  ;;  %2900 = vst.msk [vmem:[#allocation3 + $0x38] sm:$0xff] %vm539_vm2, %v2812_v45  ;;  %v4301_v45 = vld [vmem:[%s8064_s2] sm:$0xff] }
 0x413   : > { %3183 = vrot.lane.b32.xlu1 %v6849_v59, %s5289_s20 }
 0x414   : > { %v2810_v42 = vpop.permute.xlu0 %2809 }
 0x415   : > { %2899 = vst.msk [vmem:[#allocation3 + $0x30] sm:$0xff] %vm539_vm2, %v2810_v42  ;;  %v2816_v15 = vpop.permute.xlu1 %2815 }
 0x416   : > { %3181 = vrot.lane.b32.xlu0 %v6881_v19, %s5289_s20  ;;  %2902 = vst.msk [vmem:[#allocation3 + $0x48] sm:$0xff] %vm539_vm2, %v2816_v15 }
 0x417   : > { %3187 = vrot.lane.b32.xlu1 %v6857_v37, %s5289_s20 }
 0x418   : > { %v2814_v1 = vpop.permute.xlu0 %2813 }
 0x419   : > { %2901 = vst.msk [vmem:[#allocation3 + $0x40] sm:$0xff] %vm539_vm2, %v2814_v1  ;;  %v2820_v57 = vpop.permute.xlu1 %2819 }
 0x41a   : > { %3185 = vrot.lane.b32.xlu0 %v6904_v29, %s5289_s20  ;;  %2904 = vst.msk [vmem:[#allocation3 + $0x58] sm:$0xff] %vm539_vm2, %v2820_v57 }
 0x41b   : > { %3191 = vrot.lane.b32.xlu1 %v6868_v34, %s5289_s20 }
 0x41c   : > { %v2818_v59 = vpop.permute.xlu0 %2817 }
 0x41d   : > { %2903 = vst.msk [vmem:[#allocation3 + $0x50] sm:$0xff] %vm539_vm2, %v2818_v59  ;;  %v2824_v19 = vpop.permute.xlu1 %2823 }
 0x41e   : > { %3189 = vrot.lane.b32.xlu0 %v6922_v13, %s5289_s20  ;;  %2906 = vst.msk [vmem:[#allocation3 + $0x68] sm:$0xff] %vm539_vm2, %v2824_v19 }
 0x41f   : > { %3373 = vrot.lane.b32.xlu1 %v6797_v3, %s5290_s21 }
 0x420   : > { %v2822_v58 = vpop.permute.xlu0 %2821 }
 0x421   : > { %2905 = vst.msk [vmem:[#allocation3 + $0x60] sm:$0xff] %vm539_vm2, %v2822_v58  ;;  %v2828_v51 = vpop.permute.xlu1 %2827 }
 0x422   : > { %3193 = vrot.lane.b32.xlu0 %v6934_v4, %s5289_s20  ;;  %2908 = vst.msk [vmem:[#allocation3 + $0x78] sm:$0xff] %vm539_vm2, %v2828_v51 }
 0x423   : > { %3565 = vrot.lane.b32.xlu1 %v7002_v47, %s5291_s22  ;;  %v4305_v47 = vld [vmem:[%s8064_s2 + $0x20] sm:$0xf] }
 0x424   : > { %v2826_v35 = vpop.permute.xlu0 %2825  ;;  %5201 = vmatprep.subr.msk.mxu1 %vm2058_vm5, %v4305_v47 }
 0x425   : > { %2907 = vst.msk [vmem:[#allocation3 + $0x70] sm:$0xff] %vm539_vm2, %v2826_v35  ;;  %v2832_v31 = vpop.permute.xlu1 %2831  ;;  %5202 = vmatpush3.msk.msra.mxu1 %vm2058_vm5, %v4305_v47 }
 0x426   : > { %3375 = vrot.lane.b32.xlu0 %v6793_v56, %s5290_s21  ;;  %2910 = vst.msk [vmem:[#allocation3 + $0x88] sm:$0xff] %vm539_vm2, %v2832_v31 }
 0x427   : > { %3757 = vrot.lane.b32.xlu1 %v6904_v29, %s5292_s4 }
 0x428   : > { %v2830_v3 = vpop.permute.xlu0 %2829 }
 0x429   : > { %2909 = vst.msk [vmem:[#allocation3 + $0x80] sm:$0xff] %vm539_vm2, %v2830_v3  ;;  %v2836_v25 = vpop.permute.xlu1 %2835 }
 0x42a   : > { %3567 = vrot.lane.b32.xlu0 %v6998_v53, %s5291_s22  ;;  %2912 = vst.msk [vmem:[#allocation3 + $0x98] sm:$0xff] %vm539_vm2, %v2836_v25  ;;  %v4304_v53 = vld [vmem:[%s8064_s2 + $0x18] sm:$0xff] }
 0x42b   : > { %3949 = vrot.lane.b32.xlu1 %v6805_v26, %s5293_s7  ;;  %5203 = vmatprep.subr.mxu1 %v4304_v53 }
 0x42c   : > { %v2834_v56 = vpop.permute.xlu0 %2833  ;;  %5204 = vmatpush3.msra.mxu1 %v4304_v53 }
 0x42d   : > { %2911 = vst.msk [vmem:[#allocation3 + $0x90] sm:$0xff] %vm539_vm2, %v2834_v56  ;;  %v2840_v29 = vpop.permute.xlu1 %2839  ;;  %5205 = vmatprep.subr.mxu1 %v4303_v7 }
 0x42e   : > { %3759 = vrot.lane.b32.xlu0 %v6857_v37, %s5292_s4  ;;  %2914 = vst.msk [vmem:[#allocation3 + $0xa8] sm:$0xff] %vm539_vm2, %v2840_v29  ;;  %5206 = vmatpush3.msra.mxu1 %v4303_v7  ;;  %v4302_v37 = vld [vmem:[%s8064_s2 + $0x8] sm:$0xff] }
 0x42f   : > { %3951 = vrot.lane.b32.xlu1 %v6801_v6, %s5293_s7  ;;  %5207 = vmatprep.subr.mxu1 %v4302_v37 }
 0x430   : > { %v2838_v52 = vpop.permute.xlu0 %2837  ;;  %5208 = vmatpush3.msra.mxu1 %v4302_v37 }
 0x431   : > { %2913 = vst.msk [vmem:[#allocation3 + $0xa0] sm:$0xff] %vm539_vm2, %v2838_v52  ;;  %v2844_v36 = vpop.permute.xlu1 %2843  ;;  %5209 = vmatprep.subr.mxu1 %v4301_v45 }
 0x432   : > { %3377 = vrot.lane.b32.xlu0 %v6805_v26, %s5290_s21  ;;  %2916 = vst.msk [vmem:[#allocation3 + $0xb8] sm:$0xff] %vm539_vm2, %v2844_v36  ;;  %5210 = vmatpush3.msra.mxu1 %v4301_v45 }
 0x433   : > { %3379 = vrot.lane.b32.xlu1 %v6801_v6, %s5290_s21 }
 0x434   : > { %v2842_v42 = vpop.permute.xlu0 %2841 }
 0x435   : > { %2915 = vst.msk [vmem:[#allocation3 + $0xb0] sm:$0xff] %vm539_vm2, %v2842_v42  ;;  %v2848_v15 = vpop.permute.xlu1 %2847 }
 0x436   : > { %4141 = vrot.lane.b32.xlu0 %v7010_v63, %s5294_s8  ;;  %2918 = vst.msk [vmem:[#allocation3 + $0xc8] sm:$0xff] %vm539_vm2, %v2848_v15 }
 0x437   : > { %4143 = vrot.lane.b32.xlu1 %v7006_v30, %s5294_s8 }
 0x438   : > { %v2846_v26 = vpop.permute.xlu0 %2845 }
 0x439   : > { %2917 = vst.msk [vmem:[#allocation3 + $0xc0] sm:$0xff] %vm539_vm2, %v2846_v26  ;;  %v2852_v1 = vpop.permute.xlu1 %2851 }
 0x43a   : > { %3569 = vrot.lane.b32.xlu0 %v7010_v63, %s5291_s22  ;;  %2920 = vst.msk [vmem:[#allocation3 + $0xd8] sm:$0xff] %vm539_vm2, %v2852_v1 }
 0x43b   : > { %3761 = vrot.lane.b32.xlu1 %v6922_v13, %s5292_s4 }
 0x43c   : > { %v2850_v6 = vpop.permute.xlu0 %2849 }
 0x43d   : > { %2919 = vst.msk [vmem:[#allocation3 + $0xd0] sm:$0xff] %vm539_vm2, %v2850_v6  ;;  %v2856_v57 = vpop.permute.xlu1 %2855  ;;  %v3895_v6 = vld [vmem:[#allocation2 + $0xa9] sm:$0xff] }
 0x43e   : > { %3571 = vrot.lane.b32.xlu0 %v7006_v30, %s5291_s22  ;;  %2922 = vst.msk [vmem:[#allocation3 + $0xe8] sm:$0xff] %vm539_vm2, %v2856_v57 }
 0x43f   : > { %3953 = vrot.lane.b32.xlu1 %v6814_v12, %s5293_s7 }
 0x440   : > { %v2854_v59 = vpop.permute.xlu0 %2853 }
 0x441   : > { %2921 = vst.msk [vmem:[#allocation3 + $0xe0] sm:$0xff] %vm539_vm2, %v2854_v59  ;;  %v2860_v63 = vpop.permute.xlu1 %2859 }
 0x442   : > { %3763 = vrot.lane.b32.xlu0 %v6868_v34, %s5292_s4  ;;  %2924 = vst.msk [vmem:[#allocation3 + $0xf8] sm:$0xff] %vm539_vm2, %v2860_v63 }
 0x443   : > { %3955 = vrot.lane.b32.xlu1 %v6809_v21, %s5293_s7 }
 0x444   : > { %v2858_v13 = vpop.permute.xlu0 %2857 }
 0x445   : > { %2923 = vst.msk [vmem:[#allocation3 + $0xf0] sm:$0xff] %vm539_vm2, %v2858_v13  ;;  %v2992_v30 = vpop.permute.xlu1 %2991  ;;  %v3896_v13 = vld [vmem:[#allocation2 + $0xb1] sm:$0xff] }
 0x446   : > { %3381 = vrot.lane.b32.xlu0 %v6814_v12, %s5290_s21  ;;  %3086 = vst.msk [vmem:[#allocation3 + $0x8] sm:$0xff] %vm732_vm3, %v2992_v30 }
 0x447   : > { %3383 = vrot.lane.b32.xlu1 %v6809_v21, %s5290_s21 }
 0x448   : > { %v2990_v19 = vpop.permute.xlu0 %2989 }
 0x449   : > { %3085 = vst.msk [vmem:[#allocation3] sm:$0xff] %vm732_vm3, %v2990_v19  ;;  %v2996_v34 = vpop.permute.xlu1 %2995 }
 0x44a   : > { %4145 = vrot.lane.b32.xlu0 %v7018_v22, %s5294_s8  ;;  %3088 = vst.msk [vmem:[#allocation3 + $0x18] sm:$0xff] %vm732_vm3, %v2996_v34 }
 0x44b   : > { %4147 = vrot.lane.b32.xlu1 %v7014_v40, %s5294_s8 }
 0x44c   : > { %v2994_v58 = vpop.permute.xlu0 %2993 }
 0x44d   : > { %3087 = vst.msk [vmem:[#allocation3 + $0x10] sm:$0xff] %vm732_vm3, %v2994_v58  ;;  %v3000_v12 = vpop.permute.xlu1 %2999 }
 0x44e   : > { %3573 = vrot.lane.b32.xlu0 %v7018_v22, %s5291_s22  ;;  %3090 = vst.msk [vmem:[#allocation3 + $0x28] sm:$0xff] %vm732_vm3, %v3000_v12 }
 0x44f   : > { %3765 = vrot.lane.b32.xlu1 %v6934_v4, %s5292_s4 }
 0x450   : > { %v2998_v21 = vpop.permute.xlu0 %2997 }
 0x451   : > { %3089 = vst.msk [vmem:[#allocation3 + $0x20] sm:$0xff] %vm732_vm3, %v2998_v21  ;;  %v3004_v51 = vpop.permute.xlu1 %3003 }
 0x452   : > { %3575 = vrot.lane.b32.xlu0 %v7014_v40, %s5291_s22  ;;  %3092 = vst.msk [vmem:[#allocation3 + $0x38] sm:$0xff] %vm732_vm3, %v3004_v51 }
 0x453   : > { %3957 = vrot.lane.b32.xlu1 %v6827_v0, %s5293_s7 }
 0x454   : > { %v3002_v35 = vpop.permute.xlu0 %3001 }
 0x455   : > { %3091 = vst.msk [vmem:[#allocation3 + $0x30] sm:$0xff] %vm732_vm3, %v3002_v35  ;;  %v3008_v22 = vpop.permute.xlu1 %3007 }
 0x456   : > { %3767 = vrot.lane.b32.xlu0 %v6873_v11, %s5292_s4  ;;  %3094 = vst.msk [vmem:[#allocation3 + $0x48] sm:$0xff] %vm732_vm3, %v3008_v22 }
 0x457   : > { %3385 = vrot.lane.b32.xlu1 %v6827_v0, %s5290_s21 }
 0x458   : > { %v3006_v4 = vpop.permute.xlu0 %3005 }
 0x459   : > { %3093 = vst.msk [vmem:[#allocation3 + $0x40] sm:$0xff] %vm732_vm3, %v3006_v4  ;;  %v3012_v40 = vpop.permute.xlu1 %3011 }
 0x45a   : > { %3195 = vrot.lane.b32.xlu0 %v6873_v11, %s5289_s20  ;;  %3096 = vst.msk [vmem:[#allocation3 + $0x58] sm:$0xff] %vm732_vm3, %v3012_v40 }
 0x45b   : > { %4149 = vrot.lane.b32.xlu1 %v7026_v10, %s5294_s8 }
 0x45c   : > { %v3010_v31 = vpop.permute.xlu0 %3009 }
 0x45d   : > { %3095 = vst.msk [vmem:[#allocation3 + $0x50] sm:$0xff] %vm732_vm3, %v3010_v31  ;;  %v3016_v3 = vpop.permute.xlu1 %3015  ;;  %v3898_v31 = vld [vmem:[#allocation2 + $0xc9] sm:$0xff] }
 0x45e   : > { %3959 = vrot.lane.b32.xlu0 %v6818_v17, %s5293_s7  ;;  %3098 = vst.msk [vmem:[#allocation3 + $0x68] sm:$0xff] %vm732_vm3, %v3016_v3 }
 0x45f   : > { %3577 = vrot.lane.b32.xlu1 %v7026_v10, %s5291_s22 }
 0x460   : > { %v3014_v0 = vpop.permute.xlu0 %3013 }
 0x461   : > { %3097 = vst.msk [vmem:[#allocation3 + $0x60] sm:$0xff] %vm732_vm3, %v3014_v0  ;;  %v3020_v11 = vpop.permute.xlu1 %3019  ;;  %v3515_v0 = vld [vmem:[#allocation2 + $0xc2] sm:$0xff] }
 0x462   : > { %3387 = vrot.lane.b32.xlu0 %v6818_v17, %s5290_s21  ;;  %3100 = vst.msk [vmem:[#allocation3 + $0x78] sm:$0xff] %vm732_vm3, %v3020_v11 }
 0x463   : > { %3579 = vrot.lane.b32.xlu1 %v7022_v39, %s5291_s22 }
 0x464   : > { %v3018_v25 = vpop.permute.xlu0 %3017 }
 0x465   : > { %3099 = vst.msk [vmem:[#allocation3 + $0x70] sm:$0xff] %vm732_vm3, %v3018_v25  ;;  %v3024_v47 = vpop.permute.xlu1 %3023 }
 0x466   : > { %4151 = vrot.lane.b32.xlu0 %v7022_v39, %s5294_s8  ;;  %3102 = vst.msk [vmem:[#allocation3 + $0x88] sm:$0xff] %vm732_vm3, %v3024_v47 }
 0x467   : > { %3197 = vrot.lane.b32.xlu1 %v6936_v2, %s5289_s20 }
 0x468   : > { %v3022_v10 = vpop.permute.xlu0 %3021 }
 0x469   : > { %3101 = vst.msk [vmem:[#allocation3 + $0x80] sm:$0xff] %vm732_vm3, %v3022_v10  ;;  %v3028_v17 = vpop.permute.xlu1 %3027 }
 0x46a   : > { %3769 = vrot.lane.b32.xlu0 %v6936_v2, %s5292_s4  ;;  %3104 = vst.msk [vmem:[#allocation3 + $0x98] sm:$0xff] %vm732_vm3, %v3028_v17 }
 0x46b   : > { %3961 = vrot.lane.b32.xlu1 %v6840_v50, %s5293_s7 }
 0x46c   : > { %v3026_v56 = vpop.permute.xlu0 %3025 }
 0x46d   : > { %3103 = vst.msk [vmem:[#allocation3 + $0x90] sm:$0xff] %vm732_vm3, %v3026_v56  ;;  %v3032_v39 = vpop.permute.xlu1 %3031 }
 0x46e   : > { %3771 = vrot.lane.b32.xlu0 %v6878_v44, %s5292_s4  ;;  %3106 = vst.msk [vmem:[#allocation3 + $0xa8] sm:$0xff] %vm732_vm3, %v3032_v39 }
 0x46f   : > { %3389 = vrot.lane.b32.xlu1 %v6840_v50, %s5290_s21 }
 0x470   : > { %v3030_v29 = vpop.permute.xlu0 %3029 }
 0x471   : > { %3105 = vst.msk [vmem:[#allocation3 + $0xa0] sm:$0xff] %vm732_vm3, %v3030_v29  ;;  %v3036_v2 = vpop.permute.xlu1 %3035  ;;  %v3899_v29 = vld [vmem:[#allocation2 + $0xd9] sm:$0xff] }
 0x472   : > { %3199 = vrot.lane.b32.xlu0 %v6878_v44, %s5289_s20  ;;  %3108 = vst.msk [vmem:[#allocation3 + $0xb8] sm:$0xff] %vm732_vm3, %v3036_v2 }
 0x473   : > { %4153 = vrot.lane.b32.xlu1 %v7034_v43, %s5294_s8 }
 0x474   : > { %v3034_v53 = vpop.permute.xlu0 %3033 }
 0x475   : > { %3107 = vst.msk [vmem:[#allocation3 + $0xb0] sm:$0xff] %vm732_vm3, %v3034_v53  ;;  %v3040_v7 = vpop.permute.xlu1 %3039 }
 0x476   : > { %3963 = vrot.lane.b32.xlu0 %v6832_v28, %s5293_s7  ;;  %3110 = vst.msk [vmem:[#allocation3 + $0xc8] sm:$0xff] %vm732_vm3, %v3040_v7 }
 0x477   : > { %3581 = vrot.lane.b32.xlu1 %v7034_v43, %s5291_s22 }
 0x478   : > { %v3038_v50 = vpop.permute.xlu0 %3037 }
 0x479   : > { %3109 = vst.msk [vmem:[#allocation3 + $0xc0] sm:$0xff] %vm732_vm3, %v3038_v50  ;;  %v3044_v44 = vpop.permute.xlu1 %3043  ;;  %v4091_v50 = vld [vmem:[#allocation2 + $0xda] sm:$0xff] }
 0x47a   : > { %3391 = vrot.lane.b32.xlu0 %v6832_v28, %s5290_s21  ;;  %3112 = vst.msk [vmem:[#allocation3 + $0xd8] sm:$0xff] %vm732_vm3, %v3044_v44 }
 0x47b   : > { %3583 = vrot.lane.b32.xlu1 %v7030_v27, %s5291_s22 }
 0x47c   : > { %v3042_v52 = vpop.permute.xlu0 %3041 }
 0x47d   : > { %3111 = vst.msk [vmem:[#allocation3 + $0xd0] sm:$0xff] %vm732_vm3, %v3042_v52  ;;  %v3048_v36 = vpop.permute.xlu1 %3047  ;;  %v3900_v52 = vld [vmem:[#allocation2 + $0xe1] sm:$0xff] }
 0x47e   : > { %4155 = vrot.lane.b32.xlu0 %v7030_v27, %s5294_s8  ;;  %3114 = vst.msk [vmem:[#allocation3 + $0xe8] sm:$0xff] %vm732_vm3, %v3048_v36 }
 0x47f   : > { %3201 = vrot.lane.b32.xlu1 %v6946_v8, %s5289_s20 }
 0x480   : > { %v3046_v43 = vpop.permute.xlu0 %3045 }
 0x481   : > { %3113 = vst.msk [vmem:[#allocation3 + $0xe0] sm:$0xff] %vm732_vm3, %v3046_v43  ;;  %v3052_v28 = vpop.permute.xlu1 %3051 }
 0x482   : > { %3773 = vrot.lane.b32.xlu0 %v6946_v8, %s5292_s4  ;;  %3116 = vst.msk [vmem:[#allocation3 + $0xf8] sm:$0xff] %vm732_vm3, %v3052_v28 }
 0x483   : > { %3965 = vrot.lane.b32.xlu1 %v6859_v55, %s5293_s7 }
 0x484   : > { %v3050_v37 = vpop.permute.xlu0 %3049 }
 0x485   : > { %3115 = vst.msk [vmem:[#allocation3 + $0xf0] sm:$0xff] %vm732_vm3, %v3050_v37  ;;  %v3184_v27 = vpop.permute.xlu1 %3183  ;;  %v3518_v37 = vld [vmem:[#allocation2 + $0xe2] sm:$0xff] }
 0x486   : > { %3775 = vrot.lane.b32.xlu0 %v6887_v41, %s5292_s4  ;;  %3278 = vst.msk [vmem:[#allocation3 + $0x8] sm:$0xff] %vm925_vm4, %v3184_v27 }
 0x487   : > { %3393 = vrot.lane.b32.xlu1 %v6859_v55, %s5290_s21 }
 0x488   : > { %v3182_v45 = vpop.permute.xlu0 %3181 }
 0x489   : > { %3277 = vst.msk [vmem:[#allocation3] sm:$0xff] %vm925_vm4, %v3182_v45  ;;  %v3188_v8 = vpop.permute.xlu1 %3187 }
 0x48a   : > { %3203 = vrot.lane.b32.xlu0 %v6887_v41, %s5289_s20  ;;  %3280 = vst.msk [vmem:[#allocation3 + $0x18] sm:$0xff] %vm925_vm4, %v3188_v8 }
 0x48b   : > { %4157 = vrot.lane.b32.xlu1 %v7042_v20, %s5294_s8 }
 0x48c   : > { %v3186_v42 = vpop.permute.xlu0 %3185 }
 0x48d   : > { %3279 = vst.msk [vmem:[#allocation3 + $0x10] sm:$0xff] %vm925_vm4, %v3186_v42  ;;  %v3192_v15 = vpop.permute.xlu1 %3191 }
 0x48e   : > { %3967 = vrot.lane.b32.xlu0 %v6847_v54, %s5293_s7  ;;  %3282 = vst.msk [vmem:[#allocation3 + $0x28] sm:$0xff] %vm925_vm4, %v3192_v15 }
 0x48f   : > { %3585 = vrot.lane.b32.xlu1 %v7042_v20, %s5291_s22 }
 0x490   : > { %v3190_v55 = vpop.permute.xlu0 %3189 }
 0x491   : > { %3281 = vst.msk [vmem:[#allocation3 + $0x20] sm:$0xff] %vm925_vm4, %v3190_v55  ;;  %v3374_v41 = vpop.permute.xlu1 %3373  ;;  %v3901_v55 = vld [vmem:[#allocation2 + $0xf1] sm:$0xff] }
 0x492   : > { %3395 = vrot.lane.b32.xlu0 %v6847_v54, %s5290_s21  ;;  %3469 = vst.msk [vmem:[#allocation3] sm:$0xff] %vm1118_vm6, %v3374_v41 }
 0x493   : > { %3587 = vrot.lane.b32.xlu1 %v7038_v33, %s5291_s22 }
 0x494   : > { %v3194_v26 = vpop.permute.xlu0 %3193 }
 0x495   : > { %3283 = vst.msk [vmem:[#allocation3 + $0x30] sm:$0xff] %vm925_vm4, %v3194_v26  ;;  %v3566_v1 = vpop.permute.xlu1 %3565 }
 0x496   : > { %4159 = vrot.lane.b32.xlu0 %v7038_v33, %s5294_s8  ;;  %3661 = vst.msk [vmem:[#allocation3] sm:$0xff] %vm1311_vm7, %v3566_v1 }
 0x497   : > { %3205 = vrot.lane.b32.xlu1 %v6952_v5, %s5289_s20 }
 0x498   : > { %v3376_v20 = vpop.permute.xlu0 %3375 }
 0x499   : > { %3470 = vst.msk [vmem:[#allocation3 + $0x8] sm:$0xff] %vm1118_vm6, %v3376_v20  ;;  %v3758_v54 = vpop.permute.xlu1 %3757  ;;  %v4093_v20 = vld [vmem:[#allocation2 + $0xf2] sm:$0xff] }
 0x49a   : > { %3777 = vrot.lane.b32.xlu0 %v6952_v5, %s5292_s4  ;;  %3853 = vst.msk [vmem:[#allocation3] sm:$0xff] %vm1505_vm8, %v3758_v54 }
 0x49b   : > { %3969 = vrot.lane.b32.xlu1 %v3895_v6, %s5293_s7 }
 0x49c   : > { %v3568_v57 = vpop.permute.xlu0 %3567 }
 0x49d   : > { %3662 = vst.msk [vmem:[#allocation3 + $0x8] sm:$0xff] %vm1311_vm7, %v3568_v57  ;;  %v3950_v33 = vpop.permute.xlu1 %3949 }
 0x49e   : > { %3779 = vrot.lane.b32.xlu0 %v6895_v9, %s5292_s4  ;;  %4045 = vst.msk [vmem:[#allocation3] sm:$0xff] %vm1698_vm9, %v3950_v33 }
 0x49f   : > { %3397 = vrot.lane.b32.xlu1 %v3895_v6, %s5290_s21  ;;  %v3902_v6 = vld [vmem:[#allocation2 + $0xf9] sm:$0xff] }
 0x4a0   : > { %v3760_v59 = vpop.permute.xlu0 %3759 }
 0x4a1   : > { %3854 = vst.msk [vmem:[#allocation3 + $0x8] sm:$0xff] %vm1505_vm8, %v3760_v59  ;;  %v3952_v5 = vpop.permute.xlu1 %3951 }
 0x4a2   : > { %3207 = vrot.lane.b32.xlu0 %v6895_v9, %s5289_s20  ;;  %4046 = vst.msk [vmem:[#allocation3 + $0x8] sm:$0xff] %vm1698_vm9, %v3952_v5  ;;  %v3520_v5 = vld [vmem:[#allocation2 + $0xfa] sm:$0xff] }
 0x4a3   : > { %4161 = vrot.lane.b32.xlu1 %v7050_v18, %s5294_s8 }
 0x4a4   : > { %v3378_v63 = vpop.permute.xlu0 %3377 }
 0x4a5   : > { %3471 = vst.msk [vmem:[#allocation3 + $0x10] sm:$0xff] %vm1118_vm6, %v3378_v63  ;;  %v3380_v30 = vpop.permute.xlu1 %3379 }
 0x4a6   : > { %3971 = vrot.lane.b32.xlu0 %v3896_v13, %s5293_s7  ;;  %3472 = vst.msk [vmem:[#allocation3 + $0x18] sm:$0xff] %vm1118_vm6, %v3380_v30 }
 0x4a7   : > { %3589 = vrot.lane.b32.xlu1 %v7050_v18, %s5291_s22 }
 0x4a8   : > { %v4142_v19 = vpop.permute.xlu0 %4141 }
 0x4a9   : > { %4237 = vst.msk [vmem:[#allocation3] sm:$0xff] %vm1891_vm10, %v4142_v19  ;;  %v4144_v9 = vpop.permute.xlu1 %4143 }
 0x4aa   : > { %3399 = vrot.lane.b32.xlu0 %v3896_v13, %s5290_s21  ;;  %4238 = vst.msk [vmem:[#allocation3 + $0x8] sm:$0xff] %vm1891_vm10, %v4144_v9 }
 0x4ab   : > { %3591 = vrot.lane.b32.xlu1 %v7046_v23, %s5291_s22 }
 0x4ac   : > { %v3570_v34 = vpop.permute.xlu0 %3569 }
 0x4ad   : > { %3663 = vst.msk [vmem:[#allocation3 + $0x10] sm:$0xff] %vm1311_vm7, %v3570_v34  ;;  %v3762_v58 = vpop.permute.xlu1 %3761  ;;  %v3903_v34 = vld [vmem:[#allocation2 + $0x109] sm:$0xff] }
 0x4ae   : > { %4163 = vrot.lane.b32.xlu0 %v7046_v23, %s5294_s8  ;;  %3855 = vst.msk [vmem:[#allocation3 + $0x10] sm:$0xff] %vm1505_vm8, %v3762_v58  ;;  %v3897_v23 = vld [vmem:[#allocation2 + $0xc1] sm:$0xff] }
 0x4af   : > { %3209 = vrot.lane.b32.xlu1 %v6958_v32, %s5289_s20 }
 0x4b0   : > { %v3572_v18 = vpop.permute.xlu0 %3571  ;;  %v4269_v12 = vld [vmem:[#allocation3] sm:$0xff] }
 0x4b1   : > { %3664 = vst.msk [vmem:[#allocation3 + $0x18] sm:$0xff] %vm1311_vm7, %v3572_v18  ;;  %5211 = vmatprep.mubr.msk.f32.mxu1 %vm1961_vm11, %v4269_v12  ;;  %v3954_v21 = vpop.permute.xlu1 %3953  ;;  %v4270_v51 = vld [vmem:[#allocation3 + $0x8] sm:$0xff] }
 0x4b2   : > { %3781 = vrot.lane.b32.xlu0 %v6958_v32, %s5292_s4  ;;  %4047 = vst.msk [vmem:[#allocation3 + $0x10] sm:$0xff] %vm1698_vm9, %v3954_v21  ;;  %5212 = vmatmul.mubr.msk.f32.vlgmr.msra.gmra.mxu1 %vm1961_vm11, %v4270_v51  ;;  %v4095_v21 = vld [vmem:[#allocation2 + $0x10a] sm:$0xff] }
 0x4b3   : > { %3973 = vrot.lane.b32.xlu1 %v3897_v23, %s5293_s7 }
 0x4b4   : > { %v3764_v35 = vpop.permute.xlu0 %3763 }
 0x4b5   : > { %3856 = vst.msk [vmem:[#allocation3 + $0x18] sm:$0xff] %vm1505_vm8, %v3764_v35  ;;  %v3956_v22 = vpop.permute.xlu1 %3955 }
 0x4b6   : > { %3783 = vrot.lane.b32.xlu0 %v6900_v60, %s5292_s4  ;;  %4048 = vst.msk [vmem:[#allocation3 + $0x18] sm:$0xff] %vm1698_vm9, %v3956_v22 }
 0x4b7   : > { %3401 = vrot.lane.b32.xlu1 %v3897_v23, %s5290_s21  ;;  %v3904_v23 = vld [vmem:[#allocation2 + $0x111] sm:$0xff] }
 0x4b8   : > { %v3382_v4 = vpop.permute.xlu0 %3381 }
 0x4b9   : > { %3473 = vst.msk [vmem:[#allocation3 + $0x20] sm:$0xff] %vm1118_vm6, %v3382_v4  ;;  %v3384_v32 = vpop.permute.xlu1 %3383 }
 0x4ba   : > { %3211 = vrot.lane.b32.xlu0 %v6900_v60, %s5289_s20  ;;  %3474 = vst.msk [vmem:[#allocation3 + $0x28] sm:$0xff] %vm1118_vm6, %v3384_v32  ;;  %v3522_v32 = vld [vmem:[#allocation2 + $0x112] sm:$0xff] }
 0x4bb   : > { %4165 = vrot.lane.b32.xlu1 %v7055_v16, %s5294_s8  ;;  %v3516_v16 = vld [vmem:[#allocation2 + $0xca] sm:$0xff] }
 0x4bc   : > { %v4146_v40 = vpop.permute.xlu0 %4145 }
 0x4bd   : > { %4239 = vst.msk [vmem:[#allocation3 + $0x10] sm:$0xff] %vm1891_vm10, %v4146_v40  ;;  %v4148_v3 = vpop.permute.xlu1 %4147 }
 0x4be   : > { %3975 = vrot.lane.b32.xlu0 %v3898_v31, %s5293_s7  ;;  %4240 = vst.msk [vmem:[#allocation3 + $0x18] sm:$0xff] %vm1891_vm10, %v4148_v3 }
 0x4bf   : > { %3593 = vrot.lane.b32.xlu1 %v3515_v0, %s5291_s22 }
 0x4c0   : > { %v3574_v11 = vpop.permute.xlu0 %3573 }
 0x4c1   : > { %3665 = vst.msk [vmem:[#allocation3 + $0x20] sm:$0xff] %vm1311_vm7, %v3574_v11  ;;  %v3766_v60 = vpop.permute.xlu1 %3765 }
 0x4c2   : > { %3403 = vrot.lane.b32.xlu0 %v3898_v31, %s5290_s21  ;;  %3857 = vst.msk [vmem:[#allocation3 + $0x20] sm:$0xff] %vm1505_vm8, %v3766_v60  ;;  %v3905_v60 = vld [vmem:[#allocation2 + $0x121] sm:$0xff] }
 0x4c3   : > { %3595 = vrot.lane.b32.xlu1 %v3516_v16, %s5291_s22 }
 0x4c4   : > { %v3576_v25 = vpop.permute.xlu0 %3575  ;;  %v4271_v47 = vld [vmem:[#allocation3 + $0x10] sm:$0xff] }
 0x4c5   : > { %3666 = vst.msk [vmem:[#allocation3 + $0x28] sm:$0xff] %vm1311_vm7, %v3576_v25  ;;  %5214 = vmatprep.mubr.msk.f32.mxu1 %vm1961_vm11, %v4271_v47  ;;  %v3958_v10 = vpop.permute.xlu1 %3957  ;;  %v4272_v17 = vld [vmem:[#allocation3 + $0x18] sm:$0xff] }
 0x4c6   : > { %4167 = vrot.lane.b32.xlu0 %v3516_v16, %s5294_s8  ;;  %4049 = vst.msk [vmem:[#allocation3 + $0x20] sm:$0xff] %vm1698_vm9, %v3958_v10  ;;  %5215 = vmatmul.mubr.msk.f32.gmra.mxu1 %vm1961_vm11, %v4272_v17  ;;  %v4097_v17 = vld [vmem:[#allocation2 + $0x122] sm:$0xff] }
 0x4c7   : > { %3213 = vrot.lane.b32.xlu1 %v6963_v61, %s5289_s20 }
 0x4c8   : > { %v3768_v56 = vpop.permute.xlu0 %3767 }
 0x4c9   : > { %3858 = vst.msk [vmem:[#allocation3 + $0x28] sm:$0xff] %vm1505_vm8, %v3768_v56  ;;  %v3386_v39 = vpop.permute.xlu1 %3385 }
 0x4ca   : > { %3785 = vrot.lane.b32.xlu0 %v6963_v61, %s5292_s4  ;;  %3475 = vst.msk [vmem:[#allocation3 + $0x30] sm:$0xff] %vm1118_vm6, %v3386_v39 }
 0x4cb   : > { %3977 = vrot.lane.b32.xlu1 %v3899_v29, %s5293_s7 }
 0x4cc   : > { %v3196_v2 = vpop.permute.xlu0 %3195 }
 0x4cd   : > { %3284 = vst.msk [vmem:[#allocation3 + $0x38] sm:$0xff] %vm925_vm4, %v3196_v2  ;;  %v4150_v53 = vpop.permute.xlu1 %4149 }
 0x4ce   : > { %3787 = vrot.lane.b32.xlu0 %v6902_v38, %s5292_s4  ;;  %4241 = vst.msk [vmem:[#allocation3 + $0x20] sm:$0xff] %vm1891_vm10, %v4150_v53 }
 0x4cf   : > { %3405 = vrot.lane.b32.xlu1 %v3899_v29, %s5290_s21 }
 0x4d0   : > { %v3960_v7 = vpop.permute.xlu0 %3959 }
 0x4d1   : > { %4050 = vst.msk [vmem:[#allocation3 + $0x28] sm:$0xff] %vm1698_vm9, %v3960_v7  ;;  %v3578_v61 = vpop.permute.xlu1 %3577  ;;  %v3524_v7 = vld [vmem:[#allocation2 + $0x12a] sm:$0xff] }
 0x4d2   : > { %3215 = vrot.lane.b32.xlu0 %v6902_v38, %s5289_s20  ;;  %3667 = vst.msk [vmem:[#allocation3 + $0x30] sm:$0xff] %vm1311_vm7, %v3578_v61 }
 0x4d3   : > { %4169 = vrot.lane.b32.xlu1 %v4091_v50, %s5294_s8 }
 0x4d4   : > { %v3388_v44 = vpop.permute.xlu0 %3387 }
 0x4d5   : > { %3476 = vst.msk [vmem:[#allocation3 + $0x38] sm:$0xff] %vm1118_vm6, %v3388_v44  ;;  %v3580_v36 = vpop.permute.xlu1 %3579  ;;  %v4273_v43 = vld [vmem:[#allocation3 + $0x20] sm:$0xff]  ;;  %v3141_v44 = vld [vmem:[#allocation2 + $0x138] sm:$0xff] }
 0x4d6   : > { %3979 = vrot.lane.b32.xlu0 %v3900_v52, %s5293_s7  ;;  %3668 = vst.msk [vmem:[#allocation3 + $0x38] sm:$0xff] %vm1311_vm7, %v3580_v36  ;;  %5217 = vmatprep.mubr.msk.f32.mxu1 %vm1961_vm11, %v4273_v43 }
 0x4d7   : > { %3597 = vrot.lane.b32.xlu1 %v4091_v50, %s5291_s22 }
 0x4d8   : > { %v4152_v38 = vpop.permute.xlu0 %4151 }
 0x4d9   : > { %4242 = vst.msk [vmem:[#allocation3 + $0x28] sm:$0xff] %vm1891_vm10, %v4152_v38  ;;  %v3198_v28 = vpop.permute.xlu1 %3197  ;;  %v3907_v38 = vld [vmem:[#allocation2 + $0x139] sm:$0xff] }
 0x4da   : > { %3407 = vrot.lane.b32.xlu0 %v3900_v52, %s5290_s21  ;;  %3285 = vst.msk [vmem:[#allocation3 + $0x40] sm:$0xff] %vm925_vm4, %v3198_v28 }
 0x4db   : > { %3599 = vrot.lane.b32.xlu1 %v3518_v37, %s5291_s22 }
 0x4dc   : > { %v3770_v27 = vpop.permute.xlu0 %3769 }
 0x4dd   : > { %3859 = vst.msk [vmem:[#allocation3 + $0x30] sm:$0xff] %vm1505_vm8, %v3770_v27  ;;  %v3962_v45 = vpop.permute.xlu1 %3961 }
 0x4de   : > { %4171 = vrot.lane.b32.xlu0 %v3518_v37, %s5294_s8  ;;  %4051 = vst.msk [vmem:[#allocation3 + $0x30] sm:$0xff] %vm1698_vm9, %v3962_v45  ;;  %v3716_v37 = vld [vmem:[#allocation2 + $0x140] sm:$0xff] }
 0x4df   : > { %3217 = vrot.lane.b32.xlu1 %v6968_v49, %s5289_s20 }
 0x4e0   : > { %v3772_v8 = vpop.permute.xlu0 %3771  ;;  %v4274_v42 = vld [vmem:[#allocation3 + $0x28] sm:$0xff] }
 0x4e1   : > { %3860 = vst.msk [vmem:[#allocation3 + $0x38] sm:$0xff] %vm1505_vm8, %v3772_v8  ;;  %5218 = vmatmul.mubr.msk.f32.gmra.mxu1 %vm1961_vm11, %v4274_v42  ;;  %v3390_v15 = vpop.permute.xlu1 %3389  ;;  %v4099_v42 = vld [vmem:[#allocation2 + $0x13a] sm:$0xff] }
 0x4e2   : > { %3789 = vrot.lane.b32.xlu0 %v6968_v49, %s5292_s4  ;;  %3477 = vst.msk [vmem:[#allocation3 + $0x40] sm:$0xff] %vm1118_vm6, %v3390_v15 }
 0x4e3   : > { %3981 = vrot.lane.b32.xlu1 %v3901_v55, %s5293_s7 }
 0x4e4   : > { %v3200_v41 = vpop.permute.xlu0 %3199 }
 0x4e5   : > { %3286 = vst.msk [vmem:[#allocation3 + $0x48] sm:$0xff] %vm925_vm4, %v3200_v41  ;;  %v4154_v26 = vpop.permute.xlu1 %4153 }
 0x4e6   : > { %3791 = vrot.lane.b32.xlu0 %v6911_v62, %s5292_s4  ;;  %4243 = vst.msk [vmem:[#allocation3 + $0x30] sm:$0xff] %vm1891_vm10, %v4154_v26 }
 0x4e7   : > { %3409 = vrot.lane.b32.xlu1 %v3901_v55, %s5290_s21  ;;  %v3908_v55 = vld [vmem:[#allocation2 + $0x141] sm:$0xff] }
 0x4e8   : > { %v3964_v1 = vpop.permute.xlu0 %3963 }
 0x4e9   : > { %4052 = vst.msk [vmem:[#allocation3 + $0x38] sm:$0xff] %vm1698_vm9, %v3964_v1  ;;  %v3582_v49 = vpop.permute.xlu1 %3581 }
 0x4ea   : > { %3219 = vrot.lane.b32.xlu0 %v6911_v62, %s5289_s20  ;;  %3669 = vst.msk [vmem:[#allocation3 + $0x40] sm:$0xff] %vm1311_vm7, %v3582_v49 }
 0x4eb   : > { %4173 = vrot.lane.b32.xlu1 %v4093_v20, %s5294_s8 }
 0x4ec   : > { %v3392_v54 = vpop.permute.xlu0 %3391 }
 0x4ed   : > { %3478 = vst.msk [vmem:[#allocation3 + $0x48] sm:$0xff] %vm1118_vm6, %v3392_v54  ;;  %v3584_v57 = vpop.permute.xlu1 %3583  ;;  %v4275_v33 = vld [vmem:[#allocation3 + $0x30] sm:$0xff] }
 0x4ee   : > { %3983 = vrot.lane.b32.xlu0 %v3902_v6, %s5293_s7  ;;  %3670 = vst.msk [vmem:[#allocation3 + $0x48] sm:$0xff] %vm1311_vm7, %v3584_v57  ;;  %5220 = vmatprep.mubr.msk.f32.mxu1 %vm1961_vm11, %v4275_v33  ;;  %v3143_v57 = vld [vmem:[#allocation2 + $0x150] sm:$0xff] }
 0x4ef   : > { %3601 = vrot.lane.b32.xlu1 %v4093_v20, %s5291_s22  ;;  %v3526_v20 = vld [vmem:[#allocation2 + $0x142] sm:$0xff] }
 0x4f0   : > { %v4156_v62 = vpop.permute.xlu0 %4155 }
 0x4f1   : > { %4244 = vst.msk [vmem:[#allocation3 + $0x38] sm:$0xff] %vm1891_vm10, %v4156_v62  ;;  %v3202_v59 = vpop.permute.xlu1 %3201 }
 0x4f2   : > { %3411 = vrot.lane.b32.xlu0 %v3902_v6, %s5290_s21  ;;  %3287 = vst.msk [vmem:[#allocation3 + $0x50] sm:$0xff] %vm925_vm4, %v3202_v59 }
 0x4f3   : > { %3603 = vrot.lane.b32.xlu1 %v3520_v5, %s5291_s22 }
 0x4f4   : > { %v3774_v63 = vpop.permute.xlu0 %3773 }
 0x4f5   : > { %3861 = vst.msk [vmem:[#allocation3 + $0x40] sm:$0xff] %vm1505_vm8, %v3774_v63  ;;  %v3966_v13 = vpop.permute.xlu1 %3965 }
 0x4f6   : > { %4175 = vrot.lane.b32.xlu0 %v3520_v5, %s5294_s8  ;;  %4053 = vst.msk [vmem:[#allocation3 + $0x40] sm:$0xff] %vm1698_vm9, %v3966_v13  ;;  %v3909_v5 = vld [vmem:[#allocation2 + $0x151] sm:$0xff] }
 0x4f7   : > { %3221 = vrot.lane.b32.xlu1 %v6973_v46, %s5289_s20  ;;  %v3718_v13 = vld [vmem:[#allocation2 + $0x158] sm:$0xff] }
 0x4f8   : > { %v3776_v30 = vpop.permute.xlu0 %3775  ;;  %v4276_v19 = vld [vmem:[#allocation3 + $0x38] sm:$0xff] }
 0x4f9   : > { %3862 = vst.msk [vmem:[#allocation3 + $0x48] sm:$0xff] %vm1505_vm8, %v3776_v30  ;;  %5221 = vmatmul.mubr.msk.f32.gmra.mxu1 %vm1961_vm11, %v4276_v19  ;;  %v3394_v9 = vpop.permute.xlu1 %3393 }
 0x4fa   : > { %3793 = vrot.lane.b32.xlu0 %v6973_v46, %s5292_s4  ;;  %3479 = vst.msk [vmem:[#allocation3 + $0x50] sm:$0xff] %vm1118_vm6, %v3394_v9 }
 0x4fb   : > { %3985 = vrot.lane.b32.xlu1 %v3903_v34, %s5293_s7 }
 0x4fc   : > { %v3204_v58 = vpop.permute.xlu0 %3203 }
 0x4fd   : > { %3288 = vst.msk [vmem:[#allocation3 + $0x58] sm:$0xff] %vm925_vm4, %v3204_v58  ;;  %v4158_v18 = vpop.permute.xlu1 %4157 }
 0x4fe   : > { %3795 = vrot.lane.b32.xlu0 %v6919_v14, %s5292_s4  ;;  %4245 = vst.msk [vmem:[#allocation3 + $0x40] sm:$0xff] %vm1891_vm10, %v4158_v18  ;;  %v3910_v18 = vld [vmem:[#allocation2 + $0x159] sm:$0xff] }
 0x4ff   : > { %3413 = vrot.lane.b32.xlu1 %v3903_v34, %s5290_s21  ;;  %v4101_v34 = vld [vmem:[#allocation2 + $0x152] sm:$0xff] }
 0x500   : > { %v3968_v12 = vpop.permute.xlu0 %3967 }
 0x501   : > { %4054 = vst.msk [vmem:[#allocation3 + $0x48] sm:$0xff] %vm1698_vm9, %v3968_v12  ;;  %v3586_v46 = vpop.permute.xlu1 %3585 }
 0x502   : > { %3223 = vrot.lane.b32.xlu0 %v6919_v14, %s5289_s20  ;;  %3671 = vst.msk [vmem:[#allocation3 + $0x50] sm:$0xff] %vm1311_vm7, %v3586_v46 }
 0x503   : > { %4177 = vrot.lane.b32.xlu1 %v4095_v21, %s5294_s8 }
 0x504   : > { %v3396_v51 = vpop.permute.xlu0 %3395 }
 0x505   : > { %3480 = vst.msk [vmem:[#allocation3 + $0x58] sm:$0xff] %vm1118_vm6, %v3396_v51  ;;  %v3588_v35 = vpop.permute.xlu1 %3587  ;;  %v4277_v22 = vld [vmem:[#allocation3 + $0x40] sm:$0xff] }
 0x506   : > { %3987 = vrot.lane.b32.xlu0 %v3904_v23, %s5293_s7  ;;  %3672 = vst.msk [vmem:[#allocation3 + $0x58] sm:$0xff] %vm1311_vm7, %v3588_v35  ;;  %5223 = vmatprep.mubr.msk.f32.mxu1 %vm1961_vm11, %v4277_v22 }
 0x507   : > { %3605 = vrot.lane.b32.xlu1 %v4095_v21, %s5291_s22 }
 0x508   : > { %v4160_v14 = vpop.permute.xlu0 %4159 }
 0x509   : > { %4246 = vst.msk [vmem:[#allocation3 + $0x48] sm:$0xff] %vm1891_vm10, %v4160_v14  ;;  %v3206_v4 = vpop.permute.xlu1 %3205  ;;  %v3145_v14 = vld [vmem:[#allocation2 + $0x168] sm:$0xff] }
 0x50a   : > { %3415 = vrot.lane.b32.xlu0 %v3904_v23, %s5290_s21  ;;  %3289 = vst.msk [vmem:[#allocation3 + $0x60] sm:$0xff] %vm925_vm4, %v3206_v4  ;;  %v3528_v23 = vld [vmem:[#allocation2 + $0x15a] sm:$0xff] }
 0x50b   : > { %3607 = vrot.lane.b32.xlu1 %v3522_v32, %s5291_s22 }
 0x50c   : > { %v3778_v40 = vpop.permute.xlu0 %3777 }
 0x50d   : > { %3863 = vst.msk [vmem:[#allocation3 + $0x50] sm:$0xff] %vm1505_vm8, %v3778_v40  ;;  %v3970_v31 = vpop.permute.xlu1 %3969 }
 0x50e   : > { %4179 = vrot.lane.b32.xlu0 %v3522_v32, %s5294_s8  ;;  %4055 = vst.msk [vmem:[#allocation3 + $0x50] sm:$0xff] %vm1698_vm9, %v3970_v31  ;;  %v3911_v31 = vld [vmem:[#allocation2 + $0x169] sm:$0xff] }
 0x50f   : > { %3225 = vrot.lane.b32.xlu1 %v6977_v24, %s5289_s20 }
 0x510   : > { %v3780_v3 = vpop.permute.xlu0 %3779  ;;  %v4278_v0 = vld [vmem:[#allocation3 + $0x48] sm:$0xff] }
 0x511   : > { %3864 = vst.msk [vmem:[#allocation3 + $0x58] sm:$0xff] %vm1505_vm8, %v3780_v3  ;;  %5224 = vmatmul.mubr.msk.f32.gmra.mxu1 %vm1961_vm11, %v4278_v0  ;;  %v3398_v11 = vpop.permute.xlu1 %3397  ;;  %v3720_v0 = vld [vmem:[#allocation2 + $0x170] sm:$0xff] }
 0x512   : > { %3797 = vrot.lane.b32.xlu0 %v6977_v24, %s5292_s4  ;;  %3481 = vst.msk [vmem:[#allocation3 + $0x60] sm:$0xff] %vm1118_vm6, %v3398_v11  ;;  %v3140_v24 = vld [vmem:[#allocation2 + $0x128] sm:$0xff] }
 0x513   : > { %3989 = vrot.lane.b32.xlu1 %v3905_v60, %s5293_s7 }
 0x514   : > { %v3208_v16 = vpop.permute.xlu0 %3207 }
 0x515   : > { %3290 = vst.msk [vmem:[#allocation3 + $0x68] sm:$0xff] %vm925_vm4, %v3208_v16  ;;  %v4162_v25 = vpop.permute.xlu1 %4161 }
 0x516   : > { %3799 = vrot.lane.b32.xlu0 %v6927_v48, %s5292_s4  ;;  %4247 = vst.msk [vmem:[#allocation3 + $0x50] sm:$0xff] %vm1891_vm10, %v4162_v25  ;;  %v3906_v48 = vld [vmem:[#allocation2 + $0x129] sm:$0xff] }
 0x517   : > { %3417 = vrot.lane.b32.xlu1 %v3905_v60, %s5290_s21  ;;  %v4103_v25 = vld [vmem:[#allocation2 + $0x16a] sm:$0xff] }
 0x518   : > { %v3972_v47 = vpop.permute.xlu0 %3971 }
 0x519   : > { %4056 = vst.msk [vmem:[#allocation3 + $0x58] sm:$0xff] %vm1698_vm9, %v3972_v47  ;;  %v3590_v10 = vpop.permute.xlu1 %3589 }
 0x51a   : > { %3227 = vrot.lane.b32.xlu0 %v3140_v24, %s5289_s20  ;;  %3673 = vst.msk [vmem:[#allocation3 + $0x60] sm:$0xff] %vm1311_vm7, %v3590_v10  ;;  %v3912_v24 = vld [vmem:[#allocation2 + $0x171] sm:$0xff] }
 0x51b   : > { %4181 = vrot.lane.b32.xlu1 %v4097_v17, %s5294_s8 }
 0x51c   : > { %v3400_v56 = vpop.permute.xlu0 %3399 }
 0x51d   : > { %3482 = vst.msk [vmem:[#allocation3 + $0x68] sm:$0xff] %vm1118_vm6, %v3400_v56  ;;  %v3592_v39 = vpop.permute.xlu1 %3591  ;;  %v4279_v29 = vld [vmem:[#allocation3 + $0x50] sm:$0xff] }
 0x51e   : > { %3991 = vrot.lane.b32.xlu0 %v3906_v48, %s5293_s7  ;;  %3674 = vst.msk [vmem:[#allocation3 + $0x68] sm:$0xff] %vm1311_vm7, %v3592_v39  ;;  %5226 = vmatprep.mubr.msk.f32.mxu1 %vm1961_vm11, %v4279_v29  ;;  %v3530_v39 = vld [vmem:[#allocation2 + $0x172] sm:$0xff] }
 0x51f   : > { %3609 = vrot.lane.b32.xlu1 %v4097_v17, %s5291_s22 }
 0x520   : > { %v4164_v2 = vpop.permute.xlu0 %4163 }
 0x521   : > { %4248 = vst.msk [vmem:[#allocation3 + $0x58] sm:$0xff] %vm1891_vm10, %v4164_v2  ;;  %v3210_v53 = vpop.permute.xlu1 %3209 }
 0x522   : > { %3419 = vrot.lane.b32.xlu0 %v3906_v48, %s5290_s21  ;;  %3291 = vst.msk [vmem:[#allocation3 + $0x70] sm:$0xff] %vm925_vm4, %v3210_v53  ;;  %v3147_v53 = vld [vmem:[#allocation2 + $0x180] sm:$0xff] }
 0x523   : > { %3611 = vrot.lane.b32.xlu1 %v3524_v7, %s5291_s22 }
 0x524   : > { %v3782_v61 = vpop.permute.xlu0 %3781 }
 0x525   : > { %3865 = vst.msk [vmem:[#allocation3 + $0x60] sm:$0xff] %vm1505_vm8, %v3782_v61  ;;  %v3974_v50 = vpop.permute.xlu1 %3973 }
 0x526   : > { %4183 = vrot.lane.b32.xlu0 %v3524_v7, %s5294_s8  ;;  %4057 = vst.msk [vmem:[#allocation3 + $0x60] sm:$0xff] %vm1698_vm9, %v3974_v50 }
 0x527   : > { %3229 = vrot.lane.b32.xlu1 %v3141_v44, %s5289_s20 }
 0x528   : > { %v3784_v52 = vpop.permute.xlu0 %3783  ;;  %v4280_v36 = vld [vmem:[#allocation3 + $0x58] sm:$0xff] }
 0x529   : > { %3866 = vst.msk [vmem:[#allocation3 + $0x68] sm:$0xff] %vm1505_vm8, %v3784_v52  ;;  %5227 = vmatmul.mubr.msk.f32.gmra.mxu1 %vm1961_vm11, %v4280_v36  ;;  %v3402_v43 = vpop.permute.xlu1 %3401  ;;  %v3722_v36 = vld [vmem:[#allocation2 + $0x188] sm:$0xff] }
 0x52a   : > { %3801 = vrot.lane.b32.xlu0 %v3141_v44, %s5292_s4  ;;  %3483 = vst.msk [vmem:[#allocation3 + $0x70] sm:$0xff] %vm1118_vm6, %v3402_v43  ;;  %v3913_v44 = vld [vmem:[#allocation2 + $0x181] sm:$0xff] }
 0x52b   : > { %3993 = vrot.lane.b32.xlu1 %v3907_v38, %s5293_s7 }
 0x52c   : > { %v3212_v28 = vpop.permute.xlu0 %3211 }
 0x52d   : > { %3292 = vst.msk [vmem:[#allocation3 + $0x78] sm:$0xff] %vm925_vm4, %v3212_v28  ;;  %v4166_v27 = vpop.permute.xlu1 %4165 }
 0x52e   : > { %3803 = vrot.lane.b32.xlu0 %v3716_v37, %s5292_s4  ;;  %4249 = vst.msk [vmem:[#allocation3 + $0x60] sm:$0xff] %vm1891_vm10, %v4166_v27 }
 0x52f   : > { %3421 = vrot.lane.b32.xlu1 %v3907_v38, %s5290_s21 }
 0x530   : > { %v3976_v45 = vpop.permute.xlu0 %3975 }
 0x531   : > { %4058 = vst.msk [vmem:[#allocation3 + $0x68] sm:$0xff] %vm1698_vm9, %v3976_v45  ;;  %v3594_v8 = vpop.permute.xlu1 %3593  ;;  %v3914_v45 = vld [vmem:[#allocation2 + $0x189] sm:$0xff] }
 0x532   : > { %3231 = vrot.lane.b32.xlu0 %v3716_v37, %s5289_s20  ;;  %3675 = vst.msk [vmem:[#allocation3 + $0x70] sm:$0xff] %vm1311_vm7, %v3594_v8  ;;  %v4105_v37 = vld [vmem:[#allocation2 + $0x182] sm:$0xff] }
 0x533   : > { %4185 = vrot.lane.b32.xlu1 %v4099_v42, %s5294_s8 }
 0x534   : > { %v3404_v15 = vpop.permute.xlu0 %3403 }
 0x535   : > { %3484 = vst.msk [vmem:[#allocation3 + $0x78] sm:$0xff] %vm1118_vm6, %v3404_v15  ;;  %v3596_v41 = vpop.permute.xlu1 %3595  ;;  %v4281_v26 = vld [vmem:[#allocation3 + $0x60] sm:$0xff] }
 0x536   : > { %3995 = vrot.lane.b32.xlu0 %v3908_v55, %s5293_s7  ;;  %3676 = vst.msk [vmem:[#allocation3 + $0x78] sm:$0xff] %vm1311_vm7, %v3596_v41  ;;  %5229 = vmatprep.mubr.msk.f32.mxu1 %vm1961_vm11, %v4281_v26  ;;  %v3532_v41 = vld [vmem:[#allocation2 + $0x18a] sm:$0xff] }
 0x537   : > { %3613 = vrot.lane.b32.xlu1 %v4099_v42, %s5291_s22 }
 0x538   : > { %v4168_v1 = vpop.permute.xlu0 %4167 }
 0x539   : > { %4250 = vst.msk [vmem:[#allocation3 + $0x68] sm:$0xff] %vm1891_vm10, %v4168_v1  ;;  %v3214_v49 = vpop.permute.xlu1 %3213 }
 0x53a   : > { %3423 = vrot.lane.b32.xlu0 %v3908_v55, %s5290_s21  ;;  %3293 = vst.msk [vmem:[#allocation3 + $0x80] sm:$0xff] %vm925_vm4, %v3214_v49  ;;  %v3724_v49 = vld [vmem:[#allocation2 + $0x1a0] sm:$0xff] }
 0x53b   : > { %3615 = vrot.lane.b32.xlu1 %v3526_v20, %s5291_s22 }
 0x53c   : > { %v3786_v54 = vpop.permute.xlu0 %3785 }
 0x53d   : > { %3867 = vst.msk [vmem:[#allocation3 + $0x70] sm:$0xff] %vm1505_vm8, %v3786_v54  ;;  %v3978_v6 = vpop.permute.xlu1 %3977 }
 0x53e   : > { %4187 = vrot.lane.b32.xlu0 %v3526_v20, %s5294_s8  ;;  %4059 = vst.msk [vmem:[#allocation3 + $0x70] sm:$0xff] %vm1698_vm9, %v3978_v6  ;;  %v3723_v6 = vld [vmem:[#allocation2 + $0x198] sm:$0xff] }
 0x53f   : > { %3233 = vrot.lane.b32.xlu1 %v3143_v57, %s5289_s20 }
 0x540   : > { %v3788_v33 = vpop.permute.xlu0 %3787  ;;  %v4282_v62 = vld [vmem:[#allocation3 + $0x68] sm:$0xff] }
 0x541   : > { %3868 = vst.msk [vmem:[#allocation3 + $0x78] sm:$0xff] %vm1505_vm8, %v3788_v33  ;;  %5230 = vmatmul.mubr.msk.f32.gmra.mxu1 %vm1961_vm11, %v4282_v62  ;;  %v3406_v59 = vpop.permute.xlu1 %3405  ;;  %v3916_v33 = vld [vmem:[#allocation2 + $0x1a1] sm:$0xff] }
 0x542   : > { %3805 = vrot.lane.b32.xlu0 %v3143_v57, %s5292_s4  ;;  %3485 = vst.msk [vmem:[#allocation3 + $0x80] sm:$0xff] %vm1118_vm6, %v3406_v59  ;;  %v3915_v59 = vld [vmem:[#allocation2 + $0x199] sm:$0xff] }
 0x543   : > { %3997 = vrot.lane.b32.xlu1 %v3909_v5, %s5293_s7 }
 0x544   : > { %v3216_v63 = vpop.permute.xlu0 %3215 }
 0x545   : > { %3294 = vst.msk [vmem:[#allocation3 + $0x88] sm:$0xff] %vm925_vm4, %v3216_v63  ;;  %v4170_v30 = vpop.permute.xlu1 %4169  ;;  %v4108_v63 = vld [vmem:[#allocation2 + $0x1a2] sm:$0xff] }
 0x546   : > { %3807 = vrot.lane.b32.xlu0 %v3718_v13, %s5292_s4  ;;  %4251 = vst.msk [vmem:[#allocation3 + $0x70] sm:$0xff] %vm1891_vm10, %v4170_v30  ;;  %v4107_v30 = vld [vmem:[#allocation2 + $0x19a] sm:$0xff] }
 0x547   : > { %3425 = vrot.lane.b32.xlu1 %v3909_v5, %s5290_s21 }
 0x548   : > { %v3980_v19 = vpop.permute.xlu0 %3979 }
 0x549   : > { %4060 = vst.msk [vmem:[#allocation3 + $0x78] sm:$0xff] %vm1698_vm9, %v3980_v19  ;;  %v3598_v9 = vpop.permute.xlu1 %3597 }
 0x54a   : > { %3235 = vrot.lane.b32.xlu0 %v3718_v13, %s5289_s20  ;;  %3677 = vst.msk [vmem:[#allocation3 + $0x80] sm:$0xff] %vm1311_vm7, %v3598_v9 }
 0x54b   : > { %4189 = vrot.lane.b32.xlu1 %v4101_v34, %s5294_s8 }
 0x54c   : > { %v3408_v58 = vpop.permute.xlu0 %3407 }
 0x54d   : > { %3486 = vst.msk [vmem:[#allocation3 + $0x88] sm:$0xff] %vm1118_vm6, %v3408_v58  ;;  %v3600_v12 = vpop.permute.xlu1 %3599  ;;  %v4283_v46 = vld [vmem:[#allocation3 + $0x70] sm:$0xff] }
 0x54e   : > { %3999 = vrot.lane.b32.xlu0 %v3910_v18, %s5293_s7  ;;  %3678 = vst.msk [vmem:[#allocation3 + $0x88] sm:$0xff] %vm1311_vm7, %v3600_v12  ;;  %5232 = vmatprep.mubr.msk.f32.mxu1 %vm1961_vm11, %v4283_v46 }
 0x54f   : > { %3617 = vrot.lane.b32.xlu1 %v4101_v34, %s5291_s22 }
 0x550   : > { %v4172_v21 = vpop.permute.xlu0 %4171 }
 0x551   : > { %4252 = vst.msk [vmem:[#allocation3 + $0x78] sm:$0xff] %vm1891_vm10, %v4172_v21  ;;  %v3218_v51 = vpop.permute.xlu1 %3217 }
 0x552   : > { %3427 = vrot.lane.b32.xlu0 %v3910_v18, %s5290_s21  ;;  %3295 = vst.msk [vmem:[#allocation3 + $0x90] sm:$0xff] %vm925_vm4, %v3218_v51 }
 0x553   : > { %3619 = vrot.lane.b32.xlu1 %v3528_v23, %s5291_s22 }
 0x554   : > { %v3790_v35 = vpop.permute.xlu0 %3789 }
 0x555   : > { %3869 = vst.msk [vmem:[#allocation3 + $0x80] sm:$0xff] %vm1505_vm8, %v3790_v35  ;;  %v3982_v22 = vpop.permute.xlu1 %3981 }
 0x556   : > { %4191 = vrot.lane.b32.xlu0 %v3528_v23, %s5294_s8  ;;  %4061 = vst.msk [vmem:[#allocation3 + $0x80] sm:$0xff] %vm1698_vm9, %v3982_v22 }
 0x557   : > { %3237 = vrot.lane.b32.xlu1 %v3145_v14, %s5289_s20 }
 0x558   : > { %v3792_v4 = vpop.permute.xlu0 %3791  ;;  %v4284_v32 = vld [vmem:[#allocation3 + $0x78] sm:$0xff] }
 0x559   : > { %3870 = vst.msk [vmem:[#allocation3 + $0x88] sm:$0xff] %vm1505_vm8, %v3792_v4  ;;  %5233 = vmatmul.mubr.msk.f32.gmra.mxu1 %vm1961_vm11, %v4284_v32  ;;  %v3410_v40 = vpop.permute.xlu1 %3409 }
 0x55a   : > { %3809 = vrot.lane.b32.xlu0 %v3145_v14, %s5292_s4  ;;  %3487 = vst.msk [vmem:[#allocation3 + $0x90] sm:$0xff] %vm1118_vm6, %v3410_v40 }
 0x55b   : > { %4001 = vrot.lane.b32.xlu1 %v3911_v31, %s5293_s7 }
 0x55c   : > { %v3220_v3 = vpop.permute.xlu0 %3219 }
 0x55d   : > { %3296 = vst.msk [vmem:[#allocation3 + $0x98] sm:$0xff] %vm925_vm4, %v3220_v3  ;;  %v4174_v11 = vpop.permute.xlu1 %4173 }
 0x55e   : > { %3811 = vrot.lane.b32.xlu0 %v3720_v0, %s5292_s4  ;;  %4253 = vst.msk [vmem:[#allocation3 + $0x80] sm:$0xff] %vm1891_vm10, %v4174_v11 }
 0x55f   : > { %3429 = vrot.lane.b32.xlu1 %v3911_v31, %s5290_s21 }
 0x560   : > { %v3984_v60 = vpop.permute.xlu0 %3983 }
 0x561   : > { %4062 = vst.msk [vmem:[#allocation3 + $0x88] sm:$0xff] %vm1698_vm9, %v3984_v60  ;;  %v3602_v16 = vpop.permute.xlu1 %3601 }
 0x562   : > { %3239 = vrot.lane.b32.xlu0 %v3720_v0, %s5289_s20  ;;  %3679 = vst.msk [vmem:[#allocation3 + $0x90] sm:$0xff] %vm1311_vm7, %v3602_v16 }
 0x563   : > { %4193 = vrot.lane.b32.xlu1 %v4103_v25, %s5294_s8 }
 0x564   : > { %v3412_v47 = vpop.permute.xlu0 %3411 }
 0x565   : > { %3488 = vst.msk [vmem:[#allocation3 + $0x98] sm:$0xff] %vm1118_vm6, %v3412_v47  ;;  %v3604_v10 = vpop.permute.xlu1 %3603  ;;  %v4285_v17 = vld [vmem:[#allocation3 + $0x80] sm:$0xff] }
 0x566   : > { %4003 = vrot.lane.b32.xlu0 %v3912_v24, %s5293_s7  ;;  %3680 = vst.msk [vmem:[#allocation3 + $0x98] sm:$0xff] %vm1311_vm7, %v3604_v10  ;;  %5235 = vmatprep.mubr.msk.f32.mxu1 %vm1961_vm11, %v4285_v17 }
 0x567   : > { %3621 = vrot.lane.b32.xlu1 %v4103_v25, %s5291_s22 }
 0x568   : > { %v4176_v56 = vpop.permute.xlu0 %4175 }
 0x569   : > { %4254 = vst.msk [vmem:[#allocation3 + $0x88] sm:$0xff] %vm1891_vm10, %v4176_v56  ;;  %v3222_v48 = vpop.permute.xlu1 %3221 }
 0x56a   : > { %3431 = vrot.lane.b32.xlu0 %v3912_v24, %s5290_s21  ;;  %3297 = vst.msk [vmem:[#allocation3 + $0xa0] sm:$0xff] %vm925_vm4, %v3222_v48 }
 0x56b   : > { %3623 = vrot.lane.b32.xlu1 %v3530_v39, %s5291_s22 }
 0x56c   : > { %v3794_v29 = vpop.permute.xlu0 %3793 }
 0x56d   : > { %3871 = vst.msk [vmem:[#allocation3 + $0x90] sm:$0xff] %vm1505_vm8, %v3794_v29  ;;  %v3986_v2 = vpop.permute.xlu1 %3985 }
 0x56e   : > { %4195 = vrot.lane.b32.xlu0 %v3530_v39, %s5294_s8  ;;  %4063 = vst.msk [vmem:[#allocation3 + $0x90] sm:$0xff] %vm1698_vm9, %v3986_v2 }
 0x56f   : > { %3241 = vrot.lane.b32.xlu1 %v3147_v53, %s5289_s20 }
 0x570   : > { %v3796_v7 = vpop.permute.xlu0 %3795  ;;  %v4286_v61 = vld [vmem:[#allocation3 + $0x88] sm:$0xff] }
 0x571   : > { %3872 = vst.msk [vmem:[#allocation3 + $0x98] sm:$0xff] %vm1505_vm8, %v3796_v7  ;;  %5236 = vmatmul.mubr.msk.f32.gmra.mxu1 %vm1961_vm11, %v4286_v61  ;;  %v3414_v50 = vpop.permute.xlu1 %3413 }
 0x572   : > { %3813 = vrot.lane.b32.xlu0 %v3147_v53, %s5292_s4  ;;  %3489 = vst.msk [vmem:[#allocation3 + $0xa0] sm:$0xff] %vm1118_vm6, %v3414_v50 }
 0x573   : > { %4005 = vrot.lane.b32.xlu1 %v3913_v44, %s5293_s7 }
 0x574   : > { %v3224_v52 = vpop.permute.xlu0 %3223 }
 0x575   : > { %3298 = vst.msk [vmem:[#allocation3 + $0xa8] sm:$0xff] %vm925_vm4, %v3224_v52  ;;  %v4178_v43 = vpop.permute.xlu1 %4177 }
 0x576   : > { %3815 = vrot.lane.b32.xlu0 %v3722_v36, %s5292_s4  ;;  %4255 = vst.msk [vmem:[#allocation3 + $0x90] sm:$0xff] %vm1891_vm10, %v4178_v43 }
 0x577   : > { %3433 = vrot.lane.b32.xlu1 %v3913_v44, %s5290_s21 }
 0x578   : > { %v3988_v38 = vpop.permute.xlu0 %3987 }
 0x579   : > { %4064 = vst.msk [vmem:[#allocation3 + $0x98] sm:$0xff] %vm1698_vm9, %v3988_v38  ;;  %v3606_v28 = vpop.permute.xlu1 %3605 }
 0x57a   : > { %3243 = vrot.lane.b32.xlu0 %v3722_v36, %s5289_s20  ;;  %3681 = vst.msk [vmem:[#allocation3 + $0xa0] sm:$0xff] %vm1311_vm7, %v3606_v28 }
 0x57b   : > { %4197 = vrot.lane.b32.xlu1 %v4105_v37, %s5294_s8 }
 0x57c   : > { %v3416_v27 = vpop.permute.xlu0 %3415 }
 0x57d   : > { %3490 = vst.msk [vmem:[#allocation3 + $0xa8] sm:$0xff] %vm1118_vm6, %v3416_v27  ;;  %v3608_v8 = vpop.permute.xlu1 %3607  ;;  %v4287_v42 = vld [vmem:[#allocation3 + $0x90] sm:$0xff] }
 0x57e   : > { %4007 = vrot.lane.b32.xlu0 %v3914_v45, %s5293_s7  ;;  %3682 = vst.msk [vmem:[#allocation3 + $0xa8] sm:$0xff] %vm1311_vm7, %v3608_v8  ;;  %5238 = vmatprep.mubr.msk.f32.mxu1 %vm1961_vm11, %v4287_v42 }
 0x57f   : > { %3625 = vrot.lane.b32.xlu1 %v4105_v37, %s5291_s22 }
 0x580   : > { %v4180_v15 = vpop.permute.xlu0 %4179 }
 0x581   : > { %4256 = vst.msk [vmem:[#allocation3 + $0x98] sm:$0xff] %vm1891_vm10, %v4180_v15  ;;  %v3226_v55 = vpop.permute.xlu1 %3225 }
 0x582   : > { %3435 = vrot.lane.b32.xlu0 %v3914_v45, %s5290_s21  ;;  %3299 = vst.msk [vmem:[#allocation3 + $0xb0] sm:$0xff] %vm925_vm4, %v3226_v55 }
 0x583   : > { %3627 = vrot.lane.b32.xlu1 %v3532_v41, %s5291_s22  ;;  %s7961_s22 = scalar_lea.vmem %s8065_s3, %s5067_s14 }
 0x584   : > { %v3798_v26 = vpop.permute.xlu0 %3797 }
 0x585   : > { %3873 = vst.msk [vmem:[#allocation3 + $0xa0] sm:$0xff] %vm1505_vm8, %v3798_v26  ;;  %v3990_v1 = vpop.permute.xlu1 %3989 }
 0x586   : > { %4199 = vrot.lane.b32.xlu0 %v3532_v41, %s5294_s8  ;;  %4065 = vst.msk [vmem:[#allocation3 + $0xa0] sm:$0xff] %vm1698_vm9, %v3990_v1 }
 0x587   : > { %3819 = vrot.lane.b32.xlu1 %v3724_v49, %s5292_s4 }
 0x588   : > { %v3800_v20 = vpop.permute.xlu0 %3799  ;;  %v4288_v54 = vld [vmem:[#allocation3 + $0x98] sm:$0xff] }
 0x589   : > { %3874 = vst.msk [vmem:[#allocation3 + $0xa8] sm:$0xff] %vm1505_vm8, %v3800_v20  ;;  %5239 = vmatmul.mubr.msk.f32.gmra.mxu1 %vm1961_vm11, %v4288_v54  ;;  %v3418_v57 = vpop.permute.xlu1 %3417 }
 0x58a   : > { %3817 = vrot.lane.b32.xlu0 %v3723_v6, %s5292_s4  ;;  %3491 = vst.msk [vmem:[#allocation3 + $0xb0] sm:$0xff] %vm1118_vm6, %v3418_v57 }
 0x58b   : > { %4011 = vrot.lane.b32.xlu1 %v3916_v33, %s5293_s7 }
 0x58c   : > { %v3228_v62 = vpop.permute.xlu0 %3227 }
 0x58d   : > { %3300 = vst.msk [vmem:[#allocation3 + $0xb8] sm:$0xff] %vm925_vm4, %v3228_v62  ;;  %v4182_v5 = vpop.permute.xlu1 %4181 }
 0x58e   : > { %4009 = vrot.lane.b32.xlu0 %v3915_v59, %s5293_s7  ;;  %4257 = vst.msk [vmem:[#allocation3 + $0xa0] sm:$0xff] %vm1891_vm10, %v4182_v5 }
 0x58f   : > { %4203 = vrot.lane.b32.xlu1 %v4108_v63, %s5294_s8 }
 0x590   : > { %v3992_v13 = vpop.permute.xlu0 %3991 }
 0x591   : > { %4066 = vst.msk [vmem:[#allocation3 + $0xa8] sm:$0xff] %vm1698_vm9, %v3992_v13  ;;  %v3610_v19 = vpop.permute.xlu1 %3609 }
 0x592   : > { %4201 = vrot.lane.b32.xlu0 %v4107_v30, %s5294_s8  ;;  %3683 = vst.msk [vmem:[#allocation3 + $0xb0] sm:$0xff] %vm1311_vm7, %v3610_v19 }
 0x594   : > { %v3420_v9 = vpop.permute.xlu0 %3419 }
 0x595   : > { %3492 = vst.msk [vmem:[#allocation3 + $0xb8] sm:$0xff] %vm1118_vm6, %v3420_v9  ;;  %v3612_v34 = vpop.permute.xlu1 %3611  ;;  %v4289_v58 = vld [vmem:[#allocation3 + $0xa0] sm:$0xff] }
 0x596   : > { %3684 = vst.msk [vmem:[#allocation3 + $0xb8] sm:$0xff] %vm1311_vm7, %v3612_v34  ;;  %5241 = vmatprep.mubr.msk.f32.mxu1 %vm1961_vm11, %v4289_v58 }
 0x598   : > { %v4184_v18 = vpop.permute.xlu0 %4183 }
 0x599   : > { %4258 = vst.msk [vmem:[#allocation3 + $0xa8] sm:$0xff] %vm1891_vm10, %v4184_v18  ;;  %v3230_v12 = vpop.permute.xlu1 %3229 }
 0x59a   : > { %3301 = vst.msk [vmem:[#allocation3 + $0xc0] sm:$0xff] %vm925_vm4, %v3230_v12 }
 0x59c   : > { %v3802_v46 = vpop.permute.xlu0 %3801 }
 0x59d   : > { %3875 = vst.msk [vmem:[#allocation3 + $0xb0] sm:$0xff] %vm1505_vm8, %v3802_v46  ;;  %v3994_v21 = vpop.permute.xlu1 %3993  ;;  %v7664_v46 = vpop.f32.mrf.mxu1 }
 0x59e   : > { %4067 = vst.msk [vmem:[#allocation3 + $0xb0] sm:$0xff] %vm1698_vm9, %v3994_v21 }
 0x59f   : > { %v7666_v21 = vpop.f32.mrf.mxu1 }
 0x5a0   : > { %v3804_v51 = vpop.permute.xlu0 %3803  ;;  %v4290_v23 = vld [vmem:[#allocation3 + $0xa8] sm:$0xff] }
 0x5a1   : > { %3876 = vst.msk [vmem:[#allocation3 + $0xb8] sm:$0xff] %vm1505_vm8, %v3804_v51  ;;  %5242 = vmatmul.mubr.msk.f32.gmra.mxu1 %vm1961_vm11, %v4290_v23  ;;  %v3422_v35 = vpop.permute.xlu1 %3421  ;;  %v7668_v51 = vpop.f32.mrf.mxu1 }
 0x5a2   : > { %3493 = vst.msk [vmem:[#allocation3 + $0xc0] sm:$0xff] %vm1118_vm6, %v3422_v35  ;;  %v4699_v35 = vmul.f32 %v7666_v21, %v7666_v21 }
 0x5a3   : > { %v7670_v23 = vpop.f32.mrf.mxu1 }
 0x5a4   : > { %v3232_v22 = vpop.permute.xlu0 %3231 }
 0x5a5   : > { %3302 = vst.msk [vmem:[#allocation3 + $0xc8] sm:$0xff] %vm925_vm4, %v3232_v22  ;;  %v4186_v14 = vpop.permute.xlu1 %4185  ;;  %v7674_v22 = vpop.f32.mrf.mxu1 }
 0x5a6   : > { %4259 = vst.msk [vmem:[#allocation3 + $0xb0] sm:$0xff] %vm1891_vm10, %v4186_v14  ;;  %v4700_v14 = vmul.f32 %v7664_v46, %v7664_v46 }
 0x5a8   : > { %v3996_v4 = vpop.permute.xlu0 %3995 }
 0x5a9   : > { %4068 = vst.msk [vmem:[#allocation3 + $0xb8] sm:$0xff] %vm1698_vm9, %v3996_v4  ;;  %v3614_v32 = vpop.permute.xlu1 %3613  ;;  %v4630_v4 = vsel %vm204_vm0, %v7666_v21, 0.0 }
 0x5aa   : > { %3685 = vst.msk [vmem:[#allocation3 + $0xc0] sm:$0xff] %vm1311_vm7, %v3614_v32  ;;  %v4701_v32 = vmul.f32 %v7670_v23, %v7670_v23 }
 0x5ac   : > { %v3424_v40 = vpop.permute.xlu0 %3423 }
 0x5ad   : > { %3494 = vst.msk [vmem:[#allocation3 + $0xc8] sm:$0xff] %vm1118_vm6, %v3424_v40  ;;  %v3616_v31 = vpop.permute.xlu1 %3615  ;;  %v4291_v3 = vld [vmem:[#allocation3 + $0xb0] sm:$0xff]  ;;  %v4631_v40 = vsel %vm204_vm0, %v7664_v46, 0.0 }
 0x5ae   : > { %3686 = vst.msk [vmem:[#allocation3 + $0xc8] sm:$0xff] %vm1311_vm7, %v3616_v31  ;;  %5244 = vmatprep.mubr.msk.f32.mxu1 %vm1961_vm11, %v4291_v3  ;;  %v4731_v31 = vsel %vm204_vm0, %v4699_v35, 0.0  ;;  %v4633_v3 = vsel %vm204_vm0, %v7670_v23, 0.0 }
 0x5b0   : > { %v4188_v0 = vpop.permute.xlu0 %4187 }
 0x5b1   : > { %4260 = vst.msk [vmem:[#allocation3 + $0xb8] sm:$0xff] %vm1891_vm10, %v4188_v0  ;;  %v3234_v11 = vpop.permute.xlu1 %3233  ;;  %v4632_v0 = vadd.f32 %v4631_v40, %v4630_v4 }
 0x5b2   : > { %3303 = vst.msk [vmem:[#allocation3 + $0xd0] sm:$0xff] %vm925_vm4, %v3234_v11  ;;  %v7687_v11 = vpop.f32.mrf.mxu1 }
 0x5b4   : > { %v3806_v60 = vpop.permute.xlu0 %3805 }
 0x5b5   : > { %3877 = vst.msk [vmem:[#allocation3 + $0xc0] sm:$0xff] %vm1505_vm8, %v3806_v60  ;;  %v3998_v16 = vpop.permute.xlu1 %3997  ;;  %v4732_v60 = vsel %vm204_vm0, %v4700_v14, 0.0 }
 0x5b6   : > { %4069 = vst.msk [vmem:[#allocation3 + $0xc0] sm:$0xff] %vm1698_vm9, %v3998_v16  ;;  %v4734_v16 = vsel %vm204_vm0, %v4701_v32, 0.0 }
 0x5b8   : > { %v3808_v25 = vpop.permute.xlu0 %3807  ;;  %v4292_v47 = vld [vmem:[#allocation3 + $0xb8] sm:$0xff] }
 0x5b9   : > { %3878 = vst.msk [vmem:[#allocation3 + $0xc8] sm:$0xff] %vm1505_vm8, %v3808_v25  ;;  %5245 = vmatmul.mubr.msk.f32.gmra.mxu1 %vm1961_vm11, %v4292_v47  ;;  %v3426_v24 = vpop.permute.xlu1 %3425  ;;  %v4733_v25 = vadd.f32 %v4732_v60, %v4731_v31  ;;  %v4634_v47 = vadd.f32 %v4633_v3, %v4632_v0 }
 0x5ba   : > { %3495 = vst.msk [vmem:[#allocation3 + $0xd0] sm:$0xff] %vm1118_vm6, %v3426_v24  ;;  %v7691_v24 = vpop.f32.mrf.mxu1 }
 0x5bc   : > { %v3236_v10 = vpop.permute.xlu0 %3235 }
 0x5bd   : > { %3304 = vst.msk [vmem:[#allocation3 + $0xd8] sm:$0xff] %vm925_vm4, %v3236_v10  ;;  %v4190_v17 = vpop.permute.xlu1 %4189  ;;  %v4702_v10 = vmul.f32 %v7668_v51, %v7668_v51 }
 0x5be   : > { %4261 = vst.msk [vmem:[#allocation3 + $0xc0] sm:$0xff] %vm1891_vm10, %v4190_v17  ;;  %v4703_v17 = vmul.f32 %v7687_v11, %v7687_v11 }
 0x5c0   : > { %v4000_v56 = vpop.permute.xlu0 %3999 }
 0x5c1   : > { %4070 = vst.msk [vmem:[#allocation3 + $0xc8] sm:$0xff] %vm1698_vm9, %v4000_v56  ;;  %v3618_v48 = vpop.permute.xlu1 %3617  ;;  %v4735_v56 = vadd.f32 %v4734_v16, %v4733_v25 }
 0x5c2   : > { %3687 = vst.msk [vmem:[#allocation3 + $0xd0] sm:$0xff] %vm1311_vm7, %v3618_v48  ;;  %v4635_v48 = vsel %vm204_vm0, %v7668_v51, 0.0 }
 0x5c4   : > { %v3428_v39 = vpop.permute.xlu0 %3427 }
 0x5c5   : > { %3496 = vst.msk [vmem:[#allocation3 + $0xd8] sm:$0xff] %vm1118_vm6, %v3428_v39  ;;  %v3620_v29 = vpop.permute.xlu1 %3619  ;;  %v4293_v2 = vld [vmem:[#allocation3 + $0xc0] sm:$0xff]  ;;  %v4637_v39 = vsel %vm204_vm0, %v7687_v11, 0.0 }
 0x5c6   : > { %3688 = vst.msk [vmem:[#allocation3 + $0xd8] sm:$0xff] %vm1311_vm7, %v3620_v29  ;;  %5247 = vmatprep.mubr.msk.f32.mxu1 %vm1961_vm11, %v4293_v2  ;;  %v4636_v29 = vadd.f32 %v4635_v48, %v4634_v47  ;;  %v7701_v2 = vpop.f32.mrf.mxu1 }
 0x5c8   : > { %v4192_v53 = vpop.permute.xlu0 %4191 }
 0x5c9   : > { %4262 = vst.msk [vmem:[#allocation3 + $0xc8] sm:$0xff] %vm1891_vm10, %v4192_v53  ;;  %v3238_v7 = vpop.permute.xlu1 %3237  ;;  %v4736_v53 = vsel %vm204_vm0, %v4702_v10, 0.0 }
 0x5ca   : > { %3305 = vst.msk [vmem:[#allocation3 + $0xe0] sm:$0xff] %vm925_vm4, %v3238_v7  ;;  %v4738_v7 = vsel %vm204_vm0, %v4703_v17, 0.0 }
 0x5cc   : > { %v3810_v61 = vpop.permute.xlu0 %3809 }
 0x5cd   : > { %3879 = vst.msk [vmem:[#allocation3 + $0xd0] sm:$0xff] %vm1505_vm8, %v3810_v61  ;;  %v4002_v50 = vpop.permute.xlu1 %4001  ;;  %v4638_v61 = vadd.f32 %v4637_v39, %v4636_v29 }
 0x5ce   : > { %4071 = vst.msk [vmem:[#allocation3 + $0xd0] sm:$0xff] %vm1698_vm9, %v4002_v50  ;;  %v4737_v50 = vadd.f32 %v4736_v53, %v4735_v56 }
 0x5d0   : > { %v3812_v44 = vpop.permute.xlu0 %3811  ;;  %v4294_v52 = vld [vmem:[#allocation3 + $0xc8] sm:$0xff] }
 0x5d1   : > { %3880 = vst.msk [vmem:[#allocation3 + $0xd8] sm:$0xff] %vm1505_vm8, %v3812_v44  ;;  %5248 = vmatmul.mubr.msk.f32.gmra.mxu1 %vm1961_vm11, %v4294_v52  ;;  %v3430_v36 = vpop.permute.xlu1 %3429  ;;  %v7705_v44 = vpop.f32.mrf.mxu1  ;;  %v4704_v52 = vmul.f32 %v7674_v22, %v7674_v22 }
 0x5d2   : > { %3497 = vst.msk [vmem:[#allocation3 + $0xe0] sm:$0xff] %vm1118_vm6, %v3430_v36  ;;  %v4705_v36 = vmul.f32 %v7701_v2, %v7701_v2 }
 0x5d4   : > { %v3240_v43 = vpop.permute.xlu0 %3239 }
 0x5d5   : > { %3306 = vst.msk [vmem:[#allocation3 + $0xe8] sm:$0xff] %vm925_vm4, %v3240_v43  ;;  %v4194_v38 = vpop.permute.xlu1 %4193  ;;  %v4739_v43 = vadd.f32 %v4738_v7, %v4737_v50 }
 0x5d6   : > { %4263 = vst.msk [vmem:[#allocation3 + $0xd0] sm:$0xff] %vm1891_vm10, %v4194_v38  ;;  %v4639_v38 = vsel %vm204_vm0, %v7674_v22, 0.0 }
 0x5d8   : > { %v4004_v28 = vpop.permute.xlu0 %4003 }
 0x5d9   : > { %4072 = vst.msk [vmem:[#allocation3 + $0xd8] sm:$0xff] %vm1698_vm9, %v4004_v28  ;;  %v3622_v37 = vpop.permute.xlu1 %3621  ;;  %v4641_v28 = vsel %vm204_vm0, %v7701_v2, 0.0 }
 0x5da   : > { %3689 = vst.msk [vmem:[#allocation3 + $0xe0] sm:$0xff] %vm1311_vm7, %v3622_v37  ;;  %v4640_v37 = vadd.f32 %v4639_v38, %v4638_v61 }
 0x5dc   : > { %v3432_v27 = vpop.permute.xlu0 %3431 }
 0x5dd   : > { %3498 = vst.msk [vmem:[#allocation3 + $0xe8] sm:$0xff] %vm1118_vm6, %v3432_v27  ;;  %v3624_v45 = vpop.permute.xlu1 %3623  ;;  %v4295_v8 = vld [vmem:[#allocation3 + $0xd0] sm:$0xff]  ;;  %v7715_v27 = vpop.f32.mrf.mxu1 }
 0x5de   : > { %3690 = vst.msk [vmem:[#allocation3 + $0xe8] sm:$0xff] %vm1311_vm7, %v3624_v45  ;;  %5250 = vmatprep.mubr.msk.f32.mxu1 %vm1961_vm11, %v4295_v8  ;;  %v4740_v45 = vsel %vm204_vm0, %v4704_v52, 0.0  ;;  %v4742_v8 = vsel %vm204_vm0, %v4705_v36, 0.0 }
 0x5e0   : > { %v4196_v42 = vpop.permute.xlu0 %4195 }
 0x5e1   : > { %4264 = vst.msk [vmem:[#allocation3 + $0xd8] sm:$0xff] %vm1891_vm10, %v4196_v42  ;;  %v3242_v15 = vpop.permute.xlu1 %3241  ;;  %v4642_v42 = vadd.f32 %v4641_v28, %v4640_v37 }
 0x5e2   : > { %3307 = vst.msk [vmem:[#allocation3 + $0xf0] sm:$0xff] %vm925_vm4, %v3242_v15  ;;  %v4741_v15 = vadd.f32 %v4740_v45, %v4739_v43 }
 0x5e4   : > { %v3814_v55 = vpop.permute.xlu0 %3813 }
 0x5e5   : > { %3881 = vst.msk [vmem:[#allocation3 + $0xe0] sm:$0xff] %vm1505_vm8, %v3814_v55  ;;  %v4006_v41 = vpop.permute.xlu1 %4005 }
 0x5e6   : > { %4073 = vst.msk [vmem:[#allocation3 + $0xe0] sm:$0xff] %vm1698_vm9, %v4006_v41  ;;  %v4706_v41 = vmul.f32 %v7691_v24, %v7691_v24 }
 0x5e8   : > { %v3816_v26 = vpop.permute.xlu0 %3815  ;;  %v4296_v1 = vld [vmem:[#allocation3 + $0xd8] sm:$0xff] }
 0x5e9   : > { %3882 = vst.msk [vmem:[#allocation3 + $0xe8] sm:$0xff] %vm1505_vm8, %v3816_v26  ;;  %5251 = vmatmul.mubr.msk.f32.gmra.mxu1 %vm1961_vm11, %v4296_v1  ;;  %v3434_v49 = vpop.permute.xlu1 %3433  ;;  %v7719_v55 = vpop.f32.mrf.mxu1  ;;  %v4707_v26 = vmul.f32 %v7715_v27, %v7715_v27  ;;  %v4743_v1 = vadd.f32 %v4742_v8, %v4741_v15 }
 0x5ea   : > { %3499 = vst.msk [vmem:[#allocation3 + $0xf0] sm:$0xff] %vm1118_vm6, %v3434_v49  ;;  %v4643_v49 = vsel %vm204_vm0, %v7691_v24, 0.0  ;;  %v4710_v32 = vmul.f32 %v7719_v55, %v7719_v55  ;;  %v4651_v3 = vsel %vm204_vm0, %v7719_v55, 0.0 }
 0x5ec   : > { %v3244_v20 = vpop.permute.xlu0 %3243  ;;  %v4752_v25 = vsel %vm204_vm0, %v4710_v32, 0.0 }
 0x5ed   : > { %3308 = vst.msk [vmem:[#allocation3 + $0xf8] sm:$0xff] %vm925_vm4, %v3244_v20  ;;  %v4198_v54 = vpop.permute.xlu1 %4197  ;;  %v4645_v20 = vsel %vm204_vm0, %v7715_v27, 0.0 }
 0x5ee   : > { %4265 = vst.msk [vmem:[#allocation3 + $0xe0] sm:$0xff] %vm1891_vm10, %v4198_v54  ;;  %v4644_v54 = vadd.f32 %v4643_v49, %v4642_v42 }
 0x5f0   : > { %v4008_v6 = vpop.permute.xlu0 %4007 }
 0x5f1   : > { %4074 = vst.msk [vmem:[#allocation3 + $0xe8] sm:$0xff] %vm1698_vm9, %v4008_v6  ;;  %v3626_v57 = vpop.permute.xlu1 %3625  ;;  %v7729_v6 = vpop.f32.mrf.mxu1 }
 0x5f2   : > { %3691 = vst.msk [vmem:[#allocation3 + $0xf0] sm:$0xff] %vm1311_vm7, %v3626_v57  ;;  %v4744_v57 = vsel %vm204_vm0, %v4706_v41, 0.0 }
 0x5f4   : > { %v3436_v33 = vpop.permute.xlu0 %3435 }
 0x5f5   : > { %3500 = vst.msk [vmem:[#allocation3 + $0xf8] sm:$0xff] %vm1118_vm6, %v3436_v33  ;;  %v3628_v62 = vpop.permute.xlu1 %3627  ;;  %v4297_v59 = vld [vmem:[#allocation3 + $0xe0] sm:$0xff]  ;;  %v4746_v33 = vsel %vm204_vm0, %v4707_v26, 0.0 }
 0x5f6   : > { %3692 = vst.msk [vmem:[#allocation3 + $0xf8] sm:$0xff] %vm1311_vm7, %v3628_v62  ;;  %5253 = vmatprep.mubr.msk.f32.mxu1 %vm1961_vm11, %v4297_v59  ;;  %v4646_v62 = vadd.f32 %v4645_v20, %v4644_v54  ;;  %v4745_v59 = vadd.f32 %v4744_v57, %v4743_v1 }
 0x5f8   : > { %v4200_v5 = vpop.permute.xlu0 %4199 }
 0x5f9   : > { %4266 = vst.msk [vmem:[#allocation3 + $0xe8] sm:$0xff] %vm1891_vm10, %v4200_v5  ;;  %v3820_v63 = vpop.permute.xlu1 %3819 }
 0x5fa   : > { %3884 = vst.msk [vmem:[#allocation3 + $0xf8] sm:$0xff] %vm1505_vm8, %v3820_v63  ;;  %v4708_v63 = vmul.f32 %v7705_v44, %v7705_v44 }
 0x5fc   : > { %v3818_v13 = vpop.permute.xlu0 %3817 }
 0x5fd   : > { %3883 = vst.msk [vmem:[#allocation3 + $0xf0] sm:$0xff] %vm1505_vm8, %v3818_v13  ;;  %v4012_v30 = vpop.permute.xlu1 %4011  ;;  %v4709_v13 = vmul.f32 %v7729_v6, %v7729_v6 }
 0x5fe   : > { %4076 = vst.msk [vmem:[#allocation3 + $0xf8] sm:$0xff] %vm1698_vm9, %v4012_v30  ;;  %v4747_v30 = vadd.f32 %v4746_v33, %v4745_v59 }
 0x600   : > { %v4010_v19 = vpop.permute.xlu0 %4009  ;;  %v4298_v9 = vld [vmem:[#allocation3 + $0xe8] sm:$0xff] }
 0x601   : > { %4075 = vst.msk [vmem:[#allocation3 + $0xf0] sm:$0xff] %vm1698_vm9, %v4010_v19  ;;  %5254 = vmatmul.mubr.msk.f32.gmra.mxu1 %vm1961_vm11, %v4298_v9  ;;  %v4204_v34 = vpop.permute.xlu1 %4203  ;;  %v7733_v5 = vpop.f32.mrf.mxu1  ;;  %v4647_v19 = vsel %vm204_vm0, %v7705_v44, 0.0  ;;  %v4649_v9 = vsel %vm204_vm0, %v7729_v6, 0.0 }
 0x602   : > { %4268 = vst.msk [vmem:[#allocation3 + $0xf8] sm:$0xff] %vm1891_vm10, %v4204_v34  ;;  %v4648_v34 = vadd.f32 %v4647_v19, %v4646_v62  ;;  %v4712_v48 = vmul.f32 %v7733_v5, %v7733_v5  ;;  %v4655_v53 = vsel %vm204_vm0, %v7733_v5, 0.0 }
 0x604   : > { %v4202_v58 = vpop.permute.xlu0 %4201  ;;  %v4650_v35 = vadd.f32 %v4649_v9, %v4648_v34  ;;  %v4756_v52 = vsel %vm204_vm0, %v4712_v48, 0.0 }
 0x605   : > { %4267 = vst.msk [vmem:[#allocation3 + $0xf0] sm:$0xff] %vm1891_vm10, %v4202_v58  ;;  %v7743_v58 = vpop.f32.mrf.mxu1 }
 0x606   : > { %v4711_v40 = vmul.f32 %v7743_v58, %v7743_v58  ;;  %v4653_v0 = vsel %vm204_vm0, %v7743_v58, 0.0  ;;  %v4652_v60 = vadd.f32 %v4651_v3, %v4650_v35 }
 0x608   : > { %v4754_v47 = vsel %vm204_vm0, %v4711_v40, 0.0  ;;  %v4654_v10 = vadd.f32 %v4653_v0, %v4652_v60 }
 0x609   : > { %v4300_v18 = vld [vmem:[#allocation3 + $0xf8] sm:$0xff] }
 0x60a   : > { %v4656_v61 = vadd.f32 %v4655_v53, %v4654_v10 }
 0x60c   : > { %v4299_v12 = vld [vmem:[#allocation3 + $0xf0] sm:$0xff] }
 0x60d   : > { %5256 = vmatprep.mubr.msk.f32.mxu1 %vm1961_vm11, %v4299_v12  ;;  %v4750_v12 = vsel %vm204_vm0, %v4709_v13, 0.0 }
 0x60e   : > { %5257 = vmatmul.mubr.msk.f32.gmra.mxu1 %vm1961_vm11, %v4300_v18  ;;  %v4748_v18 = vsel %vm204_vm0, %v4708_v63, 0.0 }
 0x60f   : > { %v4749_v14 = vadd.f32 %v4748_v18, %v4747_v30 }
 0x611   : > { %v4751_v31 = vadd.f32 %v4750_v12, %v4749_v14 }
 0x613   : > { %v4753_v17 = vadd.f32 %v4752_v25, %v4751_v31 }
 0x615   : > { %v4755_v29 = vadd.f32 %v4754_v47, %v4753_v17 }
 0x617   : > { %v4757_v38 = vadd.f32 %v4756_v52, %v4755_v29 }
 0x619   : > { %v7747_v4 = vpop.f32.mrf.mxu1 }
 0x61a   : > { %v4714_v37 = vmul.f32 %v7747_v4, %v7747_v4  ;;  %v4659_v42 = vsel %vm204_vm0, %v7747_v4, 0.0 }
 0x61b   : > { %v7757_v16 = vpop.f32.mrf.mxu1 }
 0x61c   : > { %v4713_v39 = vmul.f32 %v7757_v16, %v7757_v16  ;;  %v4657_v7 = vsel %vm204_vm0, %v7757_v16, 0.0  ;;  %v4760_v1 = vsel %vm204_vm0, %v4714_v37, 0.0 }
 0x61d   : > { %v4658_v43 = vadd.f32 %v4657_v7, %v4656_v61 }
 0x61e   : > { %v4758_v36 = vsel %vm204_vm0, %v4713_v39, 0.0 }
 0x61f   : > { %v4759_v8 = vadd.f32 %v4758_v36, %v4757_v38  ;;  %v4660_v41 = vadd.f32 %v4659_v42, %v4658_v43 }
 0x621   : > { %v4761_v54 = vadd.f32 %v4760_v1, %v4759_v8 }
 0x631   : > { %v7761_v56 = vpop.f32.mrf.mxu1 }
 0x632   : > { %v4716_v33 = vmul.f32 %v7761_v56, %v7761_v56  ;;  %v4663_v63 = vsel %vm204_vm0, %v7761_v56, 0.0 }
 0x633   : > { %v7771_v50 = vpop.f32.mrf.mxu1 }
 0x634   : > { %v4715_v45 = vmul.f32 %v7771_v50, %v7771_v50  ;;  %v4661_v15 = vsel %vm204_vm0, %v7771_v50, 0.0  ;;  %v4764_v9 = vsel %vm204_vm0, %v4716_v33, 0.0 }
 0x635   : > { %v4662_v20 = vadd.f32 %v4661_v15, %v4660_v41 }
 0x636   : > { %v4762_v49 = vsel %vm204_vm0, %v4715_v45, 0.0 }
 0x637   : > { %v4763_v59 = vadd.f32 %v4762_v49, %v4761_v54  ;;  %v4664_v30 = vadd.f32 %v4663_v63, %v4662_v20 }
 0x639   : > { %v4765_v12 = vadd.f32 %v4764_v9, %v4763_v59 }
 0x649   : > { %v7775_v28 = vpop.f32.mrf.mxu1 }
 0x64a   : > { %v4718_v14 = vmul.f32 %v7775_v28, %v7775_v28  ;;  %v4667_v31 = vsel %vm204_vm0, %v7775_v28, 0.0 }
 0x64b   : > { %v7785_v26 = vpop.f32.mrf.mxu1 }
 0x64c   : > { %v4717_v62 = vmul.f32 %v7785_v26, %v7785_v26  ;;  %v4665_v13 = vsel %vm204_vm0, %v7785_v26, 0.0  ;;  %v4768_v25 = vsel %vm204_vm0, %v4718_v14, 0.0 }
 0x64d   : > { %v4666_v18 = vadd.f32 %v4665_v13, %v4664_v30 }
 0x64e   : > { %v4766_v34 = vsel %vm204_vm0, %v4717_v62, 0.0 }
 0x64f   : > { %v4767_v40 = vadd.f32 %v4766_v34, %v4765_v12  ;;  %v4668_v0 = vadd.f32 %v4667_v31, %v4666_v18 }
 0x651   : > { %v4769_v17 = vadd.f32 %v4768_v25, %v4767_v40 }
 0x661   : > { %v7789_v57 = vpop.f32.mrf.mxu1 }
 0x662   : > { %v4720_v39 = vmul.f32 %v7789_v57, %v7789_v57  ;;  %v4671_v7 = vsel %vm204_vm0, %v7789_v57, 0.0 }
 0x663   : > { %v7799_v19 = vpop.f32.mrf.mxu1 }
 0x664   : > { %v4719_v32 = vmul.f32 %v7799_v19, %v7799_v19  ;;  %v4669_v3 = vsel %vm204_vm0, %v7799_v19, 0.0  ;;  %v4772_v43 = vsel %vm204_vm0, %v4720_v39, 0.0 }
 0x665   : > { %v4670_v10 = vadd.f32 %v4669_v3, %v4668_v0 }
 0x666   : > { %v4770_v47 = vsel %vm204_vm0, %v4719_v32, 0.0 }
 0x667   : > { %v4771_v53 = vadd.f32 %v4770_v47, %v4769_v17  ;;  %v4672_v52 = vadd.f32 %v4671_v7, %v4670_v10 }
 0x669   : > { %v4773_v45 = vadd.f32 %v4772_v43, %v4771_v53 }
 0x679   : > { %v7803_v35 = vpop.f32.mrf.mxu1 }
 0x67a   : > { %v4722_v42 = vmul.f32 %v7803_v35, %v7803_v35  ;;  %v4675_v1 = vsel %vm204_vm0, %v7803_v35, 0.0 }
 0x67b   : > { %v7813_v60 = vpop.f32.mrf.mxu1 }
 0x67c   : > { %v4721_v29 = vmul.f32 %v7813_v60, %v7813_v60  ;;  %v4673_v61 = vsel %vm204_vm0, %v7813_v60, 0.0  ;;  %v4776_v33 = vsel %vm204_vm0, %v4722_v42, 0.0 }
 0x67d   : > { %v4674_v37 = vadd.f32 %v4673_v61, %v4672_v52 }
 0x67e   : > { %v4774_v38 = vsel %vm204_vm0, %v4721_v29, 0.0 }
 0x67f   : > { %v4775_v41 = vadd.f32 %v4774_v38, %v4773_v45  ;;  %v4676_v20 = vadd.f32 %v4675_v1, %v4674_v37 }
 0x681   : > { %v4777_v63 = vadd.f32 %v4776_v33, %v4775_v41 }
 0x691   : > { %v7817_v48 = vpop.f32.mrf.mxu1 }
 0x692   : > { %v4724_v13 = vmul.f32 %v7817_v48, %v7817_v48  ;;  %v4679_v18 = vsel %vm204_vm0, %v7817_v48, 0.0 }
 0x693   : > { %v7827_v36 = vpop.f32.mrf.mxu1 }
 0x694   : > { %v4723_v15 = vmul.f32 %v7827_v36, %v7827_v36  ;;  %v4677_v49 = vsel %vm204_vm0, %v7827_v36, 0.0  ;;  %v4780_v40 = vsel %vm204_vm0, %v4724_v13, 0.0 }
 0x695   : > { %v4678_v59 = vadd.f32 %v4677_v49, %v4676_v20 }
 0x696   : > { %v4778_v62 = vsel %vm204_vm0, %v4723_v15, 0.0 }
 0x697   : > { %v4779_v34 = vadd.f32 %v4778_v62, %v4777_v63  ;;  %v4680_v14 = vadd.f32 %v4679_v18, %v4678_v59 }
 0x699   : > { %v4781_v0 = vadd.f32 %v4780_v40, %v4779_v34 }
 0x6a9   : > { %v7831_v8 = vpop.f32.mrf.mxu1 }
 0x6aa   : > { %v4726_v25 = vmul.f32 %v7831_v8, %v7831_v8  ;;  %v4683_v17 = vsel %vm204_vm0, %v7831_v8, 0.0 }
 0x6ab   : > { %v7841_v54 = vpop.f32.mrf.mxu1 }
 0x6ac   : > { %v4725_v30 = vmul.f32 %v7841_v54, %v7841_v54  ;;  %v4681_v12 = vsel %vm204_vm0, %v7841_v54, 0.0  ;;  %v4784_v53 = vsel %vm204_vm0, %v4726_v25, 0.0 }
 0x6ad   : > { %v4682_v3 = vadd.f32 %v4681_v12, %v4680_v14 }
 0x6ae   : > { %v4782_v31 = vsel %vm204_vm0, %v4725_v30, 0.0 }
 0x6af   : > { %v4783_v10 = vadd.f32 %v4782_v31, %v4781_v0  ;;  %v4684_v29 = vadd.f32 %v4683_v17, %v4682_v3 }
 0x6b1   : > { %v4785_v52 = vadd.f32 %v4784_v53, %v4783_v10 }
 0x6c1   : > { %v7849_v9 = vpop.f32.mrf.mxu1 }
 0x6c2   : > { %v4728_v43 = vmul.f32 %v7849_v9, %v7849_v9  ;;  %v4687_v45 = vsel %vm204_vm0, %v7849_v9, 0.0 }
 0x6c3   : > { %v7855_v32 = vpop.f32.mrf.mxu1 }
 0x6c4   : > { %v4727_v47 = vmul.f32 %v7855_v32, %v7855_v32  ;;  %v4685_v39 = vsel %vm204_vm0, %v7855_v32, 0.0  ;;  %v4788_v41 = vsel %vm204_vm0, %v4728_v43, 0.0 }
 0x6c5   : > { %v4686_v61 = vadd.f32 %v4685_v39, %v4684_v29 }
 0x6c6   : > { %v4786_v7 = vsel %vm204_vm0, %v4727_v47, 0.0 }
 0x6c7   : > { %v4787_v38 = vadd.f32 %v4786_v7, %v4785_v52  ;;  %v4688_v15 = vadd.f32 %v4687_v45, %v4686_v61 }
 0x6c9   : > { %v4789_v62 = vadd.f32 %v4788_v41, %v4787_v38 }
 0x6ce   : > { %v7871_v37 = vpop.f32.mrf.mxu1 }
 0x6cf   : > { %v4730_v1 = vmul.f32 %v7871_v37, %v7871_v37  ;;  %v4691_v59 = vsel %vm204_vm0, %v7871_v37, 0.0 }
 0x6d0   : > { %v7875_v42 = vpop.f32.mrf.mxu1 }
 0x6d1   : > { %v4689_v49 = vsel %vm204_vm0, %v7875_v42, 0.0  ;;  %v4729_v20 = vmul.f32 %v7875_v42, %v7875_v42  ;;  %v4792_v34 = vsel %vm204_vm0, %v4730_v1, 0.0 }
 0x6d2   : > { %v4690_v33 = vadd.f32 %v4689_v49, %v4688_v15 }
 0x6d3   : > { %v4790_v63 = vsel %vm204_vm0, %v4729_v20, 0.0 }
 0x6d4   : > { %v4692_v13 = vadd.f32 %v4691_v59, %v4690_v33  ;;  %v4791_v30 = vadd.f32 %v4790_v63, %v4789_v62 }
 0x6d6   : > { %v4693_v18 = vrot.slane %v4692_v13, 4  ;;  %v4793_v12 = vadd.f32 %v4792_v34, %v4791_v30 }
 0x6d8   : > { %v4694_v14 = vadd.f32 %v4693_v18, %v4692_v13  ;;  %v4794_v40 = vrot.slane %v4793_v12, 4 }
 0x6da   : > { %v4695_v31 = vrot.slane %v4694_v14, 2  ;;  %v4795_v3 = vadd.f32 %v4794_v40, %v4793_v12 }
 0x6dc   : > { %v4696_v0 = vadd.f32 %v4695_v31, %v4694_v14  ;;  %v4796_v25 = vrot.slane %v4795_v3, 2 }
 0x6de   : > { %v4697_v47 = vrot.slane %v4696_v0, 1  ;;  %v4797_v10 = vadd.f32 %v4796_v25, %v4795_v3 }
 0x6e0   : > { %v4698_v17 = vadd.f32 %v4697_v47, %v4696_v0  ;;  %v4798_v39 = vrot.slane %v4797_v10, 1 }
 0x6e2   : > { %v4799_v29 = vadd.f32 %v4798_v39, %v4797_v10  ;;  %v7888_v53 = vmul.f32 0.00390625, %v4698_v17 }
 0x6e4   : > { %v4801_v7 = vmul.f32 0.00390625, %v4799_v29  ;;  %v4802_v61 = vmul.f32 %v7888_v53, %v7888_v53  ;;  %v4807_v45 = vsub.f32 %v7666_v21, %v7888_v53  ;;  %v4808_v15 = vsub.f32 %v7664_v46, %v7888_v53 }
 0x6e5   : > { %v4809_v41 = vsub.f32 %v7670_v23, %v7888_v53  ;;  %v4810_v1 = vsub.f32 %v7668_v51, %v7888_v53  ;;  %v4811_v49 = vsub.f32 %v7687_v11, %v7888_v53  ;;  %v4812_v20 = vsub.f32 %v7674_v22, %v7888_v53 }
 0x6e6   : > { %v4803_v52 = vsub.f32 %v4801_v7, %v4802_v61  ;;  %v4813_v33 = vsub.f32 %v7701_v2, %v7888_v53  ;;  %v4814_v21 = vsub.f32 %v7691_v24, %v7888_v53  ;;  %v4815_v46 = vsub.f32 %v7715_v27, %v7888_v53 }
 0x6e7   : > { %v4816_v23 = vsub.f32 %v7705_v44, %v7888_v53  ;;  %v4817_v51 = vsub.f32 %v7729_v6, %v7888_v53  ;;  %v4818_v11 = vsub.f32 %v7719_v55, %v7888_v53  ;;  %v4819_v22 = vsub.f32 %v7743_v58, %v7888_v53 }
 0x6e8   : > { %v4804_v43 = vmax.f32 %v4803_v52, 0.0  ;;  %v4820_v2 = vsub.f32 %v7733_v5, %v7888_v53  ;;  %v4821_v24 = vsub.f32 %v7757_v16, %v7888_v53  ;;  %v4822_v27 = vsub.f32 %v7747_v4, %v7888_v53 }
 0x6e9   : > { %v4823_v44 = vsub.f32 %v7771_v50, %v7888_v53  ;;  %v4824_v6 = vsub.f32 %v7761_v56, %v7888_v53  ;;  %v4825_v55 = vsub.f32 %v7785_v26, %v7888_v53  ;;  %v4826_v58 = vsub.f32 %v7775_v28, %v7888_v53 }
 0x6ea   : > { %v4805_v38 = vadd.f32 1e-05, %v4804_v43  ;;  %v4827_v5 = vsub.f32 %v7799_v19, %v7888_v53  ;;  %v4828_v16 = vsub.f32 %v7789_v57, %v7888_v53  ;;  %v4829_v4 = vsub.f32 %v7813_v60, %v7888_v53 }
 0x6eb   : > { %v4830_v50 = vsub.f32 %v7803_v35, %v7888_v53  ;;  %v4831_v56 = vsub.f32 %v7827_v36, %v7888_v53  ;;  %v4832_v26 = vsub.f32 %v7817_v48, %v7888_v53  ;;  %v4833_v28 = vsub.f32 %v7841_v54, %v7888_v53 }
 0x6ec   : > { %5277 = vrsqrt.f32 %v4805_v38  ;;  %v4834_v19 = vsub.f32 %v7831_v8, %v7888_v53  ;;  %v4835_v57 = vsub.f32 %v7855_v32, %v7888_v53  ;;  %v4836_v60 = vsub.f32 %v7849_v9, %v7888_v53 }
 0x6ed   : > { %v4837_v35 = vsub.f32 %v7875_v42, %v7888_v53  ;;  %v4838_v36 = vsub.f32 %v7871_v37, %v7888_v53 }
 0x6f9   : > { %v5278_v62 = vpop.eup %5277 }
 0x6fa   : > { %v4839_v48 = vmul.f32 %v5278_v62, %v4807_v45  ;;  %v4840_v59 = vmul.f32 %v5278_v62, %v4808_v15  ;;  %v4841_v63 = vmul.f32 %v5278_v62, %v4809_v41  ;;  %v4842_v54 = vmul.f32 %v5278_v62, %v4810_v1  ;;  %v8168_v15 = vld [vmem:[#allocation5_spill] sm:$0xff]  ;;  %v8169_v1 = vld [vmem:[#allocation7_spill] sm:$0xff] }
 0x6fb   : > { %v4843_v13 = vmul.f32 %v5278_v62, %v4811_v49  ;;  %v4844_v30 = vmul.f32 %v5278_v62, %v4812_v20  ;;  %v4845_v8 = vmul.f32 %v5278_v62, %v4813_v33  ;;  %v4846_v34 = vmul.f32 %v5278_v62, %v4814_v21  ;;  %v8170_v20 = vld [vmem:[#allocation4_spill] sm:$0xff]  ;;  %v8171_v21 = vld [vmem:[#allocation6_spill] sm:$0xff] }
 0x6fc   : > { %v4847_v18 = vmul.f32 %v5278_v62, %v4815_v46  ;;  %v4848_v12 = vmul.f32 %v5278_v62, %v4816_v23  ;;  %v4849_v32 = vmul.f32 %v5278_v62, %v4817_v51  ;;  %v4850_v14 = vmul.f32 %v5278_v62, %v4818_v11  ;;  %v8172_v23 = vld [vmem:[#allocation8_spill] sm:$0xff]  ;;  %v8173_v11 = vld [vmem:[#allocation9_spill] sm:$0xff] }
 0x6fd   : > { %v4851_v40 = vmul.f32 %v5278_v62, %v4819_v22  ;;  %v4852_v9 = vmul.f32 %v5278_v62, %v4820_v2  ;;  %v4853_v31 = vmul.f32 %v5278_v62, %v4821_v24  ;;  %v4854_v42 = vmul.f32 %v5278_v62, %v4822_v27  ;;  %v8174_v2 = vld [vmem:[#allocation10_spill] sm:$0xff]  ;;  %v8175_v27 = vld [vmem:[#allocation11_spill] sm:$0xff] }
 0x6fe   : > { %v4855_v3 = vmul.f32 %v5278_v62, %v4823_v44  ;;  %v4856_v0 = vmul.f32 %v5278_v62, %v4824_v6  ;;  %v4857_v37 = vmul.f32 %v5278_v62, %v4825_v55  ;;  %v4858_v25 = vmul.f32 %v5278_v62, %v4826_v58  ;;  %v8176_v6 = vld [vmem:[#allocation12_spill] sm:$0xff]  ;;  %v8177_v58 = vld [vmem:[#allocation13_spill] sm:$0xff] }
 0x6ff   : > { %v4859_v47 = vmul.f32 %v5278_v62, %v4827_v5  ;;  %v4860_v10 = vmul.f32 %v5278_v62, %v4828_v16  ;;  %v4861_v17 = vmul.f32 %v5278_v62, %v4829_v4  ;;  %v4862_v39 = vmul.f32 %v5278_v62, %v4830_v50  ;;  %v8178_v16 = vld [vmem:[#allocation14_spill] sm:$0xff]  ;;  %v8179_v50 = vld [vmem:[#allocation15_spill] sm:$0xff] }
 0x700   : > { %v4863_v29 = vmul.f32 %v5278_v62, %v4831_v56  ;;  %v4864_v53 = vmul.f32 %v5278_v62, %v4832_v26  ;;  %v4865_v7 = vmul.f32 %v5278_v62, %v4833_v28  ;;  %v4866_v61 = vmul.f32 %v5278_v62, %v4834_v19  ;;  %v8180_v26 = vld [vmem:[#allocation16_spill] sm:$0xff]  ;;  %v8181_v19 = vld [vmem:[#allocation17_spill] sm:$0xff] }
 0x701   : > { %v4867_v52 = vmul.f32 %v5278_v62, %v4835_v57  ;;  %v4868_v43 = vmul.f32 %v5278_v62, %v4836_v60  ;;  %v4869_v38 = vmul.f32 %v5278_v62, %v4837_v35  ;;  %v4870_v45 = vmul.f32 %v5278_v62, %v4838_v36  ;;  %v8182_v57 = vld [vmem:[#allocation18_spill] sm:$0xff]  ;;  %v8183_v35 = vld [vmem:[#allocation19_spill] sm:$0xff] }
 0x702   : > { %v4871_v41 = vadd.f32 %v4839_v48, %v8168_v15  ;;  %v4872_v49 = vadd.f32 %v4840_v59, %v8169_v1  ;;  %v4873_v33 = vadd.f32 %v4841_v63, %v8170_v20  ;;  %v4874_v46 = vadd.f32 %v4842_v54, %v8171_v21  ;;  %v8184_v48 = vld [vmem:[#allocation20_spill] sm:$0xff]  ;;  %v8185_v63 = vld [vmem:[#allocation21_spill] sm:$0xff] }
 0x703   : > { %v4875_v51 = vadd.f32 %v4843_v13, %v8172_v23  ;;  %v4876_v22 = vadd.f32 %v4844_v30, %v8173_v11  ;;  %v4877_v24 = vadd.f32 %v4845_v8, %v8174_v2  ;;  %v4878_v44 = vadd.f32 %v4846_v34, %v8175_v27  ;;  %v8186_v13 = vld [vmem:[#allocation22_spill] sm:$0xff]  ;;  %v8187_v8 = vld [vmem:[#allocation23_spill] sm:$0xff]  ;;  %v8197_v15 = vld [vmem:[#allocation33_spill] sm:$0xff] }
 0x704   : > { %v4879_v55 = vadd.f32 %v4847_v18, %v8176_v6  ;;  %v4880_v5 = vadd.f32 %v4848_v12, %v8177_v58  ;;  %v4881_v4 = vadd.f32 %v4849_v32, %v8178_v16  ;;  %v4882_v56 = vadd.f32 %v4850_v14, %v8179_v50  ;;  %4903 = vst.msk [vmem:[%s7961_s22] sm:$0xff] %vm204_vm0, %v4871_v41  ;;  %v8188_v18 = vld [vmem:[#allocation24_spill] sm:$0xff]  ;;  %v8189_v32 = vld [vmem:[#allocation25_spill] sm:$0xff]  ;;  %v8198_v41 = vld [vmem:[#allocation34_spill] sm:$0xff] }
 0x705   : > { %4904 = vst.msk [vmem:[%s7961_s22 + $0x8] sm:$0xff] %vm204_vm0, %v4872_v49  ;;  %4905 = vst.msk [vmem:[%s7961_s22 + $0x10] sm:$0xff] %vm204_vm0, %v4873_v33  ;;  %v4883_v28 = vadd.f32 %v4851_v40, %v8180_v26  ;;  %v4884_v62 = vadd.f32 %v4852_v9, %v8181_v19  ;;  %v4885_v60 = vadd.f32 %v4853_v31, %v8182_v57  ;;  %v8190_v40 = vld [vmem:[#allocation26_spill] sm:$0xff]  ;;  %v8191_v31 = vld [vmem:[#allocation27_spill] sm:$0xff] }
 0x706   : > { %4906 = vst.msk [vmem:[%s7961_s22 + $0x18] sm:$0xff] %vm204_vm0, %v4874_v46  ;;  %v4886_v36 = vadd.f32 %v4854_v42, %v8183_v35  ;;  %4907 = vst.msk [vmem:[%s7961_s22 + $0x20] sm:$0xff] %vm204_vm0, %v4875_v51  ;;  %v4887_v59 = vadd.f32 %v4855_v3, %v8184_v48  ;;  %v4888_v54 = vadd.f32 %v4856_v0, %v8185_v63  ;;  %v8192_v3 = vld [vmem:[#allocation28_spill] sm:$0xff] }
 0x707   : > { %4908 = vst.msk [vmem:[%s7961_s22 + $0x28] sm:$0xff] %vm204_vm0, %v4876_v22  ;;  %4909 = vst.msk [vmem:[%s7961_s22 + $0x30] sm:$0xff] %vm204_vm0, %v4877_v24  ;;  %v4889_v30 = vadd.f32 %v4857_v37, %v8186_v13  ;;  %v4890_v34 = vadd.f32 %v4858_v25, %v8187_v8  ;;  %v4891_v12 = vadd.f32 %v4859_v47, %v8188_v18  ;;  %v8193_v37 = vld [vmem:[#allocation29_spill] sm:$0xff]  ;;  %v8194_v47 = vld [vmem:[#allocation30_spill] sm:$0xff] }
 0x708   : > { %4910 = vst.msk [vmem:[%s7961_s22 + $0x38] sm:$0xff] %vm204_vm0, %v4878_v44  ;;  %4911 = vst.msk [vmem:[%s7961_s22 + $0x40] sm:$0xff] %vm204_vm0, %v4879_v55  ;;  %v4892_v14 = vadd.f32 %v4860_v10, %v8189_v32  ;;  %v4893_v9 = vadd.f32 %v4861_v17, %v8190_v40  ;;  %v4894_v42 = vadd.f32 %v4862_v39, %v8191_v31  ;;  %v8195_v17 = vld [vmem:[#allocation31_spill] sm:$0xff] }
 0x709   : > { %4912 = vst.msk [vmem:[%s7961_s22 + $0x48] sm:$0xff] %vm204_vm0, %v4880_v5  ;;  %4913 = vst.msk [vmem:[%s7961_s22 + $0x50] sm:$0xff] %vm204_vm0, %v4881_v4  ;;  %v4895_v0 = vadd.f32 %v4863_v29, %v8192_v3  ;;  %v4896_v25 = vadd.f32 %v4864_v53, %v8193_v37  ;;  %v4897_v10 = vadd.f32 %v4865_v7, %v8194_v47  ;;  %v8196_v29 = vld [vmem:[#allocation32_spill] sm:$0xff] }
 0x70a   : > { %4914 = vst.msk [vmem:[%s7961_s22 + $0x58] sm:$0xff] %vm204_vm0, %v4882_v56  ;;  %4915 = vst.msk [vmem:[%s7961_s22 + $0x60] sm:$0xff] %vm204_vm0, %v4883_v28  ;;  %v4898_v39 = vadd.f32 %v4866_v61, %v8195_v17  ;;  %v4899_v53 = vadd.f32 %v4867_v52, %v8196_v29  ;;  %v4900_v7 = vadd.f32 %v4868_v43, %v8197_v15  ;;  %v8199_v61 = vld [vmem:[#allocation37_spill] sm:$0xff] }
 0x70b   : > { %4916 = vst.msk [vmem:[%s7961_s22 + $0x68] sm:$0xff] %vm204_vm0, %v4884_v62  ;;  %4917 = vst.msk [vmem:[%s7961_s22 + $0x70] sm:$0xff] %vm204_vm0, %v4885_v60  ;;  %v4901_v1 = vadd.f32 %v4869_v38, %v8198_v41  ;;  %v4902_v49 = vadd.f32 %v4870_v45, %v8199_v61 }
 0x70c   : > { %4918 = vst.msk [vmem:[%s7961_s22 + $0x78] sm:$0xff] %vm204_vm0, %v4886_v36  ;;  %4919 = vst.msk [vmem:[%s7961_s22 + $0x80] sm:$0xff] %vm204_vm0, %v4887_v59 }
 0x70d   : > { %4920 = vst.msk [vmem:[%s7961_s22 + $0x88] sm:$0xff] %vm204_vm0, %v4888_v54  ;;  %4921 = vst.msk [vmem:[%s7961_s22 + $0x90] sm:$0xff] %vm204_vm0, %v4889_v30 }
 0x70e   : > { %4922 = vst.msk [vmem:[%s7961_s22 + $0x98] sm:$0xff] %vm204_vm0, %v4890_v34  ;;  %4923 = vst.msk [vmem:[%s7961_s22 + $0xa0] sm:$0xff] %vm204_vm0, %v4891_v12 }
 0x70f   : > { %4924 = vst.msk [vmem:[%s7961_s22 + $0xa8] sm:$0xff] %vm204_vm0, %v4892_v14  ;;  %4925 = vst.msk [vmem:[%s7961_s22 + $0xb0] sm:$0xff] %vm204_vm0, %v4893_v9 }
 0x710   : > { %4926 = vst.msk [vmem:[%s7961_s22 + $0xb8] sm:$0xff] %vm204_vm0, %v4894_v42  ;;  %4927 = vst.msk [vmem:[%s7961_s22 + $0xc0] sm:$0xff] %vm204_vm0, %v4895_v0 }
 0x711   : > { %4928 = vst.msk [vmem:[%s7961_s22 + $0xc8] sm:$0xff] %vm204_vm0, %v4896_v25  ;;  %4929 = vst.msk [vmem:[%s7961_s22 + $0xd0] sm:$0xff] %vm204_vm0, %v4897_v10 }
 0x712   : > { %4930 = vst.msk [vmem:[%s7961_s22 + $0xd8] sm:$0xff] %vm204_vm0, %v4898_v39  ;;  %4931 = vst.msk [vmem:[%s7961_s22 + $0xe0] sm:$0xff] %vm204_vm0, %v4899_v53 }
 0x713   : > { %4932 = vst.msk [vmem:[%s7961_s22 + $0xe8] sm:$0xff] %vm204_vm0, %v4900_v7  ;;  %4933 = vst.msk [vmem:[%s7961_s22 + $0xf0] sm:$0xff] %vm204_vm0, %v4901_v1 }
 0x714   : > { %4934 = vst.msk [vmem:[%s7961_s22 + $0xf8] sm:$0xff] %vm204_vm0, %v4902_v49 }
 0x715 PF: > { %s13_s12 = sadd.s32 1, %s5285_s12  }
 0x716   : > { %p10_p4 = scmp.ge.s32.totalorder %s13_s12, 4  }
 0x718   :  { %12 = sbr.rel (!%p10_p4) target bundleno = 1 (0x1), region = 65 }

</bundles_post_ra>
